<compile_context>
chip_gen: v5e
topology: v5e:2x2
jax: 0.10.0
libtpu: 0.0.40
codegen_flags: <defaults>
</compile_context>

<pallas_src>
import math

import jax
import jax.numpy as jnp
import numpy as np
from jax.experimental import pallas as pl
from jax.experimental.pallas import tpu as pltpu


def ivf_kernel(x_ir_ref, x_vis_ref,
               ca_ir_w1_ref, ca_ir_w2_ref,
               ca_vis_w1_ref, ca_vis_w2_ref,
               sa_ir_c1w_ref, sa_ir_m_ref, sa_ir_scal_ref,
               sa_vis_c1w_ref, sa_vis_m_ref, sa_vis_scal_ref,
               wmix_ref,
               out_ref):
    tb, C, HW = x_ir_ref.shape
    inv_hw = 1.0 / HW
    inv_c = 1.0 / C

    w_mix1 = wmix_ref[0]
    w_mix2 = wmix_ref[1]

    xi = x_ir_ref[...].astype(jnp.float32)     # (tb, C, HW), lane-dense
    xv = x_vis_ref[...].astype(jnp.float32)

    def ca_scale(x, w1_ref, w2_ref):
        """CANet sigmoid channel scales, shape (tb, C, 1)."""
        wa = w1_ref[...]                                   # (HID, C)
        wb = w2_ref[...]                                   # (C, HID)
        pm = jnp.max(x, axis=2, keepdims=True)             # AdaptiveMaxPool2d(1)
        pa = jnp.sum(x, axis=2, keepdims=True) * inv_hw    # AdaptiveAvgPool2d(1)
        outs = []
        for t in range(tb):                                # tiny per-example MLP
            p = jnp.concatenate([pm[t], pa[t]], axis=1)    # (C, 2): [max | avg]
            h = jnp.maximum(
                jnp.dot(wa, p, preferred_element_type=jnp.float32), 0.0)
            o = jnp.dot(wb, h, preferred_element_type=jnp.float32)   # (C, 2)
            outs.append(jax.nn.sigmoid(o[:, 0:1] + o[:, 1:2])[None])  # (1, C, 1)
        return jnp.concatenate(outs, axis=0)               # (tb, C, 1)

    def sa_scale(x, c1w_ref, m_ref, scal_ref):
        """SANet sigmoid spatial scale, shape (tb, 1, HW)."""
        c1b, a1, b1 = scal_ref[0], scal_ref[1], scal_ref[2]
        c2b, a2, b2 = scal_ref[3], scal_ref[4], scal_ref[5]
        c1w = c1w_ref[...]                                 # (C, 1)
        mstack = m_ref[...]                                # (3*HW, HW)

        # cbr1: 1x1 conv (C -> 1, bias) + BN + ReLU, batched over the block.
        x1 = jnp.sum(x * c1w[None, :, :], axis=1, keepdims=True)   # (tb, 1, HW)
        x1 = jnp.maximum(a1 * (x1 + c1b) + b1, 0.0)

        chmax = jnp.max(x, axis=1, keepdims=True)                   # (tb, 1, HW)
        chmean = jnp.sum(x, axis=1, keepdims=True) * inv_c          # (tb, 1, HW)

        outs = []
        for t in range(tb):
            # cbr2: 7x7 "same" conv (3 -> 1, bias) as a single MXU matmul
            # against the stacked dense conv operator, then BN + sigmoid.
            x2 = jnp.concatenate([chmax[t], chmean[t], x1[t]], axis=1)  # (1, 3*HW)
            y = jnp.dot(x2, mstack, preferred_element_type=jnp.float32)  # (1, HW)
            outs.append(jax.nn.sigmoid(a2 * (y + c2b) + b2)[None])       # (1, 1, HW)
        return jnp.concatenate(outs, axis=0)               # (tb, 1, HW)

    ca_i = ca_scale(xi, ca_ir_w1_ref, ca_ir_w2_ref)
    ca_v = ca_scale(xv, ca_vis_w1_ref, ca_vis_w2_ref)
    sa_i = sa_scale(xi, sa_ir_c1w_ref, sa_ir_m_ref, sa_ir_scal_ref)
    sa_v = sa_scale(xv, sa_vis_c1w_ref, sa_vis_m_ref, sa_vis_scal_ref)

    a_ir = ca_i * xi + xi          # CANet(ir)  output
    a_vis = ca_v * xv + xv         # CANet(vis) output
    s_ir = sa_i * xi + xi          # SANet(ir)  output
    s_vis = sa_v * xv + xv         # SANet(vis) output

    f_channel = (1.0 + a_ir) * xi + (1.0 + a_vis) * xv
    f_spatial = (1.0 + s_ir) * xi + (1.0 + s_vis) * xv
    out_ref[...] = (w_mix1 * f_channel + w_mix2 * f_spatial).astype(out_ref.dtype)


def _const_spec(shape):
    zeros = (0,) * len(shape)
    return pl.BlockSpec(shape, lambda b, _z=zeros: _z)


def _pick_tb(B, cap=8):
    # Largest divisor of B up to `cap`: bigger blocks amortize per-step
    # pipeline overhead; cap bounds VMEM usage and the tiny-matmul unroll.
    for cand in range(min(B, cap), 0, -1):
        if B % cand == 0:
            return cand
    return 1


def ivf_forward(x_ir, x_vis, params, *, tb=None):
    B, C, H, W = x_ir.shape
    HW = H * W
    if tb is None:
        tb = _pick_tb(B)
    assert B % tb == 0, "batch block size must divide the batch"

    # Lane-dense layout: (B, C, H*W); H*W is the minor (lane) dim.
    xi = x_ir.reshape(B, C, HW)
    xv = x_vis.reshape(B, C, HW)

    # Fusion mixing weights: softmax of the learned 2-vector (as in forward).
    e = jnp.exp(params["w"].astype(jnp.float32))
    wmix = e / jnp.sum(e)

    io_spec = pl.BlockSpec((tb, C, HW), lambda b: (b, 0, 0))
    smem = pl.BlockSpec(memory_space=pltpu.MemorySpace.SMEM)

    out = pl.pallas_call(
        ivf_kernel,
        grid=(B // tb,),
        in_specs=[io_spec, io_spec,
                  _const_spec(params["ca_ir_w1"].shape),
                  _const_spec(params["ca_ir_w2"].shape),
                  _const_spec(params["ca_vis_w1"].shape),
                  _const_spec(params["ca_vis_w2"].shape),
                  _const_spec(params["sa_ir_c1w"].shape),
                  _const_spec(params["sa_ir_m"].shape), smem,
                  _const_spec(params["sa_vis_c1w"].shape),
                  _const_spec(params["sa_vis_m"].shape), smem,
                  smem],
        out_specs=io_spec,
        out_shape=jax.ShapeDtypeStruct((B, C, HW), x_ir.dtype),
        compiler_params=pltpu.CompilerParams(
            dimension_semantics=("parallel",)),
    )(xi, xv,
      params["ca_ir_w1"], params["ca_ir_w2"],
      params["ca_vis_w1"], params["ca_vis_w2"],
      params["sa_ir_c1w"], params["sa_ir_m"], params["sa_ir_scal"],
      params["sa_vis_c1w"], params["sa_vis_m"], params["sa_vis_scal"],
      wmix)
    return out.reshape(B, C, H, W)


# ----------------------------------------------------------------------------
# Parameter construction (mirrors fresh nn.Module init; BN folded, eval stats)
# ----------------------------------------------------------------------------

def _uniform(key, shape, fan_in):
    bound = 1.0 / math.sqrt(fan_in)
    return jax.random.uniform(key, shape, jnp.float32, -bound, bound)


def _conv7x7_matrix(c2w, H, W):
    """Fold the 7x7 / pad=3 conv (3 -> 1, no bias) into a dense operator.

    Returns M of shape (3*H*W, H*W) such that
        y_flat = concat([x_max, x_mean, x_cbr1], axis=-1) @ M
    equals F.conv2d(x2, c2w, padding=3) flattened (zero padding built in).
    """
    w = np.asarray(c2w, np.float32).reshape(3, 7, 7)
    HW = H * W
    M = np.zeros((3, HW, HW), np.float32)
    io, jo = np.meshgrid(np.arange(H), np.arange(W), indexing="ij")
    p = (io * W + jo).ravel()
    for dy in range(7):
        for dx in range(7):
            ii = io + dy - 3
            jj = jo + dx - 3
            valid = ((ii >= 0) & (ii < H) & (jj >= 0) & (jj < W)).ravel()
            q = (np.clip(ii, 0, H - 1) * W + np.clip(jj, 0, W - 1)).ravel()
            qv, pv = q[valid], p[valid]
            for c in range(3):
                M[c, qv, pv] += w[c, dy, dx]
    return jnp.asarray(M.reshape(3 * HW, HW))


def init_params(key, C, H, W):
    if C < 2:
        raise ValueError("IVF needs C >= 2 (CANet reduction = C // 2).")
    HID = C // (C // 2)   # Conv2d(C, C // (C//2), 1) hidden width
    ks = list(jax.random.split(key, 4))

    def canet_w(k):
        k1, k2 = jax.random.split(k)
        w1 = _uniform(k1, (HID, C), C)      # Conv2d(C, HID, 1, bias=False)
        w2 = _uniform(k2, (C, HID), HID)    # Conv2d(HID, C, 1, bias=False)
        return w1, w2

    def bn_affine(gamma, beta, mean=0.0, var=1.0, eps=1e-5):
        a = gamma / math.sqrt(var + eps)
        return a, beta - a * mean

    def sanet_p(k):
        k1, k2, k3, k4 = jax.random.split(k, 4)
        c1w = _uniform(k1, (C, 1), C)               # Conv2d(C, 1, 1) weight
        c1b = float(_uniform(k2, (), C))            # Conv2d(C, 1, 1) bias
        c2w = _uniform(k3, (3, 7, 7), 3 * 49)       # Conv2d(3, 1, 7) weight
        c2b = float(_uniform(k4, (), 3 * 49))       # Conv2d(3, 1, 7) bias
        a1, b1 = bn_affine(1.0, 0.0)                # BatchNorm2d(1), eval stats
        a2, b2 = bn_affine(1.0, 0.0)
        scal = jnp.array([c1b, a1, b1, c2b, a2, b2], jnp.float32)
        return c1w, _conv7x7_matrix(c2w, H, W), scal, c2w

    ca_ir_w1, ca_ir_w2 = canet_w(ks[0])
    ca_vis_w1, ca_vis_w2 = canet_w(ks[1])
    sa_ir_c1w, sa_ir_m, sa_ir_scal, sa_ir_c2w = sanet_p(ks[2])
    sa_vis_c1w, sa_vis_m, sa_vis_scal, sa_vis_c2w = sanet_p(ks[3])

    return dict(
        ca_ir_w1=ca_ir_w1, ca_ir_w2=ca_ir_w2,
        ca_vis_w1=ca_vis_w1, ca_vis_w2=ca_vis_w2,
        sa_ir_c1w=sa_ir_c1w, sa_ir_m=sa_ir_m, sa_ir_scal=sa_ir_scal,
        sa_vis_c1w=sa_vis_c1w, sa_vis_m=sa_vis_m, sa_vis_scal=sa_vis_scal,
        w=jnp.ones((2,), jnp.float32),              # IVF.w (torch.ones(2))
        # raw 7x7 weights, kept only for the pure-JAX reference check
        sa_ir_c2w=sa_ir_c2w, sa_vis_c2w=sa_vis_c2w,
    )


# ----------------------------------------------------------------------------
# Pure-JAX reference (independent of the conv-operator fold), for self-check
# ----------------------------------------------------------------------------

def ivf_reference(x_ir, x_vis, params):
    def canet(x, w1, w2):
        B, C, H, W = x.shape
        xf = x.reshape(B, C, H * W)
        pm = jnp.max(xf, axis=-1)
        pa = jnp.mean(xf, axis=-1)

        def mlp(p):
            h = jnp.maximum(jnp.einsum("hc,bc->bh", w1, p), 0.0)
            return jnp.einsum("ch,bh->bc", w2, h)

        scale = jax.nn.sigmoid(mlp(pm) + mlp(pa))[:, :, None, None]
        return scale * x + x

    def sanet(x, c1w, c2w, scal):
        c1b, a1, b1, c2b, a2, b2 = (scal[i] for i in range(6))
        x1 = jnp.einsum("bchw,c->bhw", x, c1w[:, 0]) + c1b
        x1 = jnp.maximum(a1 * x1 + b1, 0.0)[:, None]
        x2 = jnp.concatenate([jnp.max(x, axis=1, keepdims=True),
                              jnp.mean(x, axis=1, keepdims=True), x1], axis=1)
        y = jax.lax.conv_general_dilated(
            x2, c2w[None], (1, 1), "SAME",
            dimension_numbers=("NCHW", "OIHW", "NCHW")) + c2b
        scale = jax.nn.sigmoid(a2 * y + b2)
        return scale * x + x

    a_ir = canet(x_ir, params["ca_ir_w1"], params["ca_ir_w2"])
    a_vis = canet(x_vis, params["ca_vis_w1"], params["ca_vis_w2"])
    f_channel = (1.0 + a_ir) * x_ir + (1.0 + a_vis) * x_vis
    s_ir = sanet(x_ir, params["sa_ir_c1w"], params["sa_ir_c2w"], params["sa_ir_scal"])
    s_vis = sanet(x_vis, params["sa_vis_c1w"], params["sa_vis_c2w"], params["sa_vis_scal"])
    f_spatial = (1.0 + s_ir) * x_ir + (1.0 + s_vis) * x_vis
    e = jnp.exp(params["w"])
    return (e[0] / jnp.sum(e)) * f_channel + (e[1] / jnp.sum(e)) * f_spatial


if __name__ == "__main__":
    key = jax.random.PRNGKey(0)
    k_ir, k_vis, k_p = jax.random.split(key, 3)
    B, C, H, W = 2, 4, 16, 16
    tensor_ir = jax.random.normal(k_ir, (B, C, H, W), jnp.float32)
    tensor_vis = jax.random.normal(k_vis, (B, C, H, W), jnp.float32)
    params = init_params(k_p, C, H, W)

    out = ivf_forward(tensor_ir, tensor_vis, params)
    jax.block_until_ready(out)
    assert out.shape == (B, C, H, W) and out.dtype == jnp.float32

    ref = ivf_reference(tensor_ir, tensor_vis, params)
    err = float(jnp.max(jnp.abs(out - ref)))
    scale = float(jnp.max(jnp.abs(ref)))
    # Tolerance accounts for reduced-precision MXU passes on both sides.
    assert err <= 1e-2 * scale + 1e-3, f"max abs error vs reference: {err}"
    print("KERNEL_OK")
</pallas_src>

<mosaic_0001>
module attributes {stable_mosaic.version = 11 : i64} {
  func.func @ivf_kernel(%arg0: i32, %arg1: memref<2x4x256xf32, #tpu.memory_space<vmem>>, %arg2: memref<2x4x256xf32, #tpu.memory_space<vmem>>, %arg3: memref<2x4xf32, #tpu.memory_space<vmem>>, %arg4: memref<4x2xf32, #tpu.memory_space<vmem>>, %arg5: memref<2x4xf32, #tpu.memory_space<vmem>>, %arg6: memref<4x2xf32, #tpu.memory_space<vmem>>, %arg7: memref<4x1xf32, #tpu.memory_space<vmem>>, %arg8: memref<768x256xf32, #tpu.memory_space<vmem>>, %arg9: memref<6xf32, #tpu.memory_space<smem>>, %arg10: memref<4x1xf32, #tpu.memory_space<vmem>>, %arg11: memref<768x256xf32, #tpu.memory_space<vmem>>, %arg12: memref<6xf32, #tpu.memory_space<smem>>, %arg13: memref<2xf32, #tpu.memory_space<smem>>, %arg14: memref<2x4x256xf32, #tpu.memory_space<vmem>>) attributes {dimension_semantics = [#tpu.dimension_semantics<parallel>], iteration_bounds = array<i64: 1>, scalar_prefetch = 0 : i64, scratch_operands = 0 : i64, tpu.core_type = #tpu.core_type<tc>, window_params = [{transform_indices = @transform_0, window_bounds = array<i64: 2, 4, 256>}, {transform_indices = @transform_1, window_bounds = array<i64: 2, 4, 256>}, {pipeline_mode = #tpu.pipeline_mode<synchronous>, transform_indices = @transform_2, window_bounds = array<i64: 2, 4>}, {pipeline_mode = #tpu.pipeline_mode<synchronous>, transform_indices = @transform_3, window_bounds = array<i64: 4, 2>}, {pipeline_mode = #tpu.pipeline_mode<synchronous>, transform_indices = @transform_4, window_bounds = array<i64: 2, 4>}, {pipeline_mode = #tpu.pipeline_mode<synchronous>, transform_indices = @transform_5, window_bounds = array<i64: 4, 2>}, {pipeline_mode = #tpu.pipeline_mode<synchronous>, transform_indices = @transform_6, window_bounds = array<i64: 4, 1>}, {pipeline_mode = #tpu.pipeline_mode<synchronous>, transform_indices = @transform_7, window_bounds = array<i64: 768, 256>}, {transform_indices = @transform_8, window_bounds = array<i64: 6>}, {pipeline_mode = #tpu.pipeline_mode<synchronous>, transform_indices = @transform_9, window_bounds = array<i64: 4, 1>}, {pipeline_mode = #tpu.pipeline_mode<synchronous>, transform_indices = @transform_10, window_bounds = array<i64: 768, 256>}, {transform_indices = @transform_11, window_bounds = array<i64: 6>}, {transform_indices = @transform_12, window_bounds = array<i64: 2>}, {transform_indices = @transform_13, window_bounds = array<i64: 2, 4, 256>}]} {
    %c0 = arith.constant 0 : index
    %0 = memref.load %arg13[%c0] : memref<2xf32, #tpu.memory_space<smem>>
    %c1 = arith.constant 1 : index
    %1 = memref.load %arg13[%c1] : memref<2xf32, #tpu.memory_space<smem>>
    %c0_0 = arith.constant 0 : index
    %c0_1 = arith.constant 0 : index
    %c0_2 = arith.constant 0 : index
    %2 = vector.load %arg1[%c0_0, %c0_1, %c0_2] : memref<2x4x256xf32, #tpu.memory_space<vmem>>, vector<2x4x256xf32>
    %c0_3 = arith.constant 0 : index
    %c0_4 = arith.constant 0 : index
    %c0_5 = arith.constant 0 : index
    %3 = vector.load %arg2[%c0_3, %c0_4, %c0_5] : memref<2x4x256xf32, #tpu.memory_space<vmem>>, vector<2x4x256xf32>
    %c0_6 = arith.constant 0 : index
    %c0_7 = arith.constant 0 : index
    %4 = vector.load %arg3[%c0_6, %c0_7] : memref<2x4xf32, #tpu.memory_space<vmem>>, vector<2x4xf32>
    %c0_8 = arith.constant 0 : index
    %c0_9 = arith.constant 0 : index
    %5 = vector.load %arg4[%c0_8, %c0_9] : memref<4x2xf32, #tpu.memory_space<vmem>>, vector<4x2xf32>
    %cst = arith.constant dense<0xFF800000> : vector<2x4xf32>
    %6 = vector.multi_reduction <maximumf>, %2, %cst [2] : vector<2x4x256xf32> to vector<2x4xf32>
    %7 = vector.shape_cast %6 : vector<2x4xf32> to vector<2x4x1xf32>
    %cst_10 = arith.constant dense<0.000000e+00> : vector<2x4xf32>
    %8 = vector.multi_reduction <add>, %2, %cst_10 [2] : vector<2x4x256xf32> to vector<2x4xf32>
    %9 = vector.shape_cast %8 : vector<2x4xf32> to vector<2x4x1xf32>
    %cst_11 = arith.constant 3.906250e-03 : f32
    %10 = vector.broadcast %cst_11 : f32 to vector<2x4x1xf32>
    %11 = arith.mulf %9, %10 : vector<2x4x1xf32>
    %12 = vector.extract_strided_slice %7 {offsets = [0, 0, 0], sizes = [1, 4, 1], strides = [1, 1, 1]} : vector<2x4x1xf32> to vector<1x4x1xf32>
    %13 = vector.shape_cast %12 : vector<1x4x1xf32> to vector<4x1xf32>
    %14 = vector.extract_strided_slice %11 {offsets = [0, 0, 0], sizes = [1, 4, 1], strides = [1, 1, 1]} : vector<2x4x1xf32> to vector<1x4x1xf32>
    %15 = vector.shape_cast %14 : vector<1x4x1xf32> to vector<4x1xf32>
    %16 = tpu.concatenate %13, %15 in 1 : vector<4x1xf32>, vector<4x1xf32> -> vector<4x2xf32>
    %cst_12 = arith.constant dense<0.000000e+00> : vector<2x2xf32>
    %17 = tpu.matmul %4, %16, %cst_12 {dimension_numbers = #tpu.dot_dimension_numbers<[1], [0], [0], [1], [0, 0, 1, 1], [], []>} : vector<2x4xf32>, vector<4x2xf32>, vector<2x2xf32> -> vector<2x2xf32>
    %cst_13 = arith.constant 0.000000e+00 : f32
    %18 = vector.broadcast %cst_13 : f32 to vector<2x2xf32>
    %19 = arith.maximumf %17, %18 : vector<2x2xf32>
    %cst_14 = arith.constant dense<0.000000e+00> : vector<4x2xf32>
    %20 = tpu.matmul %5, %19, %cst_14 {dimension_numbers = #tpu.dot_dimension_numbers<[1], [0], [0], [1], [0, 0, 1, 1], [], []>} : vector<4x2xf32>, vector<2x2xf32>, vector<4x2xf32> -> vector<4x2xf32>
    %21 = vector.extract_strided_slice %20 {offsets = [0, 0], sizes = [4, 1], strides = [1, 1]} : vector<4x2xf32> to vector<4x1xf32>
    %22 = vector.extract_strided_slice %20 {offsets = [0, 1], sizes = [4, 1], strides = [1, 1]} : vector<4x2xf32> to vector<4x1xf32>
    %23 = arith.addf %21, %22 : vector<4x1xf32>
    %24 = arith.negf %23 : vector<4x1xf32>
    %25 = math.exp %24 : vector<4x1xf32>
    %cst_15 = arith.constant 1.000000e+00 : f32
    %26 = vector.broadcast %cst_15 : f32 to vector<4x1xf32>
    %27 = arith.addf %26, %25 : vector<4x1xf32>
    %28 = arith.divf %26, %27 : vector<4x1xf32>
    %29 = vector.shape_cast %28 : vector<4x1xf32> to vector<1x4x1xf32>
    %30 = vector.extract_strided_slice %7 {offsets = [1, 0, 0], sizes = [1, 4, 1], strides = [1, 1, 1]} : vector<2x4x1xf32> to vector<1x4x1xf32>
    %31 = vector.shape_cast %30 : vector<1x4x1xf32> to vector<4x1xf32>
    %32 = vector.extract_strided_slice %11 {offsets = [1, 0, 0], sizes = [1, 4, 1], strides = [1, 1, 1]} : vector<2x4x1xf32> to vector<1x4x1xf32>
    %33 = vector.shape_cast %32 : vector<1x4x1xf32> to vector<4x1xf32>
    %34 = tpu.concatenate %31, %33 in 1 : vector<4x1xf32>, vector<4x1xf32> -> vector<4x2xf32>
    %cst_16 = arith.constant dense<0.000000e+00> : vector<2x2xf32>
    %35 = tpu.matmul %4, %34, %cst_16 {dimension_numbers = #tpu.dot_dimension_numbers<[1], [0], [0], [1], [0, 0, 1, 1], [], []>} : vector<2x4xf32>, vector<4x2xf32>, vector<2x2xf32> -> vector<2x2xf32>
    %cst_17 = arith.constant 0.000000e+00 : f32
    %36 = vector.broadcast %cst_17 : f32 to vector<2x2xf32>
    %37 = arith.maximumf %35, %36 : vector<2x2xf32>
    %cst_18 = arith.constant dense<0.000000e+00> : vector<4x2xf32>
    %38 = tpu.matmul %5, %37, %cst_18 {dimension_numbers = #tpu.dot_dimension_numbers<[1], [0], [0], [1], [0, 0, 1, 1], [], []>} : vector<4x2xf32>, vector<2x2xf32>, vector<4x2xf32> -> vector<4x2xf32>
    %39 = vector.extract_strided_slice %38 {offsets = [0, 0], sizes = [4, 1], strides = [1, 1]} : vector<4x2xf32> to vector<4x1xf32>
    %40 = vector.extract_strided_slice %38 {offsets = [0, 1], sizes = [4, 1], strides = [1, 1]} : vector<4x2xf32> to vector<4x1xf32>
    %41 = arith.addf %39, %40 : vector<4x1xf32>
    %42 = arith.negf %41 : vector<4x1xf32>
    %43 = math.exp %42 : vector<4x1xf32>
    %cst_19 = arith.constant 1.000000e+00 : f32
    %44 = vector.broadcast %cst_19 : f32 to vector<4x1xf32>
    %45 = arith.addf %44, %43 : vector<4x1xf32>
    %46 = arith.divf %44, %45 : vector<4x1xf32>
    %47 = vector.shape_cast %46 : vector<4x1xf32> to vector<1x4x1xf32>
    %48 = tpu.concatenate %29, %47 in 0 : vector<1x4x1xf32>, vector<1x4x1xf32> -> vector<2x4x1xf32>
    %c0_20 = arith.constant 0 : index
    %c0_21 = arith.constant 0 : index
    %49 = vector.load %arg5[%c0_20, %c0_21] : memref<2x4xf32, #tpu.memory_space<vmem>>, vector<2x4xf32>
    %c0_22 = arith.constant 0 : index
    %c0_23 = arith.constant 0 : index
    %50 = vector.load %arg6[%c0_22, %c0_23] : memref<4x2xf32, #tpu.memory_space<vmem>>, vector<4x2xf32>
    %cst_24 = arith.constant dense<0xFF800000> : vector<2x4xf32>
    %51 = vector.multi_reduction <maximumf>, %3, %cst_24 [2] : vector<2x4x256xf32> to vector<2x4xf32>
    %52 = vector.shape_cast %51 : vector<2x4xf32> to vector<2x4x1xf32>
    %cst_25 = arith.constant dense<0.000000e+00> : vector<2x4xf32>
    %53 = vector.multi_reduction <add>, %3, %cst_25 [2] : vector<2x4x256xf32> to vector<2x4xf32>
    %54 = vector.shape_cast %53 : vector<2x4xf32> to vector<2x4x1xf32>
    %cst_26 = arith.constant 3.906250e-03 : f32
    %55 = vector.broadcast %cst_26 : f32 to vector<2x4x1xf32>
    %56 = arith.mulf %54, %55 : vector<2x4x1xf32>
    %57 = vector.extract_strided_slice %52 {offsets = [0, 0, 0], sizes = [1, 4, 1], strides = [1, 1, 1]} : vector<2x4x1xf32> to vector<1x4x1xf32>
    %58 = vector.shape_cast %57 : vector<1x4x1xf32> to vector<4x1xf32>
    %59 = vector.extract_strided_slice %56 {offsets = [0, 0, 0], sizes = [1, 4, 1], strides = [1, 1, 1]} : vector<2x4x1xf32> to vector<1x4x1xf32>
    %60 = vector.shape_cast %59 : vector<1x4x1xf32> to vector<4x1xf32>
    %61 = tpu.concatenate %58, %60 in 1 : vector<4x1xf32>, vector<4x1xf32> -> vector<4x2xf32>
    %cst_27 = arith.constant dense<0.000000e+00> : vector<2x2xf32>
    %62 = tpu.matmul %49, %61, %cst_27 {dimension_numbers = #tpu.dot_dimension_numbers<[1], [0], [0], [1], [0, 0, 1, 1], [], []>} : vector<2x4xf32>, vector<4x2xf32>, vector<2x2xf32> -> vector<2x2xf32>
    %cst_28 = arith.constant 0.000000e+00 : f32
    %63 = vector.broadcast %cst_28 : f32 to vector<2x2xf32>
    %64 = arith.maximumf %62, %63 : vector<2x2xf32>
    %cst_29 = arith.constant dense<0.000000e+00> : vector<4x2xf32>
    %65 = tpu.matmul %50, %64, %cst_29 {dimension_numbers = #tpu.dot_dimension_numbers<[1], [0], [0], [1], [0, 0, 1, 1], [], []>} : vector<4x2xf32>, vector<2x2xf32>, vector<4x2xf32> -> vector<4x2xf32>
    %66 = vector.extract_strided_slice %65 {offsets = [0, 0], sizes = [4, 1], strides = [1, 1]} : vector<4x2xf32> to vector<4x1xf32>
    %67 = vector.extract_strided_slice %65 {offsets = [0, 1], sizes = [4, 1], strides = [1, 1]} : vector<4x2xf32> to vector<4x1xf32>
    %68 = arith.addf %66, %67 : vector<4x1xf32>
    %69 = arith.negf %68 : vector<4x1xf32>
    %70 = math.exp %69 : vector<4x1xf32>
    %cst_30 = arith.constant 1.000000e+00 : f32
    %71 = vector.broadcast %cst_30 : f32 to vector<4x1xf32>
    %72 = arith.addf %71, %70 : vector<4x1xf32>
    %73 = arith.divf %71, %72 : vector<4x1xf32>
    %74 = vector.shape_cast %73 : vector<4x1xf32> to vector<1x4x1xf32>
    %75 = vector.extract_strided_slice %52 {offsets = [1, 0, 0], sizes = [1, 4, 1], strides = [1, 1, 1]} : vector<2x4x1xf32> to vector<1x4x1xf32>
    %76 = vector.shape_cast %75 : vector<1x4x1xf32> to vector<4x1xf32>
    %77 = vector.extract_strided_slice %56 {offsets = [1, 0, 0], sizes = [1, 4, 1], strides = [1, 1, 1]} : vector<2x4x1xf32> to vector<1x4x1xf32>
    %78 = vector.shape_cast %77 : vector<1x4x1xf32> to vector<4x1xf32>
    %79 = tpu.concatenate %76, %78 in 1 : vector<4x1xf32>, vector<4x1xf32> -> vector<4x2xf32>
    %cst_31 = arith.constant dense<0.000000e+00> : vector<2x2xf32>
    %80 = tpu.matmul %49, %79, %cst_31 {dimension_numbers = #tpu.dot_dimension_numbers<[1], [0], [0], [1], [0, 0, 1, 1], [], []>} : vector<2x4xf32>, vector<4x2xf32>, vector<2x2xf32> -> vector<2x2xf32>
    %cst_32 = arith.constant 0.000000e+00 : f32
    %81 = vector.broadcast %cst_32 : f32 to vector<2x2xf32>
    %82 = arith.maximumf %80, %81 : vector<2x2xf32>
    %cst_33 = arith.constant dense<0.000000e+00> : vector<4x2xf32>
    %83 = tpu.matmul %50, %82, %cst_33 {dimension_numbers = #tpu.dot_dimension_numbers<[1], [0], [0], [1], [0, 0, 1, 1], [], []>} : vector<4x2xf32>, vector<2x2xf32>, vector<4x2xf32> -> vector<4x2xf32>
    %84 = vector.extract_strided_slice %83 {offsets = [0, 0], sizes = [4, 1], strides = [1, 1]} : vector<4x2xf32> to vector<4x1xf32>
    %85 = vector.extract_strided_slice %83 {offsets = [0, 1], sizes = [4, 1], strides = [1, 1]} : vector<4x2xf32> to vector<4x1xf32>
    %86 = arith.addf %84, %85 : vector<4x1xf32>
    %87 = arith.negf %86 : vector<4x1xf32>
    %88 = math.exp %87 : vector<4x1xf32>
    %cst_34 = arith.constant 1.000000e+00 : f32
    %89 = vector.broadcast %cst_34 : f32 to vector<4x1xf32>
    %90 = arith.addf %89, %88 : vector<4x1xf32>
    %91 = arith.divf %89, %90 : vector<4x1xf32>
    %92 = vector.shape_cast %91 : vector<4x1xf32> to vector<1x4x1xf32>
    %93 = tpu.concatenate %74, %92 in 0 : vector<1x4x1xf32>, vector<1x4x1xf32> -> vector<2x4x1xf32>
    %c0_35 = arith.constant 0 : index
    %94 = memref.load %arg9[%c0_35] : memref<6xf32, #tpu.memory_space<smem>>
    %c1_36 = arith.constant 1 : index
    %95 = memref.load %arg9[%c1_36] : memref<6xf32, #tpu.memory_space<smem>>
    %c2 = arith.constant 2 : index
    %96 = memref.load %arg9[%c2] : memref<6xf32, #tpu.memory_space<smem>>
    %c3 = arith.constant 3 : index
    %97 = memref.load %arg9[%c3] : memref<6xf32, #tpu.memory_space<smem>>
    %c4 = arith.constant 4 : index
    %98 = memref.load %arg9[%c4] : memref<6xf32, #tpu.memory_space<smem>>
    %c5 = arith.constant 5 : index
    %99 = memref.load %arg9[%c5] : memref<6xf32, #tpu.memory_space<smem>>
    %c0_37 = arith.constant 0 : index
    %c0_38 = arith.constant 0 : index
    %100 = vector.load %arg7[%c0_37, %c0_38] : memref<4x1xf32, #tpu.memory_space<vmem>>, vector<4x1xf32>
    %c0_39 = arith.constant 0 : index
    %c0_40 = arith.constant 0 : index
    %101 = vector.load %arg8[%c0_39, %c0_40] : memref<768x256xf32, #tpu.memory_space<vmem>>, vector<768x256xf32>
    %102 = vector.shape_cast %100 : vector<4x1xf32> to vector<1x4x1xf32>
    %103 = vector.broadcast %102 : vector<1x4x1xf32> to vector<2x4x256xf32>
    %104 = arith.mulf %2, %103 : vector<2x4x256xf32>
    %cst_41 = arith.constant dense<0.000000e+00> : vector<2x256xf32>
    %105 = vector.multi_reduction <add>, %104, %cst_41 [1] : vector<2x4x256xf32> to vector<2x256xf32>
    %106 = vector.shape_cast %105 : vector<2x256xf32> to vector<2x1x256xf32>
    %107 = vector.broadcast %94 : f32 to vector<2x1x256xf32>
    %108 = arith.addf %106, %107 : vector<2x1x256xf32>
    %109 = vector.broadcast %95 : f32 to vector<2x1x256xf32>
    %110 = arith.mulf %109, %108 : vector<2x1x256xf32>
    %111 = vector.broadcast %96 : f32 to vector<2x1x256xf32>
    %112 = arith.addf %110, %111 : vector<2x1x256xf32>
    %cst_42 = arith.constant 0.000000e+00 : f32
    %113 = vector.broadcast %cst_42 : f32 to vector<2x1x256xf32>
    %114 = arith.maximumf %112, %113 : vector<2x1x256xf32>
    %cst_43 = arith.constant dense<0xFF800000> : vector<2x256xf32>
    %115 = vector.multi_reduction <maximumf>, %2, %cst_43 [1] : vector<2x4x256xf32> to vector<2x256xf32>
    %116 = vector.shape_cast %115 : vector<2x256xf32> to vector<2x1x256xf32>
    %cst_44 = arith.constant dense<0.000000e+00> : vector<2x256xf32>
    %117 = vector.multi_reduction <add>, %2, %cst_44 [1] : vector<2x4x256xf32> to vector<2x256xf32>
    %118 = vector.shape_cast %117 : vector<2x256xf32> to vector<2x1x256xf32>
    %cst_45 = arith.constant 2.500000e-01 : f32
    %119 = vector.broadcast %cst_45 : f32 to vector<2x1x256xf32>
    %120 = arith.mulf %118, %119 : vector<2x1x256xf32>
    %121 = vector.extract_strided_slice %116 {offsets = [0, 0, 0], sizes = [1, 1, 256], strides = [1, 1, 1]} : vector<2x1x256xf32> to vector<1x1x256xf32>
    %122 = vector.shape_cast %121 : vector<1x1x256xf32> to vector<1x256xf32>
    %123 = vector.extract_strided_slice %120 {offsets = [0, 0, 0], sizes = [1, 1, 256], strides = [1, 1, 1]} : vector<2x1x256xf32> to vector<1x1x256xf32>
    %124 = vector.shape_cast %123 : vector<1x1x256xf32> to vector<1x256xf32>
    %125 = vector.extract_strided_slice %114 {offsets = [0, 0, 0], sizes = [1, 1, 256], strides = [1, 1, 1]} : vector<2x1x256xf32> to vector<1x1x256xf32>
    %126 = vector.shape_cast %125 : vector<1x1x256xf32> to vector<1x256xf32>
    %127 = tpu.concatenate %122, %124, %126 in 1 : vector<1x256xf32>, vector<1x256xf32>, vector<1x256xf32> -> vector<1x768xf32>
    %cst_46 = arith.constant dense<0.000000e+00> : vector<1x256xf32>
    %128 = tpu.matmul %127, %101, %cst_46 {dimension_numbers = #tpu.dot_dimension_numbers<[1], [0], [0], [1], [0, 0, 1, 1], [], []>} : vector<1x768xf32>, vector<768x256xf32>, vector<1x256xf32> -> vector<1x256xf32>
    %129 = vector.broadcast %97 : f32 to vector<1x256xf32>
    %130 = arith.addf %128, %129 : vector<1x256xf32>
    %131 = vector.broadcast %98 : f32 to vector<1x256xf32>
    %132 = arith.mulf %131, %130 : vector<1x256xf32>
    %133 = vector.broadcast %99 : f32 to vector<1x256xf32>
    %134 = arith.addf %132, %133 : vector<1x256xf32>
    %135 = arith.negf %134 : vector<1x256xf32>
    %136 = math.exp %135 : vector<1x256xf32>
    %cst_47 = arith.constant 1.000000e+00 : f32
    %137 = vector.broadcast %cst_47 : f32 to vector<1x256xf32>
    %138 = arith.addf %137, %136 : vector<1x256xf32>
    %139 = arith.divf %137, %138 : vector<1x256xf32>
    %140 = vector.shape_cast %139 : vector<1x256xf32> to vector<1x1x256xf32>
    %141 = vector.extract_strided_slice %116 {offsets = [1, 0, 0], sizes = [1, 1, 256], strides = [1, 1, 1]} : vector<2x1x256xf32> to vector<1x1x256xf32>
    %142 = vector.shape_cast %141 : vector<1x1x256xf32> to vector<1x256xf32>
    %143 = vector.extract_strided_slice %120 {offsets = [1, 0, 0], sizes = [1, 1, 256], strides = [1, 1, 1]} : vector<2x1x256xf32> to vector<1x1x256xf32>
    %144 = vector.shape_cast %143 : vector<1x1x256xf32> to vector<1x256xf32>
    %145 = vector.extract_strided_slice %114 {offsets = [1, 0, 0], sizes = [1, 1, 256], strides = [1, 1, 1]} : vector<2x1x256xf32> to vector<1x1x256xf32>
    %146 = vector.shape_cast %145 : vector<1x1x256xf32> to vector<1x256xf32>
    %147 = tpu.concatenate %142, %144, %146 in 1 : vector<1x256xf32>, vector<1x256xf32>, vector<1x256xf32> -> vector<1x768xf32>
    %cst_48 = arith.constant dense<0.000000e+00> : vector<1x256xf32>
    %148 = tpu.matmul %147, %101, %cst_48 {dimension_numbers = #tpu.dot_dimension_numbers<[1], [0], [0], [1], [0, 0, 1, 1], [], []>} : vector<1x768xf32>, vector<768x256xf32>, vector<1x256xf32> -> vector<1x256xf32>
    %149 = vector.broadcast %97 : f32 to vector<1x256xf32>
    %150 = arith.addf %148, %149 : vector<1x256xf32>
    %151 = vector.broadcast %98 : f32 to vector<1x256xf32>
    %152 = arith.mulf %151, %150 : vector<1x256xf32>
    %153 = vector.broadcast %99 : f32 to vector<1x256xf32>
    %154 = arith.addf %152, %153 : vector<1x256xf32>
    %155 = arith.negf %154 : vector<1x256xf32>
    %156 = math.exp %155 : vector<1x256xf32>
    %cst_49 = arith.constant 1.000000e+00 : f32
    %157 = vector.broadcast %cst_49 : f32 to vector<1x256xf32>
    %158 = arith.addf %157, %156 : vector<1x256xf32>
    %159 = arith.divf %157, %158 : vector<1x256xf32>
    %160 = vector.shape_cast %159 : vector<1x256xf32> to vector<1x1x256xf32>
    %161 = tpu.concatenate %140, %160 in 0 : vector<1x1x256xf32>, vector<1x1x256xf32> -> vector<2x1x256xf32>
    %c0_50 = arith.constant 0 : index
    %162 = memref.load %arg12[%c0_50] : memref<6xf32, #tpu.memory_space<smem>>
    %c1_51 = arith.constant 1 : index
    %163 = memref.load %arg12[%c1_51] : memref<6xf32, #tpu.memory_space<smem>>
    %c2_52 = arith.constant 2 : index
    %164 = memref.load %arg12[%c2_52] : memref<6xf32, #tpu.memory_space<smem>>
    %c3_53 = arith.constant 3 : index
    %165 = memref.load %arg12[%c3_53] : memref<6xf32, #tpu.memory_space<smem>>
    %c4_54 = arith.constant 4 : index
    %166 = memref.load %arg12[%c4_54] : memref<6xf32, #tpu.memory_space<smem>>
    %c5_55 = arith.constant 5 : index
    %167 = memref.load %arg12[%c5_55] : memref<6xf32, #tpu.memory_space<smem>>
    %c0_56 = arith.constant 0 : index
    %c0_57 = arith.constant 0 : index
    %168 = vector.load %arg10[%c0_56, %c0_57] : memref<4x1xf32, #tpu.memory_space<vmem>>, vector<4x1xf32>
    %c0_58 = arith.constant 0 : index
    %c0_59 = arith.constant 0 : index
    %169 = vector.load %arg11[%c0_58, %c0_59] : memref<768x256xf32, #tpu.memory_space<vmem>>, vector<768x256xf32>
    %170 = vector.shape_cast %168 : vector<4x1xf32> to vector<1x4x1xf32>
    %171 = vector.broadcast %170 : vector<1x4x1xf32> to vector<2x4x256xf32>
    %172 = arith.mulf %3, %171 : vector<2x4x256xf32>
    %cst_60 = arith.constant dense<0.000000e+00> : vector<2x256xf32>
    %173 = vector.multi_reduction <add>, %172, %cst_60 [1] : vector<2x4x256xf32> to vector<2x256xf32>
    %174 = vector.shape_cast %173 : vector<2x256xf32> to vector<2x1x256xf32>
    %175 = vector.broadcast %162 : f32 to vector<2x1x256xf32>
    %176 = arith.addf %174, %175 : vector<2x1x256xf32>
    %177 = vector.broadcast %163 : f32 to vector<2x1x256xf32>
    %178 = arith.mulf %177, %176 : vector<2x1x256xf32>
    %179 = vector.broadcast %164 : f32 to vector<2x1x256xf32>
    %180 = arith.addf %178, %179 : vector<2x1x256xf32>
    %cst_61 = arith.constant 0.000000e+00 : f32
    %181 = vector.broadcast %cst_61 : f32 to vector<2x1x256xf32>
    %182 = arith.maximumf %180, %181 : vector<2x1x256xf32>
    %cst_62 = arith.constant dense<0xFF800000> : vector<2x256xf32>
    %183 = vector.multi_reduction <maximumf>, %3, %cst_62 [1] : vector<2x4x256xf32> to vector<2x256xf32>
    %184 = vector.shape_cast %183 : vector<2x256xf32> to vector<2x1x256xf32>
    %cst_63 = arith.constant dense<0.000000e+00> : vector<2x256xf32>
    %185 = vector.multi_reduction <add>, %3, %cst_63 [1] : vector<2x4x256xf32> to vector<2x256xf32>
    %186 = vector.shape_cast %185 : vector<2x256xf32> to vector<2x1x256xf32>
    %cst_64 = arith.constant 2.500000e-01 : f32
    %187 = vector.broadcast %cst_64 : f32 to vector<2x1x256xf32>
    %188 = arith.mulf %186, %187 : vector<2x1x256xf32>
    %189 = vector.extract_strided_slice %184 {offsets = [0, 0, 0], sizes = [1, 1, 256], strides = [1, 1, 1]} : vector<2x1x256xf32> to vector<1x1x256xf32>
    %190 = vector.shape_cast %189 : vector<1x1x256xf32> to vector<1x256xf32>
    %191 = vector.extract_strided_slice %188 {offsets = [0, 0, 0], sizes = [1, 1, 256], strides = [1, 1, 1]} : vector<2x1x256xf32> to vector<1x1x256xf32>
    %192 = vector.shape_cast %191 : vector<1x1x256xf32> to vector<1x256xf32>
    %193 = vector.extract_strided_slice %182 {offsets = [0, 0, 0], sizes = [1, 1, 256], strides = [1, 1, 1]} : vector<2x1x256xf32> to vector<1x1x256xf32>
    %194 = vector.shape_cast %193 : vector<1x1x256xf32> to vector<1x256xf32>
    %195 = tpu.concatenate %190, %192, %194 in 1 : vector<1x256xf32>, vector<1x256xf32>, vector<1x256xf32> -> vector<1x768xf32>
    %cst_65 = arith.constant dense<0.000000e+00> : vector<1x256xf32>
    %196 = tpu.matmul %195, %169, %cst_65 {dimension_numbers = #tpu.dot_dimension_numbers<[1], [0], [0], [1], [0, 0, 1, 1], [], []>} : vector<1x768xf32>, vector<768x256xf32>, vector<1x256xf32> -> vector<1x256xf32>
    %197 = vector.broadcast %165 : f32 to vector<1x256xf32>
    %198 = arith.addf %196, %197 : vector<1x256xf32>
    %199 = vector.broadcast %166 : f32 to vector<1x256xf32>
    %200 = arith.mulf %199, %198 : vector<1x256xf32>
    %201 = vector.broadcast %167 : f32 to vector<1x256xf32>
    %202 = arith.addf %200, %201 : vector<1x256xf32>
    %203 = arith.negf %202 : vector<1x256xf32>
    %204 = math.exp %203 : vector<1x256xf32>
    %cst_66 = arith.constant 1.000000e+00 : f32
    %205 = vector.broadcast %cst_66 : f32 to vector<1x256xf32>
    %206 = arith.addf %205, %204 : vector<1x256xf32>
    %207 = arith.divf %205, %206 : vector<1x256xf32>
    %208 = vector.shape_cast %207 : vector<1x256xf32> to vector<1x1x256xf32>
    %209 = vector.extract_strided_slice %184 {offsets = [1, 0, 0], sizes = [1, 1, 256], strides = [1, 1, 1]} : vector<2x1x256xf32> to vector<1x1x256xf32>
    %210 = vector.shape_cast %209 : vector<1x1x256xf32> to vector<1x256xf32>
    %211 = vector.extract_strided_slice %188 {offsets = [1, 0, 0], sizes = [1, 1, 256], strides = [1, 1, 1]} : vector<2x1x256xf32> to vector<1x1x256xf32>
    %212 = vector.shape_cast %211 : vector<1x1x256xf32> to vector<1x256xf32>
    %213 = vector.extract_strided_slice %182 {offsets = [1, 0, 0], sizes = [1, 1, 256], strides = [1, 1, 1]} : vector<2x1x256xf32> to vector<1x1x256xf32>
    %214 = vector.shape_cast %213 : vector<1x1x256xf32> to vector<1x256xf32>
    %215 = tpu.concatenate %210, %212, %214 in 1 : vector<1x256xf32>, vector<1x256xf32>, vector<1x256xf32> -> vector<1x768xf32>
    %cst_67 = arith.constant dense<0.000000e+00> : vector<1x256xf32>
    %216 = tpu.matmul %215, %169, %cst_67 {dimension_numbers = #tpu.dot_dimension_numbers<[1], [0], [0], [1], [0, 0, 1, 1], [], []>} : vector<1x768xf32>, vector<768x256xf32>, vector<1x256xf32> -> vector<1x256xf32>
    %217 = vector.broadcast %165 : f32 to vector<1x256xf32>
    %218 = arith.addf %216, %217 : vector<1x256xf32>
    %219 = vector.broadcast %166 : f32 to vector<1x256xf32>
    %220 = arith.mulf %219, %218 : vector<1x256xf32>
    %221 = vector.broadcast %167 : f32 to vector<1x256xf32>
    %222 = arith.addf %220, %221 : vector<1x256xf32>
    %223 = arith.negf %222 : vector<1x256xf32>
    %224 = math.exp %223 : vector<1x256xf32>
    %cst_68 = arith.constant 1.000000e+00 : f32
    %225 = vector.broadcast %cst_68 : f32 to vector<1x256xf32>
    %226 = arith.addf %225, %224 : vector<1x256xf32>
    %227 = arith.divf %225, %226 : vector<1x256xf32>
    %228 = vector.shape_cast %227 : vector<1x256xf32> to vector<1x1x256xf32>
    %229 = tpu.concatenate %208, %228 in 0 : vector<1x1x256xf32>, vector<1x1x256xf32> -> vector<2x1x256xf32>
    %230 = vector.broadcast %48 : vector<2x4x1xf32> to vector<2x4x256xf32>
    %231 = arith.mulf %230, %2 : vector<2x4x256xf32>
    %232 = arith.addf %231, %2 : vector<2x4x256xf32>
    %233 = vector.broadcast %93 : vector<2x4x1xf32> to vector<2x4x256xf32>
    %234 = arith.mulf %233, %3 : vector<2x4x256xf32>
    %235 = arith.addf %234, %3 : vector<2x4x256xf32>
    %236 = vector.broadcast %161 : vector<2x1x256xf32> to vector<2x4x256xf32>
    %237 = arith.mulf %236, %2 : vector<2x4x256xf32>
    %238 = arith.addf %237, %2 : vector<2x4x256xf32>
    %239 = vector.broadcast %229 : vector<2x1x256xf32> to vector<2x4x256xf32>
    %240 = arith.mulf %239, %3 : vector<2x4x256xf32>
    %241 = arith.addf %240, %3 : vector<2x4x256xf32>
    %cst_69 = arith.constant 1.000000e+00 : f32
    %242 = vector.broadcast %cst_69 : f32 to vector<2x4x256xf32>
    %243 = arith.addf %242, %232 : vector<2x4x256xf32>
    %244 = arith.mulf %243, %2 : vector<2x4x256xf32>
    %cst_70 = arith.constant 1.000000e+00 : f32
    %245 = vector.broadcast %cst_70 : f32 to vector<2x4x256xf32>
    %246 = arith.addf %245, %235 : vector<2x4x256xf32>
    %247 = arith.mulf %246, %3 : vector<2x4x256xf32>
    %248 = arith.addf %244, %247 : vector<2x4x256xf32>
    %cst_71 = arith.constant 1.000000e+00 : f32
    %249 = vector.broadcast %cst_71 : f32 to vector<2x4x256xf32>
    %250 = arith.addf %249, %238 : vector<2x4x256xf32>
    %251 = arith.mulf %250, %2 : vector<2x4x256xf32>
    %cst_72 = arith.constant 1.000000e+00 : f32
    %252 = vector.broadcast %cst_72 : f32 to vector<2x4x256xf32>
    %253 = arith.addf %252, %241 : vector<2x4x256xf32>
    %254 = arith.mulf %253, %3 : vector<2x4x256xf32>
    %255 = arith.addf %251, %254 : vector<2x4x256xf32>
    %256 = vector.broadcast %0 : f32 to vector<2x4x256xf32>
    %257 = arith.mulf %256, %248 : vector<2x4x256xf32>
    %258 = vector.broadcast %1 : f32 to vector<2x4x256xf32>
    %259 = arith.mulf %258, %255 : vector<2x4x256xf32>
    %260 = arith.addf %257, %259 : vector<2x4x256xf32>
    %c0_73 = arith.constant 0 : index
    %c0_74 = arith.constant 0 : index
    %c0_75 = arith.constant 0 : index
    %261 = vector.load %arg14[%c0_73, %c0_74, %c0_75] : memref<2x4x256xf32, #tpu.memory_space<vmem>>, vector<2x4x256xf32>
    tpu.vector_store %arg14[%c0_73, %c0_74, %c0_75], %260 {strides = array<i32>} : memref<2x4x256xf32, #tpu.memory_space<vmem>>, vector<2x4x256xf32>,
    return
  }
  func.func @transform_0(%arg0: i32) -> (i32, i32, i32) {
    %c0_i32 = arith.constant 0 : i32
    %c0_i32_0 = arith.constant 0 : i32
    %c0_i32_1 = arith.constant 0 : i32
    return %arg0, %c0_i32, %c0_i32_0 : i32, i32, i32
  }
  func.func @transform_1(%arg0: i32) -> (i32, i32, i32) {
    %c0_i32 = arith.constant 0 : i32
    %c0_i32_0 = arith.constant 0 : i32
    %c0_i32_1 = arith.constant 0 : i32
    return %arg0, %c0_i32, %c0_i32_0 : i32, i32, i32
  }
  func.func @transform_2(%arg0: i32) -> (i32, i32) {
    %c0_i32 = arith.constant 0 : i32
    %c0_i32_0 = arith.constant 0 : i32
    %c0_i32_1 = arith.constant 0 : i32
    return %c0_i32, %c0_i32_0 : i32, i32
  }
  func.func @transform_3(%arg0: i32) -> (i32, i32) {
    %c0_i32 = arith.constant 0 : i32
    %c0_i32_0 = arith.constant 0 : i32
    %c0_i32_1 = arith.constant 0 : i32
    return %c0_i32, %c0_i32_0 : i32, i32
  }
  func.func @transform_4(%arg0: i32) -> (i32, i32) {
    %c0_i32 = arith.constant 0 : i32
    %c0_i32_0 = arith.constant 0 : i32
    %c0_i32_1 = arith.constant 0 : i32
    return %c0_i32, %c0_i32_0 : i32, i32
  }
  func.func @transform_5(%arg0: i32) -> (i32, i32) {
    %c0_i32 = arith.constant 0 : i32
    %c0_i32_0 = arith.constant 0 : i32
    %c0_i32_1 = arith.constant 0 : i32
    return %c0_i32, %c0_i32_0 : i32, i32
  }
  func.func @transform_6(%arg0: i32) -> (i32, i32) {
    %c0_i32 = arith.constant 0 : i32
    %c0_i32_0 = arith.constant 0 : i32
    %c0_i32_1 = arith.constant 0 : i32
    return %c0_i32, %c0_i32_0 : i32, i32
  }
  func.func @transform_7(%arg0: i32) -> (i32, i32) {
    %c0_i32 = arith.constant 0 : i32
    %c0_i32_0 = arith.constant 0 : i32
    %c0_i32_1 = arith.constant 0 : i32
    return %c0_i32, %c0_i32_0 : i32, i32
  }
  func.func @transform_8(%arg0: i32) -> i32 {
    %c0_i32 = arith.constant 0 : i32
    %c0_i32_0 = arith.constant 0 : i32
    return %c0_i32 : i32
  }
  func.func @transform_9(%arg0: i32) -> (i32, i32) {
    %c0_i32 = arith.constant 0 : i32
    %c0_i32_0 = arith.constant 0 : i32
    %c0_i32_1 = arith.constant 0 : i32
    return %c0_i32, %c0_i32_0 : i32, i32
  }
  func.func @transform_10(%arg0: i32) -> (i32, i32) {
    %c0_i32 = arith.constant 0 : i32
    %c0_i32_0 = arith.constant 0 : i32
    %c0_i32_1 = arith.constant 0 : i32
    return %c0_i32, %c0_i32_0 : i32, i32
  }
  func.func @transform_11(%arg0: i32) -> i32 {
    %c0_i32 = arith.constant 0 : i32
    %c0_i32_0 = arith.constant 0 : i32
    return %c0_i32 : i32
  }
  func.func @transform_12(%arg0: i32) -> i32 {
    %c0_i32 = arith.constant 0 : i32
    %c0_i32_0 = arith.constant 0 : i32
    return %c0_i32 : i32
  }
  func.func @transform_13(%arg0: i32) -> (i32, i32, i32) {
    %c0_i32 = arith.constant 0 : i32
    %c0_i32_0 = arith.constant 0 : i32
    %c0_i32_1 = arith.constant 0 : i32
    return %arg0, %c0_i32, %c0_i32_0 : i32, i32, i32
  }
}

</mosaic_0001>

<bundles_post_ra>
// kernel: tpu_custom_call.1
= control target key start
LH: loop header
LB: loop body
LE: loop exit
PB: predicated region body
PF: predicated region fallthrough
CT: control target
= control target key end

     0   :  { %18 = vsyncpa [#allocation3], 0  ;;  %s5261_s0 = inlined_call_operand.hbm [shape: f32[2,4,256], index: 0, kind: input, shape index: {}]   ;;  %s5262_s1 = inlined_call_operand.hbm [shape: f32[2,4,256], index: 1, kind: input, shape index: {}]   ;;  %s5263_s2 = inlined_call_operand.vmem [shape: f32[2,4], index: 2, kind: input, shape index: {}]   ;;  %s5264_s3 = inlined_call_operand.vmem [shape: f32[4,2], index: 3, kind: input, shape index: {}]   ;;  %s5265_s4 = inlined_call_operand.vmem [shape: f32[2,4], index: 4, kind: input, shape index: {}]   ;;  %s5266_s5 = inlined_call_operand.vmem [shape: f32[4,2], index: 5, kind: input, shape index: {}]   ;;  %s5267_s6 = inlined_call_operand.vmem [shape: f32[4,1], index: 6, kind: input, shape index: {}]   ;;  %s5268_s7 = inlined_call_operand.hbm [shape: f32[768,256], index: 7, kind: input, shape index: {}]   ;;  %s5269_s8 = inlined_call_operand.vmem [shape: f32[6], index: 8, kind: input, shape index: {}]   ;;  %s5270_s9 = inlined_call_operand.vmem [shape: f32[4,1], index: 9, kind: input, shape index: {}]   ;;  %s5271_s10 = inlined_call_operand.hbm [shape: f32[768,256], index: 10, kind: input, shape index: {}]   ;;  %s5272_s11 = inlined_call_operand.vmem [shape: f32[6], index: 11, kind: input, shape index: {}]   ;;  %s5273_s12 = inlined_call_operand.vmem [shape: f32[2], index: 12, kind: input, shape index: {}]   ;;  %s5274_s13 = inlined_call_operand.hbm [shape: f32[2,4,256], index: 13, kind: output, shape index: {}]  }
   0x1   :  { %19 = vsyncpa [#allocation7], 0 }
   0x2   :  { %20 = vsyncpa [#allocation5], 0 }
   0x3   :  { %21 = vsyncpa [#allocation11], 0 }
   0x4   :  { %22 = vsyncpa [#allocation13], 0 }
   0x5   :  { %23 = vsyncpa [#allocation4], 0  ;;  %s41_s27 = sshll.u32 %s5262_s1, 4  ;;  %s2943_s28 = smov [#allocation6]   ;;  %s42_s27 = int_to_ptr.hbm [resolvable:$true] %s41_s27 }
   0x6   :  { %s43_s29 = sshll.u32 %s2943_s28, 4  ;;  %s102_s15 = sshll.u32 %s5272_s11, 4  ;;  %s44_s29 = int_to_ptr.vmem [resolvable:$true] %s43_s29  ;;  %s103_s15 = int_to_ptr.vmem [resolvable:$true] %s102_s15 }
   0x7   :  { %s2944_s16 = smov 128   ;;  %s2945_s17 = smov 8  }
   0x8   :  { %49 = dma.hbm_to_vmem [thread:$0]  %s42_s27, 256, %s44_s29, [#allocation7], %s2944_s16, %s2944_s16, %s2945_s17  }
   0x9   :  { %s2946_s18 = smov [#allocation12]   ;;  %s28_s1 = sshll.u32 %s5261_s0, 4  ;;  %s29_s1 = int_to_ptr.hbm [resolvable:$true] %s28_s1 }
   0xa   :  { %105 = dma.vmem_to_smem %s103_s15, 16, %s2946_s18, [#allocation13]  }
   0xb   :  { %s2947_s21 = smov [#allocation2]   ;;  %s64_s11 = sshll.u32 %s5268_s7, 4  ;;  %s65_s11 = int_to_ptr.hbm [resolvable:$true] %s64_s11 }
   0xc   :  { %s30_s22 = sshll.u32 %s2947_s21, 4  ;;  %s2948_s25 = smov [#allocation8]   ;;  %s31_s22 = int_to_ptr.vmem [resolvable:$true] %s30_s22 }
   0xd   :  { %36 = dma.hbm_to_vmem [thread:$0]  %s29_s1, 256, %s31_s22, [#allocation3], %s2944_s16, %s2944_s16, %s2945_s17  }
   0xe   :  { %s66_s26 = sshll.u32 %s2948_s25, 4  ;;  %s2949_s27 = smov 256   ;;  %s67_s26 = int_to_ptr.vmem [resolvable:$true] %s66_s26 }
   0xf   :  { %s2950_s28 = smov 16   ;;  %s78_s30 = sshll.u32 %s5269_s8, 4  ;;  %s79_s30 = int_to_ptr.vmem [resolvable:$true] %s78_s30 }
  0x10   :  { %72 = dma.hbm_to_vmem [thread:$0]  %s65_s11, 24576, %s67_s26, [#allocation7], %s2949_s27, %s2949_s27, %s2950_s28  }
  0x11   :  { %s88_s7 = sshll.u32 %s5271_s10, 4  ;;  %s2951_s18 = smov [#allocation9]   ;;  %s89_s7 = int_to_ptr.hbm [resolvable:$true] %s88_s7 }
  0x12   :  { %81 = dma.vmem_to_smem %s79_s30, 16, %s2951_s18, [#allocation5]  }
  0x13   :  { %s2952_s19 = smov [#allocation10]   ;;  %s111_s22 = sshll.u32 %s5273_s12, 4  ;;  %s112_s22 = int_to_ptr.vmem [resolvable:$true] %s111_s22 }
  0x14   :  { %s90_s20 = sshll.u32 %s2952_s19, 4  ;;  %s2953_s23 = smov [#allocation14]   ;;  %s91_s20 = int_to_ptr.vmem [resolvable:$true] %s90_s20 }
  0x15   :  { %96 = dma.hbm_to_vmem [thread:$0]  %s89_s7, 24576, %s91_s20, [#allocation11], %s2949_s27, %s2949_s27, %s2950_s28  }
  0x16   :  { %114 = dma.vmem_to_smem %s112_s22, 16, %s2953_s23, [#allocation13]  }
  0x17   :  { %2931 = dma.done.wait [#allocation3], 256  }
  0x18   :  { %2932 = vsyncadd [#allocation3], 4294967040 }
  0x19   :  { %2933 = dma.done.wait [#allocation7], 24832  }
  0x1a   :  { %2934 = vsyncadd [#allocation7], 4294942464 }
  0x1b   :  { %2935 = dma.done.wait [#allocation5], 16  }
  0x1c   :  { %2936 = vsyncadd [#allocation5], 4294967280 }
  0x1d   :  { %2937 = dma.done.wait [#allocation11], 24576  }
  0x1e   :  { %2938 = vsyncadd [#allocation11], 4294942720 }
  0x1f   :  { %2939 = dma.done.wait [#allocation13], 32  }
  0x20   :  { %2940 = vsyncadd [#allocation13], 4294967264 }
  0x21   :  { %143 = sfence }
  0x22   :  { %v3055_v0 = vld [vmem:[#allocation2 + $0x8] sm:$0xff]  ;;  %v3057_v1 = vld [vmem:[#allocation2] sm:$0xff]  ;;  %vm165_vm0 = vcmask 1043456   ;;  %v2954_v9 = vmov 0   ;;  %v3065_v10 = vld [vmem:[#allocation6 + $0x8] sm:$0xff]  ;;  %vm199_vm1 = vcmask 7168  }
  0x23   :  { %5499 = vst [vmem:[#allocation22_spill] sm:$0xff] %v3055_v0  ;;  %2724 = vset.pattern.permute.xlu2 %v2954_v9  ;;  %2725 = vset.pattern.permute.xlu0 %v2954_v9  ;;  %v3067_v11 = vld [vmem:[#allocation6] sm:$0xff]  ;;  %v557_v45 = vld [vmem:[%s5267_s6] sm:$0xf]  ;;  %vm201_vm2 = vcmask 31744   ;;  %s2691_s25 = sld [smem:[#allocation9 + $0x1]] }
  0x24   :  { %5500 = vst [vmem:[#allocation23_spill] sm:$0xff] %v3057_v1  ;;  %2726 = vset.pattern.permute.xlu1 %v2954_v9  ;;  %v150_v50 = vld [vmem:[%s5263_s2] sm:$0x3]  ;;  %v2955_v56 = vmov 839922192   ;;  %v3117_v9 = vld [vmem:[#allocation8 + $0x2d0] sm:$0xff] }
  0x25   :  { %158 = vst [vmem:[#allocation1 + $0x10] ss:$2 sm:$0xff] %v3055_v0  ;;  %v3097_v57 = vunpack.c.l.s4 %v2955_v56  ;;  %v353_v63 = vld [vmem:[%s5265_s4] sm:$0x3]  ;;  %v3230_v56 = vld [vmem:[#allocation8 + $0x10] sm:$0xff]  ;;  %s2692_s26 = sld [smem:[#allocation9 + $0x2]] }
  0x26   :  { %154 = vst [vmem:[#allocation1] ss:$2 sm:$0xff] %v3057_v1  ;;  %vm233_vm3 = vcmask 1041408   ;;  %vm229_vm4 = vcmask 15360   ;;  %s4229_s29 = sld [smem:[#allocation9 + $0x3]]  ;;  %s2957_s23 = smov [#allocation15]  }
  0x27   :  { %5501 = vst [vmem:[#allocation24_spill] sm:$0xff] %v3065_v10  ;;  %v5275_v58 = vunpack.c.0.s8 %v3097_v57  ;;  %s4288_s30 = sld [smem:[#allocation12]]  ;;  %s2651_s8 = sshll.u32 %s2957_s23, 4  ;;  %s2652_s8 = int_to_ptr.vmem [resolvable:$true] %s2651_s8 }
  0x28   :  { %5502 = vst [vmem:[#allocation25_spill] sm:$0xff] %v3067_v11  ;;  %s4309_s14 = sld [smem:[#allocation12 + $0x1]]  ;;  %s2653_s24 = sshll.u32 %s5274_s13, 4  ;;  %s2654_s24 = int_to_ptr.hbm [resolvable:$true] %s2653_s24 }
  0x29   :  { %5503 = vst [vmem:[#allocation26_spill] sm:$0xff] %v3097_v57  ;;  %v3298_v57 = vld [vmem:[#allocation8 + $0x38] sm:$0xff]  ;;  %s4326_s15 = sld [smem:[#allocation12 + $0x2]] }
  0x2a   :  { %5513 = vst [vmem:[#allocation36_spill] sm:$0xff] %v3298_v57  ;;  %s2694_s7 = sld [smem:[#allocation9 + $0x4]] }
  0x2b   :  { %s4955_s18 = sld [smem:[#allocation9 + $0x5]] }
  0x2c   :  { %v159_v2 = vld.sshfl [vmem:[#allocation1 + $0x10] sm:$0xff pattern:$0x75316420]  ;;  %v160_v3 = vld.sshfl [vmem:[#allocation1 + $0x18] sm:$0xff pattern:$0x75316420] }
  0x2d   :  { %180 = vst [vmem:[#allocation1 + $0x10] ss:$2 sm:$0xff] %v3055_v0  ;;  %v155_v4 = vld.sshfl [vmem:[#allocation1] sm:$0xff pattern:$0x75316420]  ;;  %v171_v22 = vsel %vm165_vm0, %v159_v2, -inf }
  0x2e   :  { %v156_v5 = vld.sshfl [vmem:[#allocation1 + $0x8] sm:$0xff pattern:$0x75316420]  ;;  %v166_v6 = vsel %vm165_vm0, %v155_v4, -inf  ;;  %v172_v23 = vsel %vm165_vm0, %v160_v3, -inf  ;;  %v3108_v4 = vld [vmem:[#allocation8 + $0x2f0] sm:$0xff] }
  0x2f   :  { %176 = vst [vmem:[#allocation1] ss:$2 sm:$0xff] %v3057_v1  ;;  %v167_v7 = vsel %vm165_vm0, %v156_v5, -inf  ;;  %v173_v24 = vmax.f32 %v171_v22, %v172_v23  ;;  %s2702_s19 = sld [smem:[#allocation12 + $0x3]] }
  0x30   :  { %v168_v8 = vmax.f32 %v166_v6, %v167_v7  ;;  %s2703_s20 = sld [smem:[#allocation12 + $0x4]] }
  0x31   :  { %s2704_s1 = sld [smem:[#allocation12 + $0x5]] }
  0x32   :  { %169 = vmax.xlane.f32.xlu2 %v168_v8  ;;  %v3114_v8 = vld [vmem:[#allocation8 + $0x2e0] sm:$0xff]  ;;  %s144_s21 = sld [smem:[#allocation14]] }
  0x33   :  { %s2670_s22 = sld [smem:[#allocation14 + $0x1]] }
  0x34   :  { %v181_v12 = vld.sshfl [vmem:[#allocation1 + $0x10] sm:$0xff pattern:$0x75316420]  ;;  %v182_v13 = vld.sshfl [vmem:[#allocation1 + $0x18] sm:$0xff pattern:$0x75316420] }
  0x35   :  { %v192_v14 = vsel %vm165_vm0, %v181_v12, 0.0  ;;  %v193_v15 = vsel %vm165_vm0, %v182_v13, 0.0  ;;  %361 = vst [vmem:[#allocation1 + $0x10] ss:$2 sm:$0xff] %v3065_v10 }
  0x36   :  { %v194_v16 = vadd.f32 %v193_v15, %v192_v14  ;;  %v177_v17 = vld.sshfl [vmem:[#allocation1] sm:$0xff pattern:$0x75316420]  ;;  %v178_v18 = vld.sshfl [vmem:[#allocation1 + $0x8] sm:$0xff pattern:$0x75316420] }
  0x37   :  { %v187_v19 = vsel %vm165_vm0, %v177_v17, 0.0  ;;  %v188_v20 = vsel %vm165_vm0, %v178_v18, 0.0  ;;  %357 = vst [vmem:[#allocation1] ss:$2 sm:$0xff] %v3067_v11  ;;  %v3121_v14 = vld [vmem:[#allocation8 + $0x2c0] sm:$0xff]  ;;  %v3123_v15 = vld [vmem:[#allocation8 + $0xf0] sm:$0xff] }
  0x38   :  { %195 = vadd.xlane.f32.xlu0 %v194_v16  ;;  %v189_v21 = vadd.f32 %v188_v20, %v187_v19  ;;  %v3127_v16 = vld [vmem:[#allocation8 + $0x2b0] sm:$0xff]  ;;  %v3130_v17 = vld [vmem:[#allocation8 + $0x2a0] sm:$0xff] }
  0x39   :  { %v3132_v18 = vld [vmem:[#allocation8 + $0xe0] sm:$0xff]  ;;  %v3134_v19 = vld [vmem:[#allocation8 + $0xd0] sm:$0xff] }
  0x3a   :  { %190 = vadd.xlane.f32.xlu1 %v189_v21 }
  0x3c   :  { %v362_v25 = vld.sshfl [vmem:[#allocation1 + $0x10] sm:$0xff pattern:$0x75316420]  ;;  %v363_v26 = vld.sshfl [vmem:[#allocation1 + $0x18] sm:$0xff pattern:$0x75316420] }
  0x3d   :  { %382 = vst [vmem:[#allocation1 + $0x10] ss:$2 sm:$0xff] %v3065_v10  ;;  %v373_v27 = vsel %vm165_vm0, %v362_v25, -inf  ;;  %v374_v28 = vsel %vm165_vm0, %v363_v26, -inf  ;;  %v3152_v25 = vld [vmem:[#allocation8 + $0xc0] sm:$0xff] }
  0x3e   :  { %v375_v29 = vmax.f32 %v373_v27, %v374_v28  ;;  %v358_v30 = vld.sshfl [vmem:[#allocation1] sm:$0xff pattern:$0x75316420]  ;;  %v359_v31 = vld.sshfl [vmem:[#allocation1 + $0x8] sm:$0xff pattern:$0x75316420] }
  0x3f   :  { %378 = vst [vmem:[#allocation1] ss:$2 sm:$0xff] %v3067_v11  ;;  %v368_v42 = vsel %vm165_vm0, %v358_v30, -inf  ;;  %v369_v43 = vsel %vm165_vm0, %v359_v31, -inf  ;;  %v3156_v26 = vld [vmem:[#allocation8 + $0x280] sm:$0xff]  ;;  %v3158_v27 = vld [vmem:[#allocation8 + $0xb0] sm:$0xff] }
  0x40   :  { %174 = vmax.xlane.f32.xlu0 %v173_v24  ;;  %376 = vmax.xlane.f32.xlu2 %v375_v29  ;;  %v370_v44 = vmax.f32 %v368_v42, %v369_v43  ;;  %v3149_v24 = vld [vmem:[#allocation8 + $0x290] sm:$0xff]  ;;  %v3164_v29 = vld [vmem:[#allocation8 + $0xa0] sm:$0xff]  ;;  %v3292_v11 = vld [vmem:[#allocation8 + $0x48] sm:$0xff] }
  0x41   :  { %v3162_v28 = vld [vmem:[#allocation8 + $0x270] sm:$0xff]  ;;  %v3167_v30 = vld [vmem:[#allocation8 + $0x260] sm:$0xff]  ;;  %5511 = vst [vmem:[#allocation34_spill] sm:$0xff] %v3292_v11 }
  0x42   :  { %v3170_v31 = vld [vmem:[#allocation8 + $0x90] sm:$0xff]  ;;  %v3202_v42 = vld [vmem:[#allocation8 + $0x220] sm:$0xff] }
  0x43   :  { %v3204_v43 = vld [vmem:[#allocation8 + $0x50] sm:$0xff] }
  0x44   :  { %v383_v32 = vld.sshfl [vmem:[#allocation1 + $0x10] sm:$0xff pattern:$0x75316420]  ;;  %v384_v33 = vld.sshfl [vmem:[#allocation1 + $0x18] sm:$0xff pattern:$0x75316420] }
  0x45   :  { %v394_v34 = vsel %vm165_vm0, %v383_v32, 0.0  ;;  %v395_v35 = vsel %vm165_vm0, %v384_v33, 0.0 }
  0x46   :  { %v396_v36 = vadd.f32 %v395_v35, %v394_v34  ;;  %v379_v37 = vld.sshfl [vmem:[#allocation1] sm:$0xff pattern:$0x75316420]  ;;  %v380_v38 = vld.sshfl [vmem:[#allocation1 + $0x8] sm:$0xff pattern:$0x75316420] }
  0x47   :  { %v389_v39 = vsel %vm165_vm0, %v379_v37, 0.0  ;;  %v390_v40 = vsel %vm165_vm0, %v380_v38, 0.0  ;;  %v3185_v37 = vld [vmem:[#allocation8 + $0x80] sm:$0xff] }
  0x48   :  { %397 = vadd.xlane.f32.xlu1 %v396_v36  ;;  %v391_v41 = vadd.f32 %v390_v40, %v389_v39  ;;  %v3183_v36 = vld [vmem:[#allocation8 + $0x250] sm:$0xff]  ;;  %v3190_v38 = vld [vmem:[#allocation8 + $0x240] sm:$0xff] }
  0x49   :  { %v3192_v39 = vld [vmem:[#allocation8 + $0x70] sm:$0xff] }
  0x4a   :  { %392 = vadd.xlane.f32.xlu0 %v391_v41  ;;  %v3196_v40 = vld [vmem:[#allocation8 + $0x230] sm:$0xff]  ;;  %v3198_v41 = vld [vmem:[#allocation8 + $0x60] sm:$0xff] }
  0x50   :  { %371 = vmax.xlane.f32.xlu1 %v370_v44 }
  0x58   :  { %752 = vperm.xlu2 %2724, %v557_v45   ;;  %v3208_v45 = vld [vmem:[#allocation8 + $0x210] sm:$0xff] }
  0xa5   :  { %v170_v47 = vpop.xlane.xlu2 %169 }
  0xab   :  { %v196_v46 = vpop.xlane.xlu0 %195 }
  0xac   :  { %v198_v52 = vmul.f32 0.00390625, %v196_v46  ;;  %v3210_v46 = vld [vmem:[#allocation8 + $0x40] sm:$0xff] }
  0xad   :  { %v191_v48 = vpop.xlane.xlu1 %190 }
  0xae   :  { %v197_v49 = vmul.f32 0.00390625, %v191_v48 }
  0xb0   :  { %v200_v51 = vsel %vm199_vm1, %v170_v47, %v197_v49  ;;  %v3215_v49 = vld [vmem:[#allocation8 + $0x200] sm:$0xff] }
  0xb1   :  { %2671 = vmatpush.msk.msra.mxu0 %vm165_vm0, %v200_v51  ;;  %v3220_v51 = vld [vmem:[#allocation8 + $0xf8] sm:$0xff] }
  0xb2   :  { %2672 = vmatmul.msk.f32.vlgmr.msra.gmra.mxu0 %vm201_vm2, %v150_v50 }
  0xb3   :  { %v175_v53 = vpop.xlane.xlu0 %174  ;;  %v377_v54 = vpop.xlane.xlu2 %376 }
  0xb4   :  { %v281_v55 = vsel %vm199_vm1, %v175_v53, %v198_v52  ;;  %v3223_v53 = vld [vmem:[#allocation8 + $0x20] sm:$0xff] }
  0xb5   :  { %2676 = vmatpush.msk.msra.mxu2 %vm165_vm0, %v281_v55 }
  0xb6   :  { %2677 = vmatmul.msk.f32.vlgmr.msra.gmra.mxu2 %vm201_vm2, %v150_v50  ;;  %v3217_v50 = vld [vmem:[#allocation8 + $0x30] sm:$0xff] }
  0xbb   :  { %v398_v59 = vpop.xlane.xlu1 %397  ;;  %v753_v60 = vpop.permute.xlu2 %752 }
  0xbc   :  { %v400_v61 = vmul.f32 0.00390625, %v398_v59  ;;  %v757_v62 = vperm.slane %v753_v60, %v5275_v58  ;;  %v3232_v59 = vld [vmem:[#allocation8 + $0xd8] sm:$0xff] }
  0xbd   :  { %v393_v2 = vpop.xlane.xlu0 %392 }
  0xbe   :  { %v479_v3 = vsel %vm199_vm1, %v377_v54, %v400_v61  ;;  %v759_v5 = vmul.f32 %v757_v62, %v3057_v1  ;;  %v760_v6 = vmul.f32 %v757_v62, %v3055_v0  ;;  %v399_v7 = vmul.f32 0.00390625, %v393_v2  ;;  %v3226_v54 = vld [vmem:[#allocation8 + $0xe8] sm:$0xff]  ;;  %v3236_v61 = vld [vmem:[#allocation8] sm:$0xff] }
  0xbf   :  { %2686 = vmatpush.msk.msrb.mxu2 %vm165_vm0, %v479_v3  ;;  %v3238_v62 = vld [vmem:[#allocation8 + $0xc8] sm:$0xff]  ;;  %v3244_v3 = vld [vmem:[#allocation8 + $0xb8] sm:$0xff] }
  0xc0   :  { %2687 = vmatmul.msk.f32.vlgmr.msrb.gmra.mxu2 %vm201_vm2, %v353_v63  ;;  %763 = vst [vmem:[#allocation1] ss:$2 sm:$0xff] %v759_v5  ;;  %v3247_v5 = vld [vmem:[#allocation8 + $0x4e0] sm:$0xff] }
  0xc1   :  { %944 = vmatpush.msra.mxu2 %v3108_v4  ;;  %767 = vst [vmem:[#allocation1 + $0x10] ss:$2 sm:$0xff] %v760_v6 }
  0xc3   :  { %945 = vmatpush.msra.mxu2 %v3114_v8  ;;  %v372_v12 = vpop.xlane.xlu1 %371 }
  0xc4   :  { %v401_v13 = vsel %vm199_vm1, %v372_v12, %v399_v7  ;;  %v3251_v7 = vld [vmem:[#allocation8 + $0xa8] sm:$0xff]  ;;  %v3253_v12 = vld [vmem:[#allocation8 + $0x4d0] sm:$0xff] }
  0xc5   :  { %946 = vmatpush.msra.mxu2 %v3117_v9  ;;  %2681 = vmatpush.msk.msrb.mxu0 %vm165_vm0, %v401_v13 }
  0xc6   :  { %2682 = vmatmul.msk.f32.vlgmr.msrb.gmra.mxu0 %vm201_vm2, %v353_v63  ;;  %v3241_v63 = vld [vmem:[#allocation8 + $0x4f0] sm:$0xff] }
  0xc7   :  { %947 = vmatpush.msra.mxu2 %v3121_v14  ;;  %v3137_v20 = vld.sshfl [vmem:[#allocation1] sm:$0xff pattern:$0x75316420]  ;;  %v3139_v21 = vld.sshfl [vmem:[#allocation1 + $0x8] sm:$0xff pattern:$0x75316420]  ;;  %904 = vmatpush.msra.mxu0 %v3123_v15 }
  0xc8   :  { %5504 = vst [vmem:[#allocation27_spill] sm:$0xff] %v3139_v21  ;;  %v3142_v22 = vld.sshfl [vmem:[#allocation1 + $0x10] sm:$0xff pattern:$0x75316420]  ;;  %v3300_v21 = vld [vmem:[#allocation8 + $0x460] sm:$0xff] }
  0xc9   :  { %v3144_v23 = vld.sshfl [vmem:[#allocation1 + $0x18] sm:$0xff pattern:$0x75316420]  ;;  %948 = vmatpush.msra.mxu2 %v3127_v16  ;;  %821 = vst [vmem:[#allocation1] ss:$2 sm:$0xff] %v3057_v1  ;;  %905 = vmatpush.msra.mxu0 %v3132_v18 }
  0xca   :  { %5505 = vst [vmem:[#allocation28_spill] sm:$0xff] %v3144_v23  ;;  %v3286_v23 = vld [vmem:[#allocation8 + $0x58] sm:$0xff] }
  0xcb   :  { %825 = vst [vmem:[#allocation1 + $0x10] ss:$2 sm:$0xff] %v3055_v0  ;;  %949 = vmatpush.msra.mxu2 %v3130_v17  ;;  %906 = vmatpush.msra.mxu0 %v3134_v19 }
  0xcc   :  { %5514 = vst [vmem:[#allocation37_spill] sm:$0xff] %v3300_v21 }
  0xcd   :  { %950 = vmatpush.msra.mxu2 %v3149_v24  ;;  %907 = vmatpush.msra.mxu0 %v3152_v25 }
  0xcf   :  { %951 = vmatpush.msra.mxu2 %v3156_v26  ;;  %908 = vmatpush.msra.mxu0 %v3158_v27 }
  0xd0   :  { %v3172_v32 = vld.sshfl [vmem:[#allocation1] sm:$0xff pattern:$0x75316420]  ;;  %v3174_v33 = vld.sshfl [vmem:[#allocation1 + $0x8] sm:$0xff pattern:$0x75316420] }
  0xd1   :  { %952 = vmatpush.msra.mxu2 %v3162_v28  ;;  %909 = vmatpush.msra.mxu0 %v3164_v29  ;;  %860 = vst [vmem:[#allocation1] ss:$2 sm:$0xff] %v3057_v1  ;;  %v3282_v1 = vld [vmem:[#allocation8 + $0x490] sm:$0xff] }
  0xd2   :  { %v3177_v34 = vld.sshfl [vmem:[#allocation1 + $0x10] sm:$0xff pattern:$0x75316420]  ;;  %v3179_v35 = vld.sshfl [vmem:[#allocation1 + $0x18] sm:$0xff pattern:$0x75316420] }
  0xd3   :  { %5506 = vst [vmem:[#allocation29_spill] sm:$0xff] %v3179_v35  ;;  %953 = vmatpush.msra.mxu2 %v3167_v30  ;;  %910 = vmatpush.msra.mxu0 %v3170_v31  ;;  %v3288_v35 = vld [vmem:[#allocation8 + $0x480] sm:$0xff] }
  0xd4   :  { %864 = vst [vmem:[#allocation1 + $0x10] ss:$2 sm:$0xff] %v3055_v0  ;;  %v3280_v0 = vld [vmem:[#allocation8 + $0x68] sm:$0xff] }
  0xd5   :  { %954 = vmatpush.msra.mxu2 %v3183_v36  ;;  %911 = vmatpush.msra.mxu0 %v3185_v37  ;;  %5509 = vst [vmem:[#allocation32_spill] sm:$0xff] %v3282_v1 }
  0xd6   :  { %5510 = vst [vmem:[#allocation33_spill] sm:$0xff] %v3288_v35 }
  0xd7   :  { %955 = vmatpush.msra.mxu2 %v3190_v38  ;;  %912 = vmatpush.msra.mxu0 %v3192_v39 }
  0xd8   :  { %v861_v44 = vld.sshfl [vmem:[#allocation1] sm:$0xff pattern:$0x75316420] }
  0xd9   :  { %956 = vmatpush.msra.mxu2 %v3196_v40  ;;  %913 = vmatpush.msra.mxu0 %v3198_v41  ;;  %v871_v47 = vsel %vm165_vm0, %v861_v44, 0.0  ;;  %v3259_v44 = vld [vmem:[#allocation8 + $0x98] sm:$0xff] }
  0xda   :  { %v872_v48 = vrot.slane %v871_v47, 4 }
  0xdb   :  { %957 = vmatpush.msra.mxu2 %v3202_v42  ;;  %914 = vmatpush.msra.mxu0 %v3204_v43 }
  0xdc   :  { %v873_v52 = vadd.f32 %v872_v48, %v871_v47  ;;  %v3261_v47 = vld [vmem:[#allocation8 + $0x4c0] sm:$0xff]  ;;  %v3266_v48 = vld [vmem:[#allocation8 + $0x88] sm:$0xff] }
  0xdd   :  { %958 = vmatpush.msra.mxu2 %v3208_v45  ;;  %915 = vmatpush.msra.mxu0 %v3210_v46 }
  0xde   :  { %v874_v55 = vrot.slane %v873_v52, 2 }
  0xdf   :  { %959 = vmatpush.msra.mxu2 %v3215_v49  ;;  %916 = vmatpush.msra.mxu0 %v3217_v50 }
  0xe0   :  { %v875_v60 = vadd.f32 %v874_v55, %v873_v52  ;;  %v3268_v52 = vld [vmem:[#allocation8 + $0x4b0] sm:$0xff]  ;;  %v832_v55 = vsel %vm165_vm0, %v3172_v32, -inf }
  0xe1   :  { %1024 = vmatpush.msrb.mxu2 %v3220_v51  ;;  %917 = vmatpush.msra.mxu0 %v3223_v53  ;;  %5507 = vst [vmem:[#allocation30_spill] sm:$0xff] %v3268_v52 }
  0xe2   :  { %v876_v2 = vrot.slane %v875_v60, 1 }
  0xe3   :  { %1025 = vmatpush.msrb.mxu2 %v3226_v54  ;;  %918 = vmatpush.msra.mxu0 %v3230_v56 }
  0xe4   :  { %v877_v6 = vadd.f32 %v876_v2, %v875_v60  ;;  %v833_v60 = vrot.slane %v832_v55, 4  ;;  %v3274_v2 = vld [vmem:[#allocation8 + $0x78] sm:$0xff] }
  0xe5   :  { %1026 = vmatpush.msrb.mxu2 %v3232_v59  ;;  %919 = vmatpush.msra.mxu0 %v3236_v61 }
  0xe6   :  { %v3255_v13 = vmul.f32 0.25, %v877_v6  ;;  %v3276_v6 = vld [vmem:[#allocation8 + $0x4a0] sm:$0xff]  ;;  %v834_v58 = vmax.f32 %v832_v55, %v833_v60  ;;  %v3294_v55 = vld [vmem:[#allocation8 + $0x470] sm:$0xff] }
  0xe7   :  { %1027 = vmatpush.msrb.mxu2 %v3238_v62  ;;  %984 = vmatpush.msrb.mxu0 %v3241_v63  ;;  %5508 = vst [vmem:[#allocation31_spill] sm:$0xff] %v3276_v6 }
  0xe8   :  { %960 = vmatmul.f32.vlgmr.msra.gmra.mxu2 %v3255_v13  ;;  %v835_v32 = vrot.slane %v834_v58, 2  ;;  %5512 = vst [vmem:[#allocation35_spill] sm:$0xff] %v3294_v55 }
  0xe9   :  { %1028 = vmatpush.msrb.mxu2 %v3244_v3  ;;  %985 = vmatpush.msrb.mxu0 %v3247_v5 }
  0xea   :  { %v836_v10 = vmax.f32 %v834_v58, %v835_v32  ;;  %v3306_v58 = vld [vmem:[#allocation8 + $0x450] sm:$0xff]  ;;  %v3310_v32 = vld [vmem:[#allocation8 + $0x18] sm:$0xff] }
  0xeb   :  { %1029 = vmatpush.msrb.mxu2 %v3251_v7  ;;  %986 = vmatpush.msrb.mxu0 %v3253_v12  ;;  %5516 = vst [vmem:[#allocation39_spill] sm:$0xff] %v3306_v58 }
  0xec   :  { %v837_v60 = vrot.slane %v836_v10, 1  ;;  %5517 = vst [vmem:[#allocation40_spill] sm:$0xff] %v3310_v32 }
  0xed   :  { %1030 = vmatpush.msrb.mxu2 %v3259_v44  ;;  %987 = vmatpush.msrb.mxu0 %v3261_v47 }
  0xef   :  { %1031 = vmatpush.msrb.mxu2 %v3266_v48  ;;  %988 = vmatpush.msrb.mxu0 %v3268_v52  ;;  %v3392_v52 = vld [vmem:[#allocation8 + $0x288] sm:$0xff] }
  0xf0   :  { %5542 = vst [vmem:[#allocation65_spill] sm:$0xff] %v3392_v52 }
  0xf1   :  { %1032 = vmatpush.msrb.mxu2 %v3274_v2  ;;  %989 = vmatpush.msrb.mxu0 %v3276_v6  ;;  %v838_v6 = vmax.f32 %v836_v10, %v837_v60  ;;  %v3319_v10 = vld [vmem:[#allocation8 + $0x8] sm:$0xff]  ;;  %v3321_v60 = vld [vmem:[#allocation8 + $0x430] sm:$0xff] }
  0xf2   :  { %5519 = vst [vmem:[#allocation42_spill] sm:$0xff] %v3319_v10 }
  0xf3   :  { %1033 = vmatpush.msrb.mxu2 %v3280_v0  ;;  %990 = vmatpush.msrb.mxu0 %v3282_v1  ;;  %v3304_v1 = vld [vmem:[#allocation8 + $0x28] sm:$0xff]  ;;  %5520 = vst [vmem:[#allocation43_spill] sm:$0xff] %v3321_v60 }
  0xf4   :  { %5515 = vst [vmem:[#allocation38_spill] sm:$0xff] %v3304_v1  ;;  %920 = vmatmul.f32.vlgmr.msra.gmra.mxu0 %v838_v6 }
  0xf5   :  { %1034 = vmatpush.msrb.mxu2 %v3286_v23  ;;  %991 = vmatpush.msrb.mxu0 %v3288_v35  ;;  %v3312_v35 = vld [vmem:[#allocation8 + $0x440] sm:$0xff] }
  0xf6   :  { %5518 = vst [vmem:[#allocation41_spill] sm:$0xff] %v3312_v35 }
  0xf7   :  { %1035 = vmatpush.msrb.mxu2 %v3292_v11  ;;  %992 = vmatpush.msrb.mxu0 %v3294_v55  ;;  %v1476_v11 = vld [vmem:[%s5270_s9] sm:$0xf]  ;;  %v3327_v55 = vld [vmem:[#allocation8 + $0x420] sm:$0xff]  ;;  %s551_s9 = sld [smem:[#allocation9]] }
  0xf8   :  { %1671 = vperm.xlu0 %2725, %v1476_v11   ;;  %5522 = vst [vmem:[#allocation45_spill] sm:$0xff] %v3327_v55  ;;  %v3340_v11 = vld [vmem:[#allocation8 + $0x400] sm:$0xff] }
  0xf9   :  { %1036 = vmatpush.msrb.mxu2 %v3298_v57  ;;  %993 = vmatpush.msrb.mxu0 %v3300_v21  ;;  %v3324_v21 = vld [vmem:[#allocation8 + $0x4f8] sm:$0xff]  ;;  %v3330_v57 = vld [vmem:[#allocation8 + $0x4e8] sm:$0xff]  ;;  %5526 = vst [vmem:[#allocation49_spill] sm:$0xff] %v3340_v11 }
  0xfa   :  { %5521 = vst [vmem:[#allocation44_spill] sm:$0xff] %v3324_v21 }
  0xfb   :  { %1037 = vmatpush.msrb.mxu2 %v3304_v1  ;;  %994 = vmatpush.msrb.mxu0 %v3306_v58  ;;  %5523 = vst [vmem:[#allocation46_spill] sm:$0xff] %v3330_v57  ;;  %v3334_v58 = vld [vmem:[#allocation8 + $0x410] sm:$0xff]  ;;  %v3336_v1 = vld [vmem:[#allocation8 + $0x4d8] sm:$0xff] }
  0xfc   :  { %5524 = vst [vmem:[#allocation47_spill] sm:$0xff] %v3334_v58 }
  0xfd   :  { %1038 = vmatpush.msrb.mxu2 %v3310_v32  ;;  %995 = vmatpush.msrb.mxu0 %v3312_v35  ;;  %5525 = vst [vmem:[#allocation48_spill] sm:$0xff] %v3336_v1  ;;  %v3342_v35 = vld [vmem:[#allocation8 + $0x4c8] sm:$0xff]  ;;  %v3350_v32 = vld [vmem:[#allocation8 + $0x4b8] sm:$0xff] }
  0xfe   :  { %5527 = vst [vmem:[#allocation50_spill] sm:$0xff] %v3342_v35 }
  0xff   :  { %1039 = vmatpush.msrb.mxu2 %v3319_v10  ;;  %996 = vmatpush.msrb.mxu0 %v3321_v60  ;;  %v3345_v10 = vld [vmem:[#allocation8 + $0x2f8] sm:$0xff]  ;;  %v774_v60 = vsel %vm165_vm0, %v3137_v20, 0.0  ;;  %5529 = vst [vmem:[#allocation52_spill] sm:$0xff] %v3350_v32 }
 0x100   :  { %1040 = vmatmul.f32.vlgmr.msrb.gmra.mxu2 %v838_v6  ;;  %5528 = vst [vmem:[#allocation51_spill] sm:$0xff] %v3345_v10  ;;  %v3353_v6 = vld [vmem:[#allocation8 + $0x2e8] sm:$0xff] }
 0x101   :  { %1104 = vmatpush.msra.mxu2 %v3324_v21  ;;  %997 = vmatpush.msrb.mxu0 %v3327_v55  ;;  %v775_v21 = vrot.slane %v774_v60, 4  ;;  %5530 = vst [vmem:[#allocation53_spill] sm:$0xff] %v3353_v6 }
 0x103   :  { %1105 = vmatpush.msra.mxu2 %v3330_v57  ;;  %998 = vmatpush.msrb.mxu0 %v3334_v58  ;;  %v776_v55 = vadd.f32 %v775_v21, %v774_v60  ;;  %v3357_v58 = vld [vmem:[#allocation8 + $0x4a8] sm:$0xff]  ;;  %v3359_v57 = vld [vmem:[#allocation8 + $0x2d8] sm:$0xff] }
 0x104   :  { %5531 = vst [vmem:[#allocation54_spill] sm:$0xff] %v3357_v58  ;;  %v3369_v60 = vld [vmem:[#allocation8 + $0x488] sm:$0xff] }
 0x105   :  { %1106 = vmatpush.msra.mxu2 %v3336_v1  ;;  %999 = vmatpush.msrb.mxu0 %v3340_v11  ;;  %5532 = vst [vmem:[#allocation55_spill] sm:$0xff] %v3359_v57  ;;  %v777_v20 = vrot.slane %v776_v55, 2  ;;  %v3363_v1 = vld [vmem:[#allocation8 + $0x498] sm:$0xff]  ;;  %v3365_v11 = vld [vmem:[#allocation8 + $0x2c8] sm:$0xff] }
 0x106   :  { %5533 = vst [vmem:[#allocation56_spill] sm:$0xff] %v3363_v1 }
 0x107   :  { %1107 = vmatpush.msra.mxu2 %v3342_v35  ;;  %1064 = vmatpush.msra.mxu0 %v3345_v10  ;;  %5534 = vst [vmem:[#allocation57_spill] sm:$0xff] %v3365_v11  ;;  %v778_v21 = vadd.f32 %v777_v20, %v776_v55  ;;  %v3371_v10 = vld [vmem:[#allocation8 + $0x2b8] sm:$0xff]  ;;  %v3377_v35 = vld [vmem:[#allocation8 + $0x2a8] sm:$0xff] }
 0x108   :  { %5535 = vst [vmem:[#allocation58_spill] sm:$0xff] %v3369_v60  ;;  %v3381_v55 = vld [vmem:[#allocation8 + $0x468] sm:$0xff]  ;;  %v3383_v20 = vld [vmem:[#allocation8 + $0x298] sm:$0xff] }
 0x109   :  { %1108 = vmatpush.msra.mxu2 %v3350_v32  ;;  %1065 = vmatpush.msra.mxu0 %v3353_v6  ;;  %5536 = vst [vmem:[#allocation59_spill] sm:$0xff] %v3371_v10  ;;  %v779_v6 = vrot.slane %v778_v21, 1  ;;  %v3375_v32 = vld [vmem:[#allocation8 + $0x478] sm:$0xff] }
 0x10a   :  { %5537 = vst [vmem:[#allocation60_spill] sm:$0xff] %v3375_v32 }
 0x10b   :  { %1109 = vmatpush.msra.mxu2 %v3357_v58  ;;  %1066 = vmatpush.msra.mxu0 %v3359_v57  ;;  %5538 = vst [vmem:[#allocation61_spill] sm:$0xff] %v3377_v35  ;;  %v780_v57 = vadd.f32 %v779_v6, %v778_v21  ;;  %v3385_v58 = vstv %s551_s9  ;;  %v3399_v21 = vld [vmem:[#allocation8 + $0x448] sm:$0xff] }
 0x10c   :  { %5539 = vst [vmem:[#allocation62_spill] sm:$0xff] %v3381_v55 }
 0x10d   :  { %1110 = vmatpush.msra.mxu2 %v3363_v1  ;;  %1067 = vmatpush.msra.mxu0 %v3365_v11  ;;  %5540 = vst [vmem:[#allocation63_spill] sm:$0xff] %v3383_v20  ;;  %v803_v11 = vadd.f32 %v3385_v58, %v780_v57  ;;  %v3390_v1 = vld [vmem:[#allocation8 + $0x458] sm:$0xff] }
 0x10e   :  { %5541 = vst [vmem:[#allocation64_spill] sm:$0xff] %v3385_v58  ;;  %v3410_v58 = vld [vmem:[#allocation8 + $0x268] sm:$0xff] }
 0x10f   :  { %1111 = vmatpush.msra.mxu2 %v3369_v60  ;;  %1068 = vmatpush.msra.mxu0 %v3371_v10  ;;  %v3394_v60 = vstv %s2691_s25  ;;  %5543 = vst [vmem:[#allocation66_spill] sm:$0xff] %v3399_v21  ;;  %v3401_v10 = vld [vmem:[#allocation8 + $0x278] sm:$0xff] }
 0x110   :  { %v808_v6 = vmul.f32 %v3394_v60, %v803_v11  ;;  %5544 = vst [vmem:[#allocation67_spill] sm:$0xff] %v3401_v10 }
 0x111   :  { %1112 = vmatpush.msra.mxu2 %v3375_v32  ;;  %1069 = vmatpush.msra.mxu0 %v3377_v35  ;;  %v3403_v32 = vstv %s2692_s26  ;;  %v3408_v35 = vld [vmem:[#allocation8 + $0x438] sm:$0xff]  ;;  %5545 = vst [vmem:[#allocation68_spill] sm:$0xff] %v3410_v58 }
 0x112   :  { %v813_v57 = vadd.f32 %v3403_v32, %v808_v6  ;;  %v3422_v6 = vld [vmem:[#allocation8 + $0x248] sm:$0xff] }
 0x113   :  { %1113 = vmatpush.msra.mxu2 %v3381_v55  ;;  %1070 = vmatpush.msra.mxu0 %v3383_v20  ;;  %v3414_v20 = vld [vmem:[#allocation8 + $0x428] sm:$0xff]  ;;  %v3416_v55 = vld [vmem:[#allocation8 + $0x258] sm:$0xff] }
 0x114   :  { %v817_v11 = vmax.f32 %v813_v57, 0.0  ;;  %5546 = vst [vmem:[#allocation69_spill] sm:$0xff] %v3416_v55  ;;  %v3428_v57 = vld [vmem:[#allocation8 + $0x238] sm:$0xff] }
 0x115   :  { %1114 = vmatpush.msra.mxu2 %v3390_v1  ;;  %1071 = vmatpush.msra.mxu0 %v3392_v52  ;;  %v3420_v52 = vld [vmem:[#allocation8 + $0x418] sm:$0xff] }
 0x116   :  { %1000 = vmatmul.f32.vlgmr.msrb.gmra.mxu0 %v817_v11 }
 0x117   :  { %1115 = vmatpush.msra.mxu2 %v3399_v21  ;;  %1072 = vmatpush.msra.mxu0 %v3401_v10  ;;  %v3426_v21 = vld [vmem:[#allocation8 + $0x408] sm:$0xff] }
 0x118   :  { %v3432_v10 = vld [vmem:[#allocation8 + $0x228] sm:$0xff] }
 0x119   :  { %1116 = vmatpush.msra.mxu2 %v3408_v35  ;;  %1073 = vmatpush.msra.mxu0 %v3410_v58  ;;  %v3437_v58 = vld [vmem:[#allocation8 + $0x218] sm:$0xff] }
 0x11b   :  { %1117 = vmatpush.msra.mxu2 %v3414_v20  ;;  %1074 = vmatpush.msra.mxu0 %v3416_v55  ;;  %v3441_v55 = vld [vmem:[#allocation8 + $0x208] sm:$0xff] }
 0x11d   :  { %1118 = vmatpush.msra.mxu2 %v3420_v52  ;;  %1075 = vmatpush.msra.mxu0 %v3422_v6 }
 0x11f   :  { %1119 = vmatpush.msra.mxu2 %v3426_v21  ;;  %1076 = vmatpush.msra.mxu0 %v3428_v57 }
 0x120   :  { %1120 = vmatmul.f32.vlgmr.msra.gmra.mxu2 %v817_v11  ;;  %v5549_v11 = vld [vmem:[#allocation31_spill] sm:$0xff] }
 0x121   :  { %1228 = vmatpush.msrb.mxu2 %v3108_v4  ;;  %1077 = vmatpush.msra.mxu0 %v3432_v10  ;;  %v865_v4 = vld.sshfl [vmem:[#allocation1 + $0x10] sm:$0xff pattern:$0x75316420] }
 0x123   :  { %1229 = vmatpush.msrb.mxu2 %v3114_v8  ;;  %1078 = vmatpush.msra.mxu0 %v3437_v58  ;;  %v885_v8 = vsel %vm165_vm0, %v865_v4, 0.0 }
 0x125   :  { %1230 = vmatpush.msrb.mxu2 %v3117_v9  ;;  %1079 = vmatpush.msra.mxu0 %v3441_v55 }
 0x126   :  { %1080 = vmatmul.f32.vlgmr.msra.gmra.mxu0 %v3255_v13  ;;  %v5547_v13 = vld [vmem:[#allocation30_spill] sm:$0xff] }
 0x127   :  { %1231 = vmatpush.msrb.mxu2 %v3121_v14  ;;  %1188 = vmatpush.msrb.mxu0 %v3123_v15  ;;  %v886_v14 = vrot.slane %v885_v8, 4 }
 0x129   :  { %1232 = vmatpush.msrb.mxu2 %v3127_v16  ;;  %1189 = vmatpush.msrb.mxu0 %v3132_v18  ;;  %v151_v16 = vld [vmem:[%s5264_s3] sm:$0xf] }
 0x12b   :  { %1233 = vmatpush.msrb.mxu2 %v3130_v17  ;;  %1190 = vmatpush.msrb.mxu0 %v3134_v19  ;;  %v887_v17 = vadd.f32 %v886_v14, %v885_v8  ;;  %v5550_v8 = vld [vmem:[#allocation36_spill] sm:$0xff]  ;;  %v3568_v14 = vld [vmem:[#allocation8 + $0x370] sm:$0xff] }
 0x12d   :  { %1234 = vmatpush.msrb.mxu2 %v3149_v24  ;;  %1191 = vmatpush.msrb.mxu0 %v3152_v25  ;;  %v888_v18 = vrot.slane %v887_v17, 2 }
 0x12f   :  { %1235 = vmatpush.msrb.mxu2 %v3156_v26  ;;  %1192 = vmatpush.msrb.mxu0 %v3158_v27  ;;  %v225_v9 = vpop.f32.mrf.mxu0  ;;  %v889_v19 = vadd.f32 %v888_v18, %v887_v17  ;;  %v5552_v18 = vld [vmem:[#allocation38_spill] sm:$0xff] }
 0x130   :  { %v228_v15 = vmax.f32 %v225_v9, 0.0  ;;  %v3566_v9 = vld [vmem:[#allocation8 + $0x170] sm:$0xff] }
 0x131   :  { %1236 = vmatpush.msrb.mxu2 %v3162_v28  ;;  %1193 = vmatpush.msrb.mxu0 %v3164_v29  ;;  %v890_v24 = vrot.slane %v889_v19, 1 }
 0x132   :  { %2673 = vmatpush.msk.msra.mxu1 %vm233_vm3, %v228_v15  ;;  %v5551_v15 = vld [vmem:[#allocation32_spill] sm:$0xff] }
 0x133   :  { %1237 = vmatpush.msrb.mxu2 %v3167_v30  ;;  %1194 = vmatpush.msrb.mxu0 %v3170_v31  ;;  %v891_v26 = vadd.f32 %v890_v24, %v889_v19  ;;  %v3574_v19 = vld [vmem:[#allocation8 + $0x160] sm:$0xff] }
 0x134   :  { %2674 = vmatmul.msk.f32.vlgmr.msra.gmra.mxu1 %vm229_vm4, %v151_v16  ;;  %v3576_v24 = vld [vmem:[#allocation8 + $0x360] sm:$0xff] }
 0x135   :  { %1238 = vmatpush.msrb.mxu2 %v3183_v36  ;;  %1195 = vmatpush.msrb.mxu0 %v3185_v37  ;;  %v3477_v28 = vmul.f32 0.25, %v891_v26  ;;  %v354_v37 = vld [vmem:[%s5266_s5] sm:$0xf]  ;;  %s2956_s5 = smov 127  }
 0x137   :  { %1239 = vmatpush.msrb.mxu2 %v3190_v38  ;;  %1196 = vmatpush.msrb.mxu0 %v3192_v39  ;;  %v788_v38 = vsel %vm165_vm0, %v3142_v22, 0.0  ;;  %v3497_v39 = vld [vmem:[#allocation8 + $0x1f0] sm:$0xff]  ;;  %v3508_v22 = vld [vmem:[#allocation8 + $0x1e0] sm:$0xff] }
 0x139   :  { %1240 = vmatpush.msrb.mxu2 %v3196_v40  ;;  %1197 = vmatpush.msrb.mxu0 %v3198_v41  ;;  %v302_v25 = vpop.f32.mrf.mxu2  ;;  %v3499_v40 = vld [vmem:[#allocation8 + $0x3f0] sm:$0xff]  ;;  %v846_v41 = vsel %vm165_vm0, %v3177_v34, -inf }
 0x13a   :  { %v305_v27 = vmax.f32 %v302_v25, 0.0  ;;  %v3518_v34 = vld [vmem:[#allocation8 + $0x3d0] sm:$0xff]  ;;  %v5553_v25 = vld [vmem:[#allocation33_spill] sm:$0xff] }
 0x13b   :  { %1241 = vmatpush.msrb.mxu2 %v3202_v42  ;;  %1198 = vmatpush.msrb.mxu0 %v3204_v43  ;;  %v3510_v42 = vld [vmem:[#allocation8 + $0x3e0] sm:$0xff]  ;;  %v789_v43 = vrot.slane %v788_v38, 4 }
 0x13c   :  { %2678 = vmatpush.msk.msra.mxu3 %vm233_vm3, %v305_v27 }
 0x13d   :  { %1242 = vmatpush.msrb.mxu2 %v3208_v45  ;;  %1199 = vmatpush.msrb.mxu0 %v3210_v46  ;;  %v3516_v45 = vld [vmem:[#allocation8 + $0x1d0] sm:$0xff]  ;;  %v847_v46 = vrot.slane %v846_v41, 4 }
 0x13e   :  { %2679 = vmatmul.msk.f32.vlgmr.msra.gmra.mxu3 %vm229_vm4, %v151_v16 }
 0x13f   :  { %1243 = vmatpush.msrb.mxu2 %v3215_v49  ;;  %1200 = vmatpush.msrb.mxu0 %v3217_v50  ;;  %v3523_v49 = vld [vmem:[#allocation8 + $0x1c0] sm:$0xff] }
 0x140   :  { %1244 = vmatmul.f32.vlgmr.msrb.gmra.mxu2 %v3477_v28  ;;  %v3525_v50 = vld [vmem:[#allocation8 + $0x3c0] sm:$0xff] }
 0x141   :  { %1308 = vmatpush.msra.mxu2 %v3220_v51  ;;  %1201 = vmatpush.msrb.mxu0 %v3223_v53  ;;  %v862_v51 = vld.sshfl [vmem:[#allocation1 + $0x8] sm:$0xff pattern:$0x75316420]  ;;  %v790_v53 = vadd.f32 %v789_v43, %v788_v38 }
 0x142   :  { %v3590_v43 = vld [vmem:[#allocation8 + $0x140] sm:$0xff] }
 0x143   :  { %1309 = vmatpush.msra.mxu2 %v3226_v54  ;;  %1202 = vmatpush.msrb.mxu0 %v3230_v56  ;;  %v425_v29 = vpop.f32.mrf.mxu0  ;;  %v500_v30 = vpop.f32.mrf.mxu2  ;;  %v3531_v54 = vld [vmem:[#allocation8 + $0x1b0] sm:$0xff] }
 0x144   :  { %v428_v31 = vmax.f32 %v425_v29, 0.0  ;;  %v503_v36 = vmax.f32 %v500_v30, 0.0  ;;  %v3533_v56 = vld [vmem:[#allocation8 + $0x3b0] sm:$0xff]  ;;  %v5554_v29 = vld [vmem:[#allocation40_spill] sm:$0xff] }
 0x145   :  { %1310 = vmatpush.msra.mxu2 %v3232_v59  ;;  %1203 = vmatpush.msrb.mxu0 %v3236_v61  ;;  %v848_v59 = vmax.f32 %v846_v41, %v847_v46  ;;  %v839_v61 = vsel %vm165_vm0, %v3174_v33, -inf  ;;  %v3582_v30 = vld [vmem:[#allocation8 + $0x150] sm:$0xff]  ;;  %v3592_v46 = vld [vmem:[#allocation8 + $0x340] sm:$0xff] }
 0x146   :  { %2683 = vmatpush.msk.msrb.mxu1 %vm233_vm3, %v428_v31  ;;  %2688 = vmatpush.msk.msrb.mxu3 %vm233_vm3, %v503_v36  ;;  %v840_v33 = vrot.slane %v839_v61, 4  ;;  %v3584_v31 = vld [vmem:[#allocation8 + $0x350] sm:$0xff]  ;;  %v5555_v36 = vld [vmem:[#allocation35_spill] sm:$0xff] }
 0x147   :  { %1311 = vmatpush.msra.mxu2 %v3238_v62  ;;  %1268 = vmatpush.msra.mxu0 %v3241_v63  ;;  %v878_v62 = vsel %vm165_vm0, %v862_v51, 0.0  ;;  %v3542_v63 = vld [vmem:[#allocation8 + $0x1a0] sm:$0xff]  ;;  %v5556_v41 = vld [vmem:[#allocation42_spill] sm:$0xff]  ;;  %v5557_v51 = vld [vmem:[#allocation37_spill] sm:$0xff] }
 0x148   :  { %2689 = vmatmul.msk.f32.vlgmr.msrb.gmra.mxu3 %vm229_vm4, %v354_v37  ;;  %924 = vmatpush.msra.mxu1 %v3497_v39  ;;  %v841_v4 = vmax.f32 %v839_v61, %v840_v33  ;;  %v5558_v61 = vld [vmem:[#allocation44_spill] sm:$0xff]  ;;  %v5559_v33 = vld [vmem:[#allocation39_spill] sm:$0xff] }
 0x149   :  { %1312 = vmatpush.msra.mxu2 %v3244_v3  ;;  %964 = vmatpush.msra.mxu3 %v3499_v40  ;;  %v3544_v3 = vld [vmem:[#allocation8 + $0x3a0] sm:$0xff] }
 0x14a   :  { %2684 = vmatmul.msk.f32.vlgmr.msrb.gmra.mxu1 %vm229_vm4, %v354_v37  ;;  %1269 = vmatpush.msra.mxu0 %v3247_v5  ;;  %v791_v5 = vrot.slane %v790_v53, 2  ;;  %v842_v27 = vrot.slane %v841_v4, 2 }
 0x14b   :  { %1313 = vmatpush.msra.mxu2 %v3251_v7  ;;  %925 = vmatpush.msra.mxu1 %v3508_v22  ;;  %v3550_v7 = vld [vmem:[#allocation8 + $0x190] sm:$0xff] }
 0x14c   :  { %965 = vmatpush.msra.mxu3 %v3510_v42  ;;  %1270 = vmatpush.msra.mxu0 %v3253_v12  ;;  %v3552_v12 = vld [vmem:[#allocation8 + $0x390] sm:$0xff] }
 0x14d   :  { %1314 = vmatpush.msra.mxu2 %v3259_v44  ;;  %926 = vmatpush.msra.mxu1 %v3516_v45  ;;  %v849_v44 = vrot.slane %v848_v59, 2 }
 0x14e   :  { %966 = vmatpush.msra.mxu3 %v3518_v34  ;;  %1271 = vmatpush.msra.mxu0 %v3261_v47  ;;  %v5548_v47 = vld [vmem:[#allocation34_spill] sm:$0xff] }
 0x14f   :  { %1315 = vmatpush.msra.mxu2 %v3266_v48  ;;  %927 = vmatpush.msra.mxu1 %v3523_v49  ;;  %v3558_v48 = vld [vmem:[#allocation8 + $0x180] sm:$0xff]  ;;  %v850_v17 = vmax.f32 %v848_v59, %v849_v44  ;;  %v843_v59 = vmax.f32 %v841_v4, %v842_v27  ;;  %v5560_v44 = vld [vmem:[#allocation27_spill] sm:$0xff] }
 0x150   :  { %967 = vmatpush.msra.mxu3 %v3525_v50  ;;  %1272 = vmatpush.msra.mxu0 %v5547_v13  ;;  %v3612_v4 = vld [vmem:[#allocation8 + $0x320] sm:$0xff] }
 0x151   :  { %1316 = vmatpush.msra.mxu2 %v3274_v2  ;;  %928 = vmatpush.msra.mxu1 %v3531_v54  ;;  %v3560_v2 = vld [vmem:[#allocation8 + $0x380] sm:$0xff]  ;;  %v851_v38 = vrot.slane %v850_v17, 1 }
 0x152   :  { %968 = vmatpush.msra.mxu3 %v3533_v56  ;;  %1273 = vmatpush.msra.mxu0 %v5549_v11  ;;  %v5561_v11 = vld [vmem:[#allocation46_spill] sm:$0xff] }
 0x153   :  { %1317 = vmatpush.msra.mxu2 %v3280_v0  ;;  %v879_v0 = vrot.slane %v878_v62, 4  ;;  %929 = vmatpush.msra.mxu1 %v3542_v63 }
 0x154   :  { %969 = vmatpush.msra.mxu3 %v3544_v3  ;;  %1274 = vmatpush.msra.mxu0 %v5551_v15  ;;  %v5563_v15 = vld [vmem:[#allocation64_spill] sm:$0xff] }
 0x155   :  { %1318 = vmatpush.msra.mxu2 %v3286_v23  ;;  %v792_v23 = vadd.f32 %v791_v5, %v790_v53  ;;  %930 = vmatpush.msra.mxu1 %v3550_v7  ;;  %v880_v16 = vadd.f32 %v879_v0, %v878_v62  ;;  %v3598_v62 = vld [vmem:[#allocation8 + $0x130] sm:$0xff]  ;;  %v3603_v0 = vmax.f32 %v850_v17, %v851_v38  ;;  %v5564_v17 = vld [vmem:[#allocation48_spill] sm:$0xff] }
 0x156   :  { %970 = vmatpush.msra.mxu3 %v3552_v12  ;;  %1275 = vmatpush.msra.mxu0 %v5553_v25  ;;  %v3600_v5 = vld [vmem:[#allocation8 + $0x330] sm:$0xff]  ;;  %v3629_v38 = vld [vmem:[#allocation8 + $0x300] sm:$0xff] }
 0x157   :  { %1319 = vmatpush.msra.mxu2 %v5548_v47  ;;  %931 = vmatpush.msra.mxu1 %v3558_v48  ;;  %v793_v26 = vrot.slane %v792_v23, 1  ;;  %v881_v37 = vrot.slane %v880_v16, 2  ;;  %v781_v47 = vsel %vm165_vm0, %v5560_v44, 0.0  ;;  %v3619_v25 = vld [vmem:[#allocation8 + $0x110] sm:$0xff]  ;;  %v3640_v44 = vld [vmem:[#allocation8 + $0x1f8] sm:$0xff] }
 0x158   :  { %971 = vmatpush.msra.mxu3 %v3560_v2  ;;  %1276 = vmatpush.msra.mxu0 %v5555_v36  ;;  %v5565_v36 = vld [vmem:[#allocation50_spill] sm:$0xff]  ;;  %5569 = vst [vmem:[#allocation34_spill] sm:$0xff] %v3640_v44 }
 0x159   :  { %1320 = vmatpush.msra.mxu2 %v5550_v8  ;;  %932 = vmatpush.msra.mxu1 %v3566_v9  ;;  %v794_v53 = vadd.f32 %v793_v26, %v792_v23  ;;  %v882_v13 = vadd.f32 %v881_v37, %v880_v16  ;;  %v3610_v23 = vld [vmem:[#allocation8 + $0x120] sm:$0xff]  ;;  %v5562_v8 = vld [vmem:[#allocation41_spill] sm:$0xff]  ;;  %v844_v16 = vrot.slane %v843_v59, 1  ;;  %v3621_v26 = vld [vmem:[#allocation8 + $0x310] sm:$0xff] }
 0x15a   :  { %972 = vmatpush.msra.mxu3 %v3568_v14  ;;  %1277 = vmatpush.msra.mxu0 %v5557_v51  ;;  %v3627_v37 = vld [vmem:[#allocation8 + $0x100] sm:$0xff] }
 0x15b   :  { %1321 = vmatpush.msra.mxu2 %v5552_v18  ;;  %933 = vmatpush.msra.mxu1 %v3574_v19  ;;  %v805_v18 = vadd.f32 %v5563_v15, %v794_v53  ;;  %v883_v27 = vrot.slane %v882_v13, 1  ;;  %v3635_v53 = vld [vmem:[#allocation8 + $0x5f0] sm:$0xff] }
 0x15c   :  { %973 = vmatpush.msra.mxu3 %v3576_v24  ;;  %1278 = vmatpush.msra.mxu0 %v5559_v33  ;;  %5567 = vst [vmem:[#allocation30_spill] sm:$0xff] %v3635_v53  ;;  %v5568_v33 = vld [vmem:[#allocation52_spill] sm:$0xff] }
 0x15d   :  { %1322 = vmatpush.msra.mxu2 %v5554_v29  ;;  %934 = vmatpush.msra.mxu1 %v3582_v30  ;;  %v782_v29 = vrot.slane %v781_v47, 4  ;;  %v810_v51 = vmul.f32 %v3394_v60, %v805_v18  ;;  %v3645_v18 = vld [vmem:[#allocation8 + $0x5e0] sm:$0xff] }
 0x15e   :  { %974 = vmatpush.msra.mxu3 %v3584_v31  ;;  %1279 = vmatpush.msra.mxu0 %v5562_v8  ;;  %v5570_v8 = vld [vmem:[#allocation45_spill] sm:$0xff]  ;;  %5571 = vst [vmem:[#allocation31_spill] sm:$0xff] %v3645_v18 }
 0x15f   :  { %1323 = vmatpush.msra.mxu2 %v5556_v41  ;;  %935 = vmatpush.msra.mxu1 %v3590_v43  ;;  %v5566_v41 = vld [vmem:[#allocation43_spill] sm:$0xff] }
 0x160   :  { %975 = vmatpush.msra.mxu3 %v3592_v46  ;;  %1204 = vmatmul.f32.vlgmr.msrb.gmra.mxu0 %v3603_v0 }
 0x161   :  { %1388 = vmatpush.msrb.mxu2 %v5558_v61  ;;  %936 = vmatpush.msra.mxu1 %v3598_v62  ;;  %v3637_v61 = vmax.f32 %v843_v59, %v844_v16  ;;  %v3649_v59 = vld [vmem:[#allocation8 + $0x1e8] sm:$0xff]  ;;  %v3652_v16 = vadd.f32 %v3403_v32, %v810_v51  ;;  %v5578_v51 = vld [vmem:[#allocation58_spill] sm:$0xff] }
 0x162   :  { %976 = vmatpush.msra.mxu3 %v3600_v5  ;;  %1280 = vmatpush.msra.mxu0 %v5566_v41  ;;  %5573 = vst [vmem:[#allocation36_spill] sm:$0xff] %v3649_v59 }
 0x163   :  { %1389 = vmatpush.msrb.mxu2 %v5561_v11  ;;  %937 = vmatpush.msra.mxu1 %v3610_v23  ;;  %v884_v11 = vadd.f32 %v883_v27, %v882_v13  ;;  %v3655_v13 = vld [vmem:[#allocation8 + $0x5d0] sm:$0xff]  ;;  %v3660_v27 = vld [vmem:[#allocation8 + $0x1d8] sm:$0xff] }
 0x164   :  { %977 = vmatpush.msra.mxu3 %v3612_v4  ;;  %1281 = vmatpush.msra.mxu0 %v5570_v8  ;;  %5574 = vst [vmem:[#allocation32_spill] sm:$0xff] %v3655_v13  ;;  %v3668_v8 = vld [vmem:[#allocation8 + $0x5c0] sm:$0xff] }
 0x165   :  { %1390 = vmatpush.msrb.mxu2 %v5564_v17  ;;  %938 = vmatpush.msra.mxu1 %v3619_v25  ;;  %v783_v17 = vadd.f32 %v782_v29, %v781_v47  ;;  %v5575_v47 = vld [vmem:[#allocation56_spill] sm:$0xff]  ;;  %5576 = vst [vmem:[#allocation38_spill] sm:$0xff] %v3660_v27  ;;  %v3662_v29 = vmul.f32 0.25, %v884_v11 }
 0x166   :  { %978 = vmatpush.msra.mxu3 %v3621_v26  ;;  %5579 = vst [vmem:[#allocation33_spill] sm:$0xff] %v3668_v8  ;;  %v5582_v11 = vld [vmem:[#allocation60_spill] sm:$0xff]  ;;  %1324 = vmatmul.f32.vlgmr.msra.gmra.mxu2 %v3603_v0  ;;  %v3728_v0 = vld [vmem:[#allocation8 + $0x168] sm:$0xff] }
 0x167   :  { %1391 = vmatpush.msrb.mxu2 %v5565_v36  ;;  %939 = vmatpush.msra.mxu1 %v3627_v37  ;;  %v5572_v36 = vld [vmem:[#allocation54_spill] sm:$0xff]  ;;  %v784_v41 = vrot.slane %v783_v17, 2  ;;  %5599 = vst [vmem:[#allocation46_spill] sm:$0xff] %v3728_v0 }
 0x168   :  { %979 = vmatpush.msra.mxu3 %v3629_v38  ;;  %940 = vmatmul.f32.vlgmr.msra.gmra.mxu1 %v3637_v61 }
 0x169   :  { %1392 = vmatpush.msrb.mxu2 %v5568_v33  ;;  %1004 = vmatpush.msrb.mxu1 %v3635_v53  ;;  %v5577_v33 = vld [vmem:[#allocation47_spill] sm:$0xff] }
 0x16a   :  { %1044 = vmatpush.msrb.mxu3 %v3640_v44  ;;  %1282 = vmatpush.msra.mxu0 %v5577_v33  ;;  %v3679_v33 = vld [vmem:[#allocation8 + $0x1b8] sm:$0xff]  ;;  %v1672_v44 = vpop.permute.xlu0 %1671 }
 0x16b   :  { %1393 = vmatpush.msrb.mxu2 %v5572_v36  ;;  %1005 = vmatpush.msrb.mxu1 %v3645_v18  ;;  %v3670_v36 = vld [vmem:[#allocation8 + $0x1c8] sm:$0xff]  ;;  %5584 = vst [vmem:[#allocation42_spill] sm:$0xff] %v3679_v33 }
 0x16c   :  { %1045 = vmatpush.msrb.mxu3 %v3649_v59  ;;  %5580 = vst [vmem:[#allocation40_spill] sm:$0xff] %v3670_v36  ;;  %v5581_v18 = vld [vmem:[#allocation49_spill] sm:$0xff]  ;;  %v3677_v59 = vld [vmem:[#allocation8 + $0x5b0] sm:$0xff] }
 0x16d   :  { %1394 = vmatpush.msrb.mxu2 %v5575_v47  ;;  %1006 = vmatpush.msrb.mxu1 %v3655_v13  ;;  %5583 = vst [vmem:[#allocation35_spill] sm:$0xff] %v3677_v59  ;;  %v5585_v13 = vld [vmem:[#allocation62_spill] sm:$0xff]  ;;  %v3684_v47 = vld [vmem:[#allocation8 + $0x5a0] sm:$0xff] }
 0x16e   :  { %1046 = vmatpush.msrb.mxu3 %v3660_v27  ;;  %1283 = vmatpush.msra.mxu0 %v5581_v18  ;;  %v3686_v27 = vld [vmem:[#allocation8 + $0x1a8] sm:$0xff]  ;;  %v5587_v18 = vmax.f32 %v3652_v16, 0.0 }
 0x16f   :  { %1395 = vmatpush.msrb.mxu2 %v5578_v51  ;;  %980 = vmatmul.f32.vlgmr.msra.gmra.mxu3 %v3662_v29  ;;  %v785_v51 = vadd.f32 %v784_v41, %v783_v17  ;;  %5586 = vst [vmem:[#allocation37_spill] sm:$0xff] %v3686_v27 }
 0x170   :  { %1007 = vmatpush.msrb.mxu1 %v3668_v8  ;;  %1047 = vmatpush.msrb.mxu3 %v3670_v36  ;;  %v3697_v36 = vld [vmem:[#allocation8 + $0x590] sm:$0xff]  ;;  %v5591_v8 = vld [vmem:[#allocation51_spill] sm:$0xff] }
 0x171   :  { %1396 = vmatpush.msrb.mxu2 %v5582_v11  ;;  %1284 = vmatmul.f32.vlgmr.msra.gmra.mxu0 %v5587_v18  ;;  %v5588_v11 = vld [vmem:[#allocation26_spill] sm:$0xff]  ;;  %v786_v53 = vrot.slane %v785_v51, 1  ;;  %v5592_v18 = vld [vmem:[#allocation25_spill] sm:$0xff] }
 0x172   :  { %1008 = vmatpush.msrb.mxu1 %v3677_v59  ;;  %1048 = vmatpush.msrb.mxu3 %v3679_v33  ;;  %v5589_v17 = vunpack.c.0.s8 %v5588_v11  ;;  %v5593_v59 = vld [vmem:[#allocation66_spill] sm:$0xff]  ;;  %v5594_v11 = vld [vmem:[#allocation53_spill] sm:$0xff] }
 0x173   :  { %1397 = vmatpush.msrb.mxu2 %v5585_v13  ;;  %v3699_v13 = vld [vmem:[#allocation8 + $0x198] sm:$0xff]  ;;  %1348 = vmatpush.msrb.mxu0 %v5591_v8  ;;  %v3715_v8 = vld [vmem:[#allocation8 + $0x570] sm:$0xff] }
 0x174   :  { %v3694_v41 = vperm.slane %v1672_v44, %v5589_v17  ;;  %5590 = vst [vmem:[#allocation44_spill] sm:$0xff] %v3699_v13  ;;  %1009 = vmatpush.msrb.mxu1 %v3684_v47  ;;  %1049 = vmatpush.msrb.mxu3 %v3686_v27  ;;  %v3707_v44 = vld [vmem:[#allocation8 + $0x580] sm:$0xff]  ;;  %v5596_v17 = vld [vmem:[#allocation55_spill] sm:$0xff]  ;;  %v787_v27 = vadd.f32 %v786_v53, %v785_v51  ;;  %v3731_v53 = vld [vmem:[#allocation8 + $0x550] sm:$0xff] }
 0x175   :  { %1398 = vmatpush.msrb.mxu2 %v3390_v1  ;;  %1349 = vmatpush.msrb.mxu0 %v5594_v11  ;;  %v3712_v1 = vld [vmem:[#allocation8 + $0x188] sm:$0xff]  ;;  %5595 = vst [vmem:[#allocation39_spill] sm:$0xff] %v3715_v8  ;;  %v3723_v11 = vld [vmem:[#allocation8 + $0x560] sm:$0xff]  ;;  %v3737_v51 = vld [vmem:[#allocation8 + $0x158] sm:$0xff] }
 0x176   :  { %v1678_v33 = vmul.f32 %v3694_v41, %v5592_v18  ;;  %1010 = vmatpush.msrb.mxu1 %v3697_v36  ;;  %1050 = vmatpush.msrb.mxu3 %v3699_v13  ;;  %v5598_v13 = vld [vmem:[#allocation57_spill] sm:$0xff]  ;;  %5601 = vst [vmem:[#allocation41_spill] sm:$0xff] %v3737_v51 }
 0x177   :  { %1399 = vmatpush.msrb.mxu2 %v5593_v59  ;;  %1350 = vmatpush.msrb.mxu0 %v5596_v17  ;;  %v3720_v59 = vld [vmem:[#allocation8 + $0x178] sm:$0xff]  ;;  %v5604_v17 = vld [vmem:[#allocation61_spill] sm:$0xff] }
 0x178   :  { %1682 = vst [vmem:[#allocation1] ss:$2 sm:$0xff] %v1678_v33  ;;  %1011 = vmatpush.msrb.mxu1 %v3707_v44  ;;  %1051 = vmatpush.msrb.mxu3 %v3712_v1  ;;  %v804_v33 = vadd.f32 %v5563_v15, %v787_v27  ;;  %v5607_v27 = vmax.f32 %v3652_v16, 0.0  ;;  %v3770_v16 = vld [vmem:[#allocation8 + $0x520] sm:$0xff] }
 0x179   :  { %1400 = vmatpush.msrb.mxu2 %v3408_v35  ;;  %5597 = vst [vmem:[#allocation27_spill] sm:$0xff] %v3720_v59  ;;  %1351 = vmatpush.msrb.mxu0 %v5598_v13  ;;  %v5600_v35 = vld [vmem:[#allocation59_spill] sm:$0xff]  ;;  %v3739_v13 = vld [vmem:[#allocation10 + $0x2f0] sm:$0xff] }
 0x17a   :  { %1012 = vmatpush.msrb.mxu1 %v3715_v8  ;;  %1052 = vmatpush.msrb.mxu3 %v3720_v59  ;;  %5602 = vst [vmem:[#allocation64_spill] sm:$0xff] %v3739_v13 }
 0x17b   :  { %1401 = vmatpush.msrb.mxu2 %v3414_v20  ;;  %1352 = vmatpush.msrb.mxu0 %v5600_v35  ;;  %v3741_v20 = vld [vmem:[#allocation8 + $0x540] sm:$0xff]  ;;  %5613 = vst [vmem:[#allocation47_spill] sm:$0xff] %v3770_v16 }
 0x17c   :  { %1013 = vmatpush.msrb.mxu1 %v3723_v11  ;;  %5603 = vst [vmem:[#allocation48_spill] sm:$0xff] %v3741_v20  ;;  %1053 = vmatpush.msrb.mxu3 %v3728_v0  ;;  %v3757_v35 = vld [vmem:[#allocation10 + $0x2e0] sm:$0xff]  ;;  %v809_v0 = vmul.f32 %v3394_v60, %v804_v33 }
 0x17d   :  { %1402 = vmatpush.msrb.mxu2 %v3420_v52  ;;  %1353 = vmatpush.msrb.mxu0 %v5604_v17  ;;  %v3751_v52 = vld [vmem:[#allocation8 + $0x148] sm:$0xff]  ;;  %5608 = vst [vmem:[#allocation52_spill] sm:$0xff] %v3757_v35  ;;  %v3759_v17 = vld [vmem:[#allocation8 + $0x530] sm:$0xff]  ;;  %v3777_v33 = vld [vmem:[#allocation10 + $0x2c0] sm:$0xff] }
 0x17e   :  { %1014 = vmatpush.msrb.mxu1 %v3731_v53  ;;  %5606 = vst [vmem:[#allocation43_spill] sm:$0xff] %v3751_v52  ;;  %1054 = vmatpush.msrb.mxu3 %v3737_v51  ;;  %v5612_v51 = vld [vmem:[#allocation63_spill] sm:$0xff] }
 0x17f   :  { %v3745_v59 = vld.sshfl [vmem:[#allocation1] sm:$0xff pattern:$0x75316420]  ;;  %v3747_v8 = vld.sshfl [vmem:[#allocation1 + $0x8] sm:$0xff pattern:$0x75316420]  ;;  %1403 = vmatpush.msrb.mxu2 %v3426_v21  ;;  %1354 = vmatpush.msrb.mxu0 %v5612_v51 }
 0x180   :  { %5605 = vst [vmem:[#allocation50_spill] sm:$0xff] %v3747_v8  ;;  %1404 = vmatmul.f32.vlgmr.msrb.gmra.mxu2 %v5607_v27  ;;  %1015 = vmatpush.msrb.mxu1 %v3741_v20  ;;  %v3764_v21 = vld [vmem:[#allocation8 + $0x138] sm:$0xff]  ;;  %v3767_v8 = vld [vmem:[#allocation10 + $0x2d0] sm:$0xff]  ;;  %v3774_v27 = vld [vmem:[#allocation8 + $0x128] sm:$0xff] }
 0x181   :  { %1740 = vst [vmem:[#allocation1] ss:$2 sm:$0xff] %v5592_v18  ;;  %1863 = vmatpush.msra.mxu2 %v3739_v13  ;;  %1055 = vmatpush.msrb.mxu3 %v3751_v52  ;;  %v5616_v20 = vld [vmem:[#allocation65_spill] sm:$0xff]  ;;  %v3780_v13 = vld [vmem:[#allocation8 + $0x510] sm:$0xff]  ;;  %v3783_v52 = vadd.f32 %v3403_v32, %v809_v0  ;;  %v3787_v51 = vld [vmem:[#allocation8 + $0x118] sm:$0xff] }
 0x182   :  { %5609 = vst [vmem:[#allocation45_spill] sm:$0xff] %v3759_v17  ;;  %1016 = vmatpush.msrb.mxu1 %v3759_v17  ;;  %1355 = vmatpush.msrb.mxu0 %v5616_v20  ;;  %v3790_v17 = vld [vmem:[#allocation10 + $0x2b0] sm:$0xff]  ;;  %v3797_v0 = vld [vmem:[#allocation8 + $0x108] sm:$0xff]  ;;  %v3800_v20 = vld [vmem:[#allocation10 + $0x2a0] sm:$0xff] }
 0x183   :  { %5610 = vst [vmem:[#allocation54_spill] sm:$0xff] %v3764_v21  ;;  %1864 = vmatpush.msra.mxu2 %v3757_v35  ;;  %1056 = vmatpush.msrb.mxu3 %v3764_v21  ;;  %v5620_v21 = vld [vmem:[#allocation67_spill] sm:$0xff]  ;;  %v3793_v35 = vld [vmem:[#allocation8 + $0x500] sm:$0xff] }
 0x184   :  { %5611 = vst [vmem:[#allocation56_spill] sm:$0xff] %v3767_v8  ;;  %1017 = vmatpush.msrb.mxu1 %v3770_v16  ;;  %1356 = vmatpush.msrb.mxu0 %v5620_v21  ;;  %v5357_v16 = vmax.f32 %v3783_v52, 0.0  ;;  %v3808_v21 = vld [vmem:[#allocation8 + $0x5f8] sm:$0xff] }
 0x185   :  { %5614 = vst [vmem:[#allocation58_spill] sm:$0xff] %v3774_v27  ;;  %1865 = vmatpush.msra.mxu2 %v3767_v8  ;;  %1057 = vmatpush.msrb.mxu3 %v3774_v27  ;;  %v3803_v8 = vld [vmem:[#allocation8 + $0x3f8] sm:$0xff]  ;;  %v5624_v27 = vld [vmem:[#allocation68_spill] sm:$0xff] }
 0x186   :  { %5615 = vst [vmem:[#allocation49_spill] sm:$0xff] %v3777_v33  ;;  %1018 = vmatpush.msrb.mxu1 %v3780_v13  ;;  %1357 = vmatpush.msrb.mxu0 %v5624_v27 }
 0x187   :  { %5617 = vst [vmem:[#allocation60_spill] sm:$0xff] %v3780_v13  ;;  %1866 = vmatpush.msra.mxu2 %v3777_v33  ;;  %1058 = vmatpush.msrb.mxu3 %v3787_v51  ;;  %v3815_v13 = vld [vmem:[#allocation8 + $0x3e8] sm:$0xff] }
 0x188   :  { %5618 = vst [vmem:[#allocation62_spill] sm:$0xff] %v3787_v51  ;;  %1019 = vmatpush.msrb.mxu1 %v3793_v35  ;;  %v3813_v51 = vld [vmem:[#allocation10 + $0x290] sm:$0xff]  ;;  %v3817_v33 = vld [vmem:[#allocation8 + $0x5e8] sm:$0xff]  ;;  %v3821_v27 = vld.sshfl [vmem:[#allocation1] sm:$0xff pattern:$0x75316420] }
 0x189   :  { %5619 = vst [vmem:[#allocation26_spill] sm:$0xff] %v3790_v17  ;;  %1867 = vmatpush.msra.mxu2 %v3790_v17  ;;  %1059 = vmatpush.msrb.mxu3 %v3797_v0  ;;  %v3827_v17 = vld [vmem:[#allocation10 + $0x280] sm:$0xff] }
 0x18a   :  { %5621 = vst [vmem:[#allocation51_spill] sm:$0xff] %v3793_v35  ;;  %1020 = vmatmul.f32.vlgmr.msrb.gmra.mxu1 %v5357_v16  ;;  %v3823_v35 = vld.sshfl [vmem:[#allocation1 + $0x8] sm:$0xff pattern:$0x75316420]  ;;  %v3829_v16 = vld [vmem:[#allocation8 + $0x3d8] sm:$0xff]  ;;  %1060 = vmatmul.f32.vlgmr.msrb.gmra.mxu3 %v3637_v61  ;;  %v3960_v61 = vld [vmem:[#allocation8 + $0x328] sm:$0xff] }
 0x18b   :  { %5622 = vst [vmem:[#allocation25_spill] sm:$0xff] %v3797_v0  ;;  %1868 = vmatpush.msra.mxu2 %v3800_v20  ;;  %1084 = vmatpush.msra.mxu1 %v3803_v8  ;;  %v5629_v0 = vld [vmem:[#allocation69_spill] sm:$0xff] }
 0x18c   :  { %5623 = vst [vmem:[#allocation66_spill] sm:$0xff] %v3800_v20  ;;  %1124 = vmatpush.msra.mxu3 %v3808_v21  ;;  %1358 = vmatpush.msrb.mxu0 %v5629_v0  ;;  %v3834_v20 = vld [vmem:[#allocation8 + $0x5d8] sm:$0xff]  ;;  %v3844_v0 = vld [vmem:[#allocation8 + $0x5c8] sm:$0xff] }
 0x18d   :  { %5625 = vst [vmem:[#allocation53_spill] sm:$0xff] %v3808_v21  ;;  %1869 = vmatpush.msra.mxu2 %v3813_v51  ;;  %1085 = vmatpush.msra.mxu1 %v3815_v13  ;;  %v3840_v21 = vld [vmem:[#allocation8 + $0x3c8] sm:$0xff] }
 0x18e   :  { %5626 = vst [vmem:[#allocation55_spill] sm:$0xff] %v3813_v51  ;;  %1125 = vmatpush.msra.mxu3 %v3817_v33  ;;  %1359 = vmatpush.msrb.mxu0 %v3422_v6  ;;  %v3850_v51 = vld [vmem:[#allocation8 + $0x3b8] sm:$0xff] }
 0x18f   :  { %5627 = vst [vmem:[#allocation57_spill] sm:$0xff] %v3815_v13  ;;  %1870 = vmatpush.msra.mxu2 %v3827_v17  ;;  %1086 = vmatpush.msra.mxu1 %v3829_v16  ;;  %v3848_v13 = vld [vmem:[#allocation10 + $0x260] sm:$0xff]  ;;  %v3854_v6 = vld [vmem:[#allocation8 + $0x5b8] sm:$0xff] }
 0x190   :  { %5628 = vst [vmem:[#allocation59_spill] sm:$0xff] %v3823_v35  ;;  %v3838_v35 = vld [vmem:[#allocation10 + $0x270] sm:$0xff]  ;;  %1126 = vmatpush.msra.mxu3 %v3834_v20  ;;  %1360 = vmatpush.msrb.mxu0 %v3428_v57  ;;  %v3864_v57 = vld [vmem:[#allocation8 + $0x5a8] sm:$0xff] }
 0x191   :  { %5630 = vst [vmem:[#allocation61_spill] sm:$0xff] %v3827_v17  ;;  %1871 = vmatpush.msra.mxu2 %v3838_v35  ;;  %1087 = vmatpush.msra.mxu1 %v3840_v21  ;;  %v3860_v17 = vld [vmem:[#allocation8 + $0x3a8] sm:$0xff] }
 0x192   :  { %5631 = vst [vmem:[#allocation63_spill] sm:$0xff] %v3829_v16  ;;  %1127 = vmatpush.msra.mxu3 %v3844_v0  ;;  %1361 = vmatpush.msrb.mxu0 %v3432_v10  ;;  %v3858_v16 = vld [vmem:[#allocation10 + $0x250] sm:$0xff]  ;;  %v3874_v10 = vld [vmem:[#allocation8 + $0x598] sm:$0xff] }
 0x193   :  { %1779 = vst [vmem:[#allocation1] ss:$2 sm:$0xff] %v5592_v18  ;;  %1872 = vmatpush.msra.mxu2 %v3848_v13  ;;  %1088 = vmatpush.msra.mxu1 %v3850_v51 }
 0x194   :  { %5632 = vst [vmem:[#allocation65_spill] sm:$0xff] %v3838_v35  ;;  %1128 = vmatpush.msra.mxu3 %v3854_v6  ;;  %1362 = vmatpush.msrb.mxu0 %v3437_v58  ;;  %v3870_v35 = vld [vmem:[#allocation8 + $0x398] sm:$0xff]  ;;  %v3886_v58 = vld [vmem:[#allocation8 + $0x588] sm:$0xff] }
 0x195   :  { %5633 = vst [vmem:[#allocation67_spill] sm:$0xff] %v3840_v21  ;;  %v3868_v21 = vld [vmem:[#allocation10 + $0x240] sm:$0xff]  ;;  %1873 = vmatpush.msra.mxu2 %v3858_v16  ;;  %1089 = vmatpush.msra.mxu1 %v3860_v17 }
 0x196   :  { %5634 = vst [vmem:[#allocation68_spill] sm:$0xff] %v3844_v0  ;;  %v3876_v0 = vld [vmem:[#allocation10 + $0xf0] sm:$0xff]  ;;  %1129 = vmatpush.msra.mxu3 %v3864_v57  ;;  %1363 = vmatpush.msrb.mxu0 %v3441_v55  ;;  %v3898_v55 = vld [vmem:[#allocation8 + $0x578] sm:$0xff] }
 0x197   :  { %5635 = vst [vmem:[#allocation69_spill] sm:$0xff] %v3848_v13  ;;  %1874 = vmatpush.msra.mxu2 %v3868_v21  ;;  %1090 = vmatpush.msra.mxu1 %v3870_v35 }
 0x198   :  { %5636 = vst [vmem:[#allocation70_spill] sm:$0xff] %v3850_v51  ;;  %v3880_v51 = vld [vmem:[#allocation10 + $0x230] sm:$0xff]  ;;  %1130 = vmatpush.msra.mxu3 %v3874_v10  ;;  %1823 = vmatpush.msra.mxu0 %v3876_v0 }
 0x199   :  { %5637 = vst [vmem:[#allocation71_spill] sm:$0xff] %v3854_v6  ;;  %v3882_v6 = vld [vmem:[#allocation8 + $0x388] sm:$0xff]  ;;  %1875 = vmatpush.msra.mxu2 %v3880_v51  ;;  %1364 = vmatmul.f32.vlgmr.msrb.gmra.mxu0 %v3477_v28 }
 0x19a   :  { %5638 = vst [vmem:[#allocation72_spill] sm:$0xff] %v3858_v16  ;;  %v3888_v16 = vld [vmem:[#allocation10 + $0xe0] sm:$0xff]  ;;  %1091 = vmatpush.msra.mxu1 %v3882_v6  ;;  %1131 = vmatpush.msra.mxu3 %v3886_v58  ;;  %v4088_v28 = vld [vmem:[#allocation10 + $0x8] sm:$0xff] }
 0x19b   :  { %5639 = vst [vmem:[#allocation73_spill] sm:$0xff] %v3860_v17  ;;  %v3892_v17 = vld [vmem:[#allocation10 + $0x220] sm:$0xff]  ;;  %1824 = vmatpush.msra.mxu0 %v3888_v16 }
 0x19c   :  { %5640 = vst [vmem:[#allocation74_spill] sm:$0xff] %v3864_v57  ;;  %v3894_v57 = vld [vmem:[#allocation8 + $0x378] sm:$0xff]  ;;  %1876 = vmatpush.msra.mxu2 %v3892_v17  ;;  %1132 = vmatpush.msra.mxu3 %v3898_v55 }
 0x19d   :  { %5641 = vst [vmem:[#allocation75_spill] sm:$0xff] %v3868_v21  ;;  %v3900_v21 = vld [vmem:[#allocation10 + $0xd0] sm:$0xff]  ;;  %1092 = vmatpush.msra.mxu1 %v3894_v57 }
 0x19e   :  { %5642 = vst [vmem:[#allocation76_spill] sm:$0xff] %v3870_v35  ;;  %v3904_v35 = vld [vmem:[#allocation10 + $0x210] sm:$0xff]  ;;  %1825 = vmatpush.msra.mxu0 %v3900_v21 }
 0x19f   :  { %5643 = vst [vmem:[#allocation77_spill] sm:$0xff] %v3874_v10  ;;  %v3906_v10 = vld [vmem:[#allocation8 + $0x368] sm:$0xff]  ;;  %1877 = vmatpush.msra.mxu2 %v3904_v35 }
 0x1a0   :  { %5644 = vst [vmem:[#allocation78_spill] sm:$0xff] %v3876_v0  ;;  %v3910_v0 = vld [vmem:[#allocation8 + $0x568] sm:$0xff]  ;;  %1093 = vmatpush.msra.mxu1 %v3906_v10 }
 0x1a1   :  { %5645 = vst [vmem:[#allocation79_spill] sm:$0xff] %v3880_v51  ;;  %v3912_v51 = vld [vmem:[#allocation10 + $0xc0] sm:$0xff]  ;;  %1133 = vmatpush.msra.mxu3 %v3910_v0 }
 0x1a2   :  { %5646 = vst [vmem:[#allocation80_spill] sm:$0xff] %v3882_v6  ;;  %v5657_v6 = vld [vmem:[#allocation24_spill] sm:$0xff]  ;;  %1826 = vmatpush.msra.mxu0 %v3912_v51 }
 0x1a3   :  { %5647 = vst [vmem:[#allocation81_spill] sm:$0xff] %v3886_v58  ;;  %v1679_v13 = vmul.f32 %v3694_v41, %v5657_v6  ;;  %v3920_v58 = vld [vmem:[#allocation8 + $0x358] sm:$0xff]  ;;  %v3930_v41 = vld [vmem:[#allocation10 + $0xb0] sm:$0xff] }
 0x1a4   :  { %5648 = vst [vmem:[#allocation82_spill] sm:$0xff] %v3888_v16  ;;  %v3918_v16 = vld [vmem:[#allocation10 + $0x200] sm:$0xff]  ;;  %1094 = vmatpush.msra.mxu1 %v3920_v58  ;;  %1827 = vmatpush.msra.mxu0 %v3930_v41 }
 0x1a5   :  { %5649 = vst [vmem:[#allocation83_spill] sm:$0xff] %v3892_v17  ;;  %v3926_v17 = vld [vmem:[#allocation10 + $0xf8] sm:$0xff]  ;;  %1878 = vmatpush.msra.mxu2 %v3918_v16 }
 0x1a6   :  { %5650 = vst [vmem:[#allocation84_spill] sm:$0xff] %v3894_v57  ;;  %v3924_v57 = vld [vmem:[#allocation8 + $0x558] sm:$0xff] }
 0x1a7   :  { %5651 = vst [vmem:[#allocation85_spill] sm:$0xff] %v3898_v55  ;;  %v3936_v55 = vld [vmem:[#allocation8 + $0x548] sm:$0xff]  ;;  %1134 = vmatpush.msra.mxu3 %v3924_v57  ;;  %1943 = vmatpush.msrb.mxu2 %v3926_v17 }
 0x1a8   :  { %5652 = vst [vmem:[#allocation86_spill] sm:$0xff] %v3900_v21  ;;  %v3934_v21 = vld [vmem:[#allocation8 + $0x348] sm:$0xff] }
 0x1a9   :  { %5653 = vst [vmem:[#allocation87_spill] sm:$0xff] %v3904_v35  ;;  %v3938_v35 = vld.sshfl [vmem:[#allocation1 + $0x18] sm:$0xff pattern:$0x75316420]  ;;  %1095 = vmatpush.msra.mxu1 %v3934_v21  ;;  %1135 = vmatpush.msra.mxu3 %v3936_v55 }
 0x1aa   :  { %5654 = vst [vmem:[#allocation88_spill] sm:$0xff] %v3906_v10  ;;  %v3942_v10 = vld [vmem:[#allocation10 + $0xe8] sm:$0xff] }
 0x1ab   :  { %5655 = vst [vmem:[#allocation89_spill] sm:$0xff] %v3910_v0  ;;  %v3944_v0 = vld [vmem:[#allocation10 + $0xa0] sm:$0xff]  ;;  %1944 = vmatpush.msrb.mxu2 %v3942_v10 }
 0x1ac   :  { %5656 = vst [vmem:[#allocation90_spill] sm:$0xff] %v3912_v51  ;;  %v3948_v51 = vld [vmem:[#allocation8 + $0x338] sm:$0xff]  ;;  %1828 = vmatpush.msra.mxu0 %v3944_v0 }
 0x1ad   :  { %5658 = vst [vmem:[#allocation24_spill] sm:$0xff] %v3918_v16  ;;  %v1780_v16 = vld.sshfl [vmem:[#allocation1] sm:$0xff pattern:$0x75316420]  ;;  %1096 = vmatpush.msra.mxu1 %v3948_v51 }
 0x1ae   :  { %5659 = vst [vmem:[#allocation91_spill] sm:$0xff] %v3920_v58  ;;  %v3950_v58 = vld [vmem:[#allocation8 + $0x538] sm:$0xff] }
 0x1af   :  { %5660 = vst [vmem:[#allocation92_spill] sm:$0xff] %v3924_v57  ;;  %v3954_v57 = vld [vmem:[#allocation10 + $0xd8] sm:$0xff]  ;;  %1136 = vmatpush.msra.mxu3 %v3950_v58  ;;  %1097 = vmatpush.msra.mxu1 %v3960_v61 }
 0x1b0   :  { %5661 = vst [vmem:[#allocation93_spill] sm:$0xff] %v3926_v17  ;;  %v3956_v17 = vld [vmem:[#allocation10 + $0x90] sm:$0xff]  ;;  %1945 = vmatpush.msrb.mxu2 %v3954_v57 }
 0x1b1   :  { %5662 = vst [vmem:[#allocation94_spill] sm:$0xff] %v3930_v41  ;;  %v3966_v41 = vld [vmem:[#allocation10 + $0xc8] sm:$0xff]  ;;  %1829 = vmatpush.msra.mxu0 %v3956_v17 }
 0x1b2   :  { %5663 = vst [vmem:[#allocation95_spill] sm:$0xff] %v3934_v21  ;;  %v3968_v21 = vld [vmem:[#allocation10 + $0x80] sm:$0xff]  ;;  %1946 = vmatpush.msrb.mxu2 %v3966_v41 }
 0x1b3   :  { %5664 = vst [vmem:[#allocation96_spill] sm:$0xff] %v3936_v55  ;;  %v1790_v55 = vsel %vm165_vm0, %v1780_v16, 0.0  ;;  %1830 = vmatpush.msra.mxu0 %v3968_v21  ;;  %v3985_v16 = vld [vmem:[#allocation8 + $0x308] sm:$0xff] }
 0x1b4   :  { %5665 = vst [vmem:[#allocation97_spill] sm:$0xff] %v3942_v10  ;;  %v3973_v10 = vld [vmem:[#allocation8 + $0x318] sm:$0xff] }
 0x1b5   :  { %5666 = vst [vmem:[#allocation98_spill] sm:$0xff] %v3944_v0  ;;  %v3975_v0 = vld [vmem:[#allocation8 + $0x518] sm:$0xff]  ;;  %1098 = vmatpush.msra.mxu1 %v3973_v10 }
 0x1b6   :  { %1686 = vst [vmem:[#allocation1 + $0x10] ss:$2 sm:$0xff] %v1679_v13  ;;  %v3962_v13 = vld [vmem:[#allocation8 + $0x528] sm:$0xff] }
 0x1b7   :  { %5667 = vst [vmem:[#allocation99_spill] sm:$0xff] %v3948_v51  ;;  %1137 = vmatpush.msra.mxu3 %v3962_v13  ;;  %v3979_v51 = vld [vmem:[#allocation10 + $0xb8] sm:$0xff]  ;;  %1099 = vmatpush.msra.mxu1 %v3985_v16 }
 0x1b8   :  { %5668 = vst [vmem:[#allocation100_spill] sm:$0xff] %v3950_v58  ;;  %v3981_v58 = vld [vmem:[#allocation10 + $0x70] sm:$0xff]  ;;  %1947 = vmatpush.msrb.mxu2 %v3979_v51  ;;  %1100 = vmatmul.f32.vlgmr.msra.gmra.mxu1 %v3662_v29 }
 0x1b9   :  { %5669 = vst [vmem:[#allocation101_spill] sm:$0xff] %v3954_v57  ;;  %v3987_v57 = vld [vmem:[#allocation8 + $0x508] sm:$0xff]  ;;  %1138 = vmatpush.msra.mxu3 %v3975_v0  ;;  %1831 = vmatpush.msra.mxu0 %v3981_v58 }
 0x1ba   :  { %5670 = vst [vmem:[#allocation102_spill] sm:$0xff] %v3956_v17  ;;  %v1791_v17 = vrot.slane %v1790_v55, 4  ;;  %1208 = vmatpush.msrb.mxu1 %v3497_v39  ;;  %v4022_v39 = vld [vmem:[#allocation10 + $0x78] sm:$0xff] }
 0x1bb   :  { %5671 = vst [vmem:[#allocation103_spill] sm:$0xff] %v3960_v61  ;;  %v3991_v61 = vld [vmem:[#allocation10 + $0xa8] sm:$0xff]  ;;  %1139 = vmatpush.msra.mxu3 %v3987_v57 }
 0x1bc   :  { %5672 = vst [vmem:[#allocation104_spill] sm:$0xff] %v3966_v41  ;;  %1948 = vmatpush.msrb.mxu2 %v3991_v61  ;;  %v4001_v41 = vld [vmem:[#allocation10 + $0x98] sm:$0xff]  ;;  %1209 = vmatpush.msrb.mxu1 %v3508_v22  ;;  %v4029_v22 = vld [vmem:[#allocation10 + $0x30] sm:$0xff] }
 0x1bd   :  { %5673 = vst [vmem:[#allocation105_spill] sm:$0xff] %v3968_v21  ;;  %v3997_v21 = vld [vmem:[#allocation10 + $0x60] sm:$0xff]  ;;  %1248 = vmatpush.msrb.mxu3 %v3499_v40  ;;  %v4016_v29 = vld.sshfl [vmem:[#allocation1 + $0x10] sm:$0xff pattern:$0x75316420] }
 0x1be   :  { %5674 = vst [vmem:[#allocation106_spill] sm:$0xff] %v3973_v10  ;;  %v1792_v10 = vadd.f32 %v1791_v17, %v1790_v55  ;;  %1832 = vmatpush.msra.mxu0 %v3997_v21  ;;  %1949 = vmatpush.msrb.mxu2 %v4001_v41  ;;  %v892_v17 = vsel %vm165_vm0, %v3938_v35, 0.0 }
 0x1bf   :  { %5675 = vst [vmem:[#allocation107_spill] sm:$0xff] %v3975_v0  ;;  %v5679_v0 = vmax.f32 %v3783_v52, 0.0  ;;  %v4018_v52 = vld.sshfl [vmem:[#allocation1 + $0x18] sm:$0xff pattern:$0x75316420]  ;;  %1249 = vmatpush.msrb.mxu3 %v3510_v42  ;;  %1210 = vmatpush.msrb.mxu1 %v3516_v45  ;;  %v4033_v42 = vld [vmem:[#allocation10 + $0x68] sm:$0xff] }
 0x1c0   :  { %5676 = vst [vmem:[#allocation108_spill] sm:$0xff] %v3979_v51  ;;  %v4006_v51 = vld [vmem:[#allocation10 + $0x50] sm:$0xff]  ;;  %v1793_v40 = vrot.slane %v1792_v10, 2  ;;  %v893_v35 = vrot.slane %v892_v17, 4  ;;  %v4041_v45 = vld [vmem:[#allocation10 + $0x58] sm:$0xff] }
 0x1c1   :  { %5677 = vst [vmem:[#allocation109_spill] sm:$0xff] %v3985_v16  ;;  %1140 = vmatmul.f32.vlgmr.msra.gmra.mxu3 %v5679_v0  ;;  %v4012_v16 = vld [vmem:[#allocation10 + $0x40] sm:$0xff]  ;;  %1833 = vmatpush.msra.mxu0 %v4006_v51 }
 0x1c2   :  { %5678 = vst [vmem:[#allocation110_spill] sm:$0xff] %v3987_v57  ;;  %v4010_v57 = vld [vmem:[#allocation10 + $0x88] sm:$0xff]  ;;  %1250 = vmatpush.msrb.mxu3 %v3518_v34  ;;  %1211 = vmatpush.msrb.mxu1 %v3523_v49  ;;  %v4037_v0 = vld [vmem:[#allocation10 + $0x20] sm:$0xff]  ;;  %v1794_v55 = vadd.f32 %v1793_v40, %v1792_v10  ;;  %v4045_v34 = vld [vmem:[#allocation10 + $0x10] sm:$0xff]  ;;  %v4049_v49 = vpop.f32.mrf.mxu1 }
 0x1c3   :  { %5680 = vst [vmem:[#allocation111_spill] sm:$0xff] %v4018_v52  ;;  %1950 = vmatpush.msrb.mxu2 %v4010_v57  ;;  %1834 = vmatpush.msra.mxu0 %v4012_v16  ;;  %v4051_v52 = vld [vmem:[#allocation10 + $0x48] sm:$0xff] }
 0x1c4   :  { %1744 = vst [vmem:[#allocation1 + $0x10] ss:$2 sm:$0xff] %v5657_v6  ;;  %1251 = vmatpush.msrb.mxu3 %v3525_v50  ;;  %1212 = vmatpush.msrb.mxu1 %v3531_v54  ;;  %v894_v50 = vadd.f32 %v893_v35, %v892_v17  ;;  %v5683_v10 = vld [vmem:[#allocation29_spill] sm:$0xff]  ;;  %v4059_v54 = vld [vmem:[#allocation10] sm:$0xff] }
 0x1c5   :  { %1951 = vmatpush.msrb.mxu2 %v4022_v39  ;;  %5681 = vst [vmem:[#allocation112_spill] sm:$0xff] %v4037_v0  ;;  %1835 = vmatpush.msra.mxu0 %v4029_v22  ;;  %v853_v40 = vsel %vm165_vm0, %v5683_v10, -inf  ;;  %v4072_v17 = vld [vmem:[#allocation10 + $0x28] sm:$0xff]  ;;  %v4076_v10 = vld [vmem:[#allocation10 + $0x4e0] sm:$0xff] }
 0x1c6   :  { %1252 = vmatpush.msrb.mxu3 %v3533_v56  ;;  %5682 = vst [vmem:[#allocation113_spill] sm:$0xff] %v4049_v49  ;;  %1213 = vmatpush.msrb.mxu1 %v3542_v63  ;;  %v4061_v56 = vld [vmem:[#allocation10 + $0x38] sm:$0xff]  ;;  %v4068_v63 = vld [vmem:[#allocation10 + $0x4f0] sm:$0xff]  ;;  %v895_v35 = vrot.slane %v894_v50, 2 }
 0x1c7   :  { %1952 = vmatpush.msrb.mxu2 %v4033_v42  ;;  %1836 = vmatpush.msra.mxu0 %v4037_v0  ;;  %5684 = vst [vmem:[#allocation29_spill] sm:$0xff] %v4061_v56  ;;  %v1795_v0 = vrot.slane %v1794_v55, 1 }
 0x1c8   :  { %1253 = vmatpush.msrb.mxu3 %v3544_v3  ;;  %258 = vrot.lane.b32.xlu1 %v4049_v49, %s2956_s5  ;;  %v854_v3 = vrot.slane %v853_v40, 4 }
 0x1c9   :  { %1953 = vmatpush.msrb.mxu2 %v4041_v45  ;;  %1837 = vmatpush.msra.mxu0 %v4045_v34  ;;  %v1796_v49 = vadd.f32 %v1795_v0, %v1794_v55 }
 0x1ca   :  { %1214 = vmatpush.msrb.mxu1 %v3550_v7  ;;  %1254 = vmatpush.msrb.mxu3 %v3552_v12  ;;  %v4080_v7 = vld [vmem:[#allocation10 + $0x18] sm:$0xff]  ;;  %v4084_v12 = vld [vmem:[#allocation10 + $0x4d0] sm:$0xff] }
 0x1cb   :  { %1954 = vmatpush.msrb.mxu2 %v4051_v52  ;;  %1838 = vmatpush.msra.mxu0 %v4059_v54  ;;  %v4094_v0 = vmul.f32 0.25, %v1796_v49  ;;  %v4108_v49 = vld [vmem:[#allocation10 + $0x4e8] sm:$0xff] }
 0x1cc   :  { %1215 = vmatpush.msrb.mxu1 %v3558_v48  ;;  %1255 = vmatpush.msrb.mxu3 %v3560_v2  ;;  %v896_v48 = vadd.f32 %v895_v35, %v894_v50  ;;  %v4092_v2 = vld [vmem:[#allocation10 + $0x4c0] sm:$0xff]  ;;  %v4112_v50 = vpop.f32.mrf.mxu0 }
 0x1cd   :  { %1955 = vmatpush.msrb.mxu2 %v4061_v56  ;;  %1903 = vmatpush.msrb.mxu0 %v4068_v63  ;;  %v855_v56 = vmax.f32 %v853_v40, %v854_v3  ;;  %5685 = vst [vmem:[#allocation114_spill] sm:$0xff] %v4112_v50 }
 0x1ce   :  { %1216 = vmatpush.msrb.mxu1 %v3566_v9  ;;  %1256 = vmatpush.msrb.mxu3 %v3568_v14  ;;  %v4100_v9 = vld [vmem:[#allocation10 + $0x4f8] sm:$0xff]  ;;  %v4102_v14 = vld [vmem:[#allocation10 + $0x4b0] sm:$0xff] }
 0x1cf   :  { %1956 = vmatpush.msrb.mxu2 %v4072_v17  ;;  %1904 = vmatpush.msrb.mxu0 %v4076_v10  ;;  %v856_v55 = vrot.slane %v855_v56, 2 }
 0x1d0   :  { %1217 = vmatpush.msrb.mxu1 %v3574_v19  ;;  %1257 = vmatpush.msrb.mxu3 %v3576_v24  ;;  %v897_v19 = vrot.slane %v896_v48, 1  ;;  %v4110_v24 = vld [vmem:[#allocation10 + $0x4a0] sm:$0xff] }
 0x1d1   :  { %1957 = vmatpush.msrb.mxu2 %v4080_v7  ;;  %1905 = vmatpush.msrb.mxu0 %v4084_v12  ;;  %v857_v40 = vmax.f32 %v855_v56, %v856_v55  ;;  %v4136_v56 = vpop.f32.mrf.mxu3 }
 0x1d2   :  { %1218 = vmatpush.msrb.mxu1 %v3582_v30  ;;  %1258 = vmatpush.msrb.mxu3 %v3584_v31  ;;  %v1751_v30 = vsel %vm165_vm0, %v3821_v27, -inf  ;;  %v4120_v31 = vld [vmem:[#allocation10 + $0x4d8] sm:$0xff]  ;;  %v898_v3 = vadd.f32 %v897_v19, %v896_v48  ;;  %v4128_v27 = vld [vmem:[#allocation10 + $0x4c8] sm:$0xff] }
 0x1d3   :  { %1958 = vmatpush.msrb.mxu2 %v4088_v28  ;;  %1906 = vmatpush.msrb.mxu0 %v4092_v2  ;;  %5686 = vst [vmem:[#allocation115_spill] sm:$0xff] %v4120_v31  ;;  %v1752_v35 = vrot.slane %v1751_v30, 4  ;;  %v858_v48 = vrot.slane %v857_v40, 1 }
 0x1d4   :  { %1879 = vmatmul.f32.vlgmr.msra.gmra.mxu2 %v4094_v0  ;;  %1219 = vmatpush.msrb.mxu1 %v3590_v43  ;;  %v4122_v43 = vld [vmem:[#allocation10 + $0x490] sm:$0xff]  ;;  %5688 = vst [vmem:[#allocation117_spill] sm:$0xff] %v4128_v27  ;;  %v4146_v55 = vmul.f32 0.25, %v898_v3  ;;  %v4162_v3 = vld [vmem:[#allocation10 + $0x498] sm:$0xff] }
 0x1d5   :  { %2023 = vmatpush.msra.mxu2 %v4100_v9  ;;  %1907 = vmatpush.msrb.mxu0 %v4102_v14  ;;  %5687 = vst [vmem:[#allocation116_spill] sm:$0xff] %v4122_v43  ;;  %v1753_v19 = vmax.f32 %v1751_v30, %v1752_v35  ;;  %v4160_v30 = vld [vmem:[#allocation10 + $0x460] sm:$0xff]  ;;  %v4166_v35 = vpop.f32.mrf.mxu0 }
 0x1d6   :  { %1259 = vmatpush.msrb.mxu3 %v3592_v46  ;;  %1220 = vmatpush.msrb.mxu1 %v3598_v62  ;;  %v4130_v46 = vld [vmem:[#allocation10 + $0x480] sm:$0xff]  ;;  %5696 = vst [vmem:[#allocation121_spill] sm:$0xff] %v4162_v3 }
 0x1d7   :  { %2024 = vmatpush.msra.mxu2 %v4108_v49  ;;  %1908 = vmatpush.msrb.mxu0 %v4110_v24  ;;  %5689 = vst [vmem:[#allocation118_spill] sm:$0xff] %v4130_v46  ;;  %v5690_v62 = vld [vmem:[#allocation28_spill] sm:$0xff] }
 0x1d8   :  { %1260 = vmatpush.msrb.mxu3 %v3600_v5  ;;  %1221 = vmatpush.msrb.mxu1 %v3610_v23  ;;  %v795_v50 = vsel %vm165_vm0, %v5690_v62, 0.0  ;;  %v4140_v5 = vld [vmem:[#allocation10 + $0x4b8] sm:$0xff]  ;;  %v4142_v23 = vld [vmem:[#allocation10 + $0x470] sm:$0xff]  ;;  %5697 = vst [vmem:[#allocation122_spill] sm:$0xff] %v4166_v35 }
 0x1d9   :  { %2025 = vmatpush.msra.mxu2 %v4120_v31  ;;  %1909 = vmatpush.msrb.mxu0 %v4122_v43  ;;  %5691 = vst [vmem:[#allocation28_spill] sm:$0xff] %v4140_v5  ;;  %v796_v62 = vrot.slane %v795_v50, 4  ;;  %v4148_v43 = vld.sshfl [vmem:[#allocation1 + $0x8] sm:$0xff pattern:$0x75316420]  ;;  %v5704_v35 = vld [vmem:[#allocation31_spill] sm:$0xff] }
 0x1da   :  { %1261 = vmatpush.msrb.mxu3 %v3612_v4  ;;  %1222 = vmatpush.msrb.mxu1 %v3619_v25  ;;  %5692 = vst [vmem:[#allocation119_spill] sm:$0xff] %v4142_v23  ;;  %v4153_v4 = vld [vmem:[#allocation10 + $0x4a8] sm:$0xff]  ;;  %v5694_v25 = vld [vmem:[#allocation23_spill] sm:$0xff] }
 0x1db   :  { %2026 = vmatpush.msra.mxu2 %v4128_v27  ;;  %1910 = vmatpush.msrb.mxu0 %v4130_v46  ;;  %5693 = vst [vmem:[#allocation120_spill] sm:$0xff] %v4153_v4  ;;  %v1754_v46 = vrot.slane %v1753_v19, 2  ;;  %v5698_v27 = vld [vmem:[#allocation30_spill] sm:$0xff] }
 0x1dc   :  { %1262 = vmatpush.msrb.mxu3 %v3621_v26  ;;  %330 = vrot.lane.b32.xlu2 %v4136_v56, %s2956_s5  ;;  %2399 = vst [vmem:[#allocation1] ss:$2 sm:$0xff] %v5694_v25  ;;  %v4164_v26 = vmax.f32 %v857_v40, %v858_v48  ;;  %v5702_v40 = vld [vmem:[#allocation36_spill] sm:$0xff] }
 0x1dd   :  { %2027 = vmatpush.msra.mxu2 %v4140_v5  ;;  %1911 = vmatpush.msrb.mxu0 %v4142_v23  ;;  %5695 = vst [vmem:[#allocation23_spill] sm:$0xff] %v4160_v30  ;;  %v797_v5 = vadd.f32 %v796_v62, %v795_v50  ;;  %v5699_v23 = vld [vmem:[#allocation34_spill] sm:$0xff]  ;;  %v4180_v48 = vld [vmem:[#allocation10 + $0x440] sm:$0xff]  ;;  %v4184_v50 = vpop.f32.mrf.mxu1 }
 0x1de   :  { %1223 = vmatpush.msrb.mxu1 %v3627_v37  ;;  %1263 = vmatpush.msrb.mxu3 %v3629_v38  ;;  %v4172_v37 = vld [vmem:[#allocation10 + $0x450] sm:$0xff]  ;;  %v4176_v38 = vld [vmem:[#allocation10 + $0x488] sm:$0xff]  ;;  %5703 = vst [vmem:[#allocation36_spill] sm:$0xff] %v4180_v48 }
 0x1df   :  { %2028 = vmatpush.msra.mxu2 %v4153_v4  ;;  %1264 = vmatmul.f32.vlgmr.msrb.gmra.mxu3 %v4146_v55  ;;  %5700 = vst [vmem:[#allocation30_spill] sm:$0xff] %v4172_v37  ;;  %v798_v62 = vrot.slane %v797_v5, 2  ;;  %v5709_v4 = vld [vmem:[#allocation32_spill] sm:$0xff] }
 0x1e0   :  { %1288 = vmatpush.msra.mxu1 %v5698_v27  ;;  %1328 = vmatpush.msra.mxu3 %v5699_v23  ;;  %5701 = vst [vmem:[#allocation34_spill] sm:$0xff] %v4176_v38  ;;  %v4186_v27 = vld [vmem:[#allocation10 + $0x478] sm:$0xff]  ;;  %v1755_v23 = vmax.f32 %v1753_v19, %v1754_v46  ;;  %v4201_v46 = vpop.f32.mrf.mxu3  ;;  %v1693_v19 = vsel %vm165_vm0, %v3745_v59, 0.0 }
 0x1e1   :  { %1912 = vmatpush.msrb.mxu0 %v4160_v30  ;;  %2029 = vmatpush.msra.mxu2 %v4162_v3  ;;  %5705 = vst [vmem:[#allocation31_spill] sm:$0xff] %v4184_v50  ;;  %v5707_v3 = vld [vmem:[#allocation38_spill] sm:$0xff]  ;;  %v4190_v30 = vpop.f32.mrf.mxu2  ;;  %v5718_v59 = vld [vmem:[#allocation35_spill] sm:$0xff] }
 0x1e2   :  { %1224 = vmatmul.f32.vlgmr.msrb.gmra.mxu1 %v4164_v26  ;;  %1329 = vmatpush.msra.mxu3 %v5702_v40  ;;  %5706 = vst [vmem:[#allocation123_spill] sm:$0xff] %v4186_v27  ;;  %v4194_v40 = vld [vmem:[#allocation10 + $0x430] sm:$0xff] }
 0x1e3   :  { %1289 = vmatpush.msra.mxu1 %v5704_v35  ;;  %1913 = vmatpush.msrb.mxu0 %v4172_v37  ;;  %5708 = vst [vmem:[#allocation38_spill] sm:$0xff] %v4190_v30  ;;  %v4196_v35 = vld [vmem:[#allocation10 + $0x468] sm:$0xff]  ;;  %v5712_v30 = vld [vmem:[#allocation40_spill] sm:$0xff]  ;;  %v4209_v37 = vld.sshfl [vmem:[#allocation1] sm:$0xff pattern:$0x75316420] }
 0x1e4   :  { %2030 = vmatpush.msra.mxu2 %v4176_v38  ;;  %1330 = vmatpush.msra.mxu3 %v5707_v3  ;;  %5710 = vst [vmem:[#allocation32_spill] sm:$0xff] %v4201_v46  ;;  %v5711_v3 = vld [vmem:[#allocation33_spill] sm:$0xff]  ;;  %v799_v38 = vadd.f32 %v798_v62, %v797_v5  ;;  %v4217_v31 = vld.sshfl [vmem:[#allocation1 + $0x8] sm:$0xff pattern:$0x75316420]  ;;  %v1694_v5 = vrot.slane %v1693_v19, 4 }
 0x1e5   :  { %1290 = vmatpush.msra.mxu1 %v5709_v4  ;;  %1914 = vmatpush.msrb.mxu0 %v4180_v48  ;;  %v4207_v4 = vld [vmem:[#allocation10 + $0x420] sm:$0xff]  ;;  %v1756_v48 = vrot.slane %v1755_v23, 1  ;;  %5714 = vst [vmem:[#allocation40_spill] sm:$0xff] %v4209_v37  ;;  %v5719_v62 = vld [vmem:[#allocation42_spill] sm:$0xff] }
 0x1e6   :  { %2031 = vmatpush.msra.mxu2 %v4186_v27  ;;  %456 = vrot.lane.b32.xlu2 %v4184_v50, %s2956_s5  ;;  %5713 = vst [vmem:[#allocation33_spill] sm:$0xff] %v4207_v4  ;;  %v4213_v27 = vld [vmem:[#allocation10 + $0x458] sm:$0xff]  ;;  %v4215_v50 = vpop.f32.mrf.mxu0  ;;  %v4233_v37 = vld [vmem:[#allocation10 + $0x400] sm:$0xff] }
 0x1e7   :  { %1291 = vmatpush.msra.mxu1 %v5711_v3  ;;  %1331 = vmatpush.msra.mxu3 %v5712_v30  ;;  %5715 = vst [vmem:[#allocation124_spill] sm:$0xff] %v4213_v27  ;;  %v4222_v30 = vld [vmem:[#allocation10 + $0x410] sm:$0xff]  ;;  %v4227_v3 = vld [vmem:[#allocation10 + $0x448] sm:$0xff] }
 0x1e8   :  { %1915 = vmatpush.msrb.mxu0 %v4194_v40  ;;  %2032 = vmatpush.msra.mxu2 %v4196_v35  ;;  %5716 = vst [vmem:[#allocation125_spill] sm:$0xff] %v4215_v50  ;;  %v5720_v50 = vld [vmem:[#allocation37_spill] sm:$0xff] }
 0x1e9   :  { %5717 = vst [vmem:[#allocation126_spill] sm:$0xff] %v4217_v31  ;;  %528 = vrot.lane.b32.xlu1 %v4201_v46, %s2956_s5  ;;  %1292 = vmatpush.msra.mxu1 %v5718_v59  ;;  %v1757_v59 = vmax.f32 %v1755_v23, %v1756_v48  ;;  %v800_v31 = vrot.slane %v799_v38, 1  ;;  %v4237_v46 = vld [vmem:[#allocation10 + $0x438] sm:$0xff]  ;;  %v4247_v48 = vpop.f32.mrf.mxu2 }
 0x1ea   :  { %2414 = vst [vmem:[#allocation1] ss:$2 sm:$0xff] %v5694_v25  ;;  %1332 = vmatpush.msra.mxu3 %v5719_v62  ;;  %1916 = vmatpush.msrb.mxu0 %v4207_v4  ;;  %v4241_v62 = vld [vmem:[#allocation10 + $0x2f8] sm:$0xff]  ;;  %v1695_v4 = vadd.f32 %v1694_v5, %v1693_v19 }
 0x1eb   :  { %2033 = vmatpush.msra.mxu2 %v4213_v27  ;;  %1293 = vmatpush.msra.mxu1 %v3684_v47  ;;  %5721 = vst [vmem:[#allocation35_spill] sm:$0xff] %v4237_v46  ;;  %v5723_v27 = vld [vmem:[#allocation44_spill] sm:$0xff]  ;;  %v4245_v47 = vld [vmem:[#allocation10 + $0x428] sm:$0xff]  ;;  %v4252_v23 = vld [vmem:[#allocation10 + $0x418] sm:$0xff] }
 0x1ec   :  { %1333 = vmatpush.msra.mxu3 %v5720_v50  ;;  %1917 = vmatpush.msrb.mxu0 %v4222_v30  ;;  %5722 = vst [vmem:[#allocation42_spill] sm:$0xff] %v4241_v62  ;;  %v4250_v50 = vld [vmem:[#allocation10 + $0x2e8] sm:$0xff]  ;;  %v4262_v5 = vld [vmem:[#allocation10 + $0x2d8] sm:$0xff] }
 0x1ed   :  { %2034 = vmatpush.msra.mxu2 %v4227_v3  ;;  %1294 = vmatpush.msra.mxu1 %v3697_v36  ;;  %5724 = vst [vmem:[#allocation37_spill] sm:$0xff] %v4247_v48  ;;  %v801_v36 = vadd.f32 %v800_v31, %v799_v38  ;;  %v1696_v48 = vrot.slane %v1695_v4, 2  ;;  %v5729_v31 = vld [vmem:[#allocation39_spill] sm:$0xff] }
 0x1ee   :  { %1334 = vmatpush.msra.mxu3 %v5723_v27  ;;  %1918 = vmatpush.msrb.mxu0 %v4233_v37  ;;  %5725 = vst [vmem:[#allocation44_spill] sm:$0xff] %v4250_v50  ;;  %v1205_v38 = vpop.f32.mrf.mxu0 }
 0x1ef   :  { %1839 = vmatmul.f32.vlgmr.msra.gmra.mxu0 %v1757_v59  ;;  %2035 = vmatpush.msra.mxu2 %v4237_v46  ;;  %v4266_v46 = vstv %s4229_s29 }
 0x1f0   :  { %1983 = vmatpush.msra.mxu0 %v4241_v62  ;;  %1295 = vmatpush.msra.mxu1 %v3707_v44  ;;  %5728 = vst [vmem:[#allocation129_spill] sm:$0xff] %v4266_v46  ;;  %v4270_v44 = vld [vmem:[#allocation10 + $0x408] sm:$0xff]  ;;  %v4278_v62 = vadd.f32 %v1205_v38, %v4266_v46  ;;  %v5736_v38 = vld [vmem:[#allocation64_spill] sm:$0xff] }
 0x1f1   :  { %v4256_v27 = vld.sshfl [vmem:[#allocation1] sm:$0xff pattern:$0x75316420]  ;;  %v4258_v19 = vld.sshfl [vmem:[#allocation1 + $0x8] sm:$0xff pattern:$0x75316420]  ;;  %1335 = vmatpush.msra.mxu3 %v3712_v1  ;;  %2036 = vmatpush.msra.mxu2 %v4245_v47 }
 0x1f2   :  { %5726 = vst [vmem:[#allocation127_spill] sm:$0xff] %v4256_v27  ;;  %1984 = vmatpush.msra.mxu0 %v4250_v50  ;;  %1296 = vmatpush.msra.mxu1 %v5729_v31  ;;  %v5730_v27 = vld [vmem:[#allocation27_spill] sm:$0xff]  ;;  %v4274_v1 = vld [vmem:[#allocation10 + $0x2c8] sm:$0xff]  ;;  %v5732_v50 = vld [vmem:[#allocation46_spill] sm:$0xff] }
 0x1f3   :  { %5727 = vst [vmem:[#allocation128_spill] sm:$0xff] %v4258_v19  ;;  %1336 = vmatpush.msra.mxu3 %v5730_v27  ;;  %2037 = vmatpush.msra.mxu2 %v4252_v23  ;;  %v806_v19 = vadd.f32 %v5563_v15, %v801_v36  ;;  %v4284_v31 = vld [vmem:[#allocation10 + $0x2b8] sm:$0xff]  ;;  %v1697_v27 = vadd.f32 %v1696_v48, %v1695_v4  ;;  %v5734_v15 = vld [vmem:[#allocation41_spill] sm:$0xff] }
 0x1f4   :  { %2439 = vst [vmem:[#allocation1] ss:$2 sm:$0xff] %v5592_v18  ;;  %1985 = vmatpush.msra.mxu0 %v4262_v5  ;;  %1297 = vmatpush.msra.mxu1 %v3723_v11  ;;  %v4291_v36 = vld [vmem:[#allocation10 + $0x2a8] sm:$0xff] }
 0x1f5   :  { %5731 = vst [vmem:[#allocation39_spill] sm:$0xff] %v4274_v1  ;;  %1337 = vmatpush.msra.mxu3 %v5732_v50  ;;  %2038 = vmatpush.msra.mxu2 %v4270_v44  ;;  %v811_v11 = vmul.f32 %v3394_v60, %v806_v19  ;;  %v4296_v50 = vpop.f32.mrf.mxu2  ;;  %v5743_v60 = vld [vmem:[#allocation52_spill] sm:$0xff]  ;;  %v5744_v19 = vld [vmem:[#allocation45_spill] sm:$0xff] }
 0x1f6   :  { %5733 = vst [vmem:[#allocation27_spill] sm:$0xff] %v4284_v31  ;;  %1986 = vmatpush.msra.mxu0 %v4274_v1  ;;  %1298 = vmatpush.msra.mxu1 %v3731_v53  ;;  %v5740_v53 = vld [vmem:[#allocation48_spill] sm:$0xff]  ;;  %v5741_v1 = vld [vmem:[#allocation43_spill] sm:$0xff] }
 0x1f7   :  { %1338 = vmatpush.msra.mxu3 %v5734_v15  ;;  %1959 = vmatmul.f32.vlgmr.msrb.gmra.mxu2 %v1757_v59  ;;  %5735 = vst [vmem:[#allocation46_spill] sm:$0xff] %v4291_v36  ;;  %v4304_v15 = vld [vmem:[#allocation10 + $0x298] sm:$0xff]  ;;  %v1698_v59 = vrot.slane %v1697_v27, 1 }
 0x1f8   :  { %2147 = vmatpush.msrb.mxu2 %v5736_v38  ;;  %1987 = vmatpush.msra.mxu0 %v4284_v31  ;;  %5737 = vst [vmem:[#allocation41_spill] sm:$0xff] %v4296_v50  ;;  %v5745_v38 = vld [vmem:[#allocation54_spill] sm:$0xff]  ;;  %v4322_v50 = vld [vmem:[#allocation10 + $0x278] sm:$0xff]  ;;  %v5751_v31 = vld [vmem:[#allocation49_spill] sm:$0xff] }
 0x1f9   :  { %1299 = vmatpush.msra.mxu1 %v5740_v53  ;;  %1339 = vmatpush.msra.mxu3 %v5741_v1  ;;  %5742 = vst [vmem:[#allocation48_spill] sm:$0xff] %v4304_v15  ;;  %v4316_v1 = vadd.f32 %v3403_v32, %v811_v11  ;;  %v5747_v53 = vld [vmem:[#allocation56_spill] sm:$0xff]  ;;  %v5753_v11 = vld [vmem:[#allocation62_spill] sm:$0xff] }
 0x1fa   :  { %2148 = vmatpush.msrb.mxu2 %v5743_v60  ;;  %1988 = vmatpush.msra.mxu0 %v4291_v36  ;;  %v5749_v60 = vld [vmem:[#allocation58_spill] sm:$0xff]  ;;  %5750 = vst [vmem:[#allocation52_spill] sm:$0xff] %v4322_v50  ;;  %v1699_v36 = vadd.f32 %v1698_v59, %v1697_v27  ;;  %v5752_v32 = vld [vmem:[#allocation60_spill] sm:$0xff]  ;;  %v5757_v59 = vld [vmem:[#allocation51_spill] sm:$0xff] }
 0x1fb   :  { %v4298_v4 = vld.sshfl [vmem:[#allocation1] sm:$0xff pattern:$0x75316420]  ;;  %v4300_v48 = vld.sshfl [vmem:[#allocation1 + $0x8] sm:$0xff pattern:$0x75316420]  ;;  %1300 = vmatpush.msra.mxu1 %v5744_v19  ;;  %1340 = vmatpush.msra.mxu3 %v5745_v38  ;;  %v4329_v19 = vstv %s4288_s30 }
 0x1fc   :  { %5738 = vst [vmem:[#allocation64_spill] sm:$0xff] %v4298_v4  ;;  %v4313_v4 = vld [vmem:[#allocation10 + $0x288] sm:$0xff]  ;;  %2149 = vmatpush.msrb.mxu2 %v5747_v53  ;;  %1989 = vmatpush.msra.mxu0 %v4304_v15  ;;  %v5754_v38 = vld [vmem:[#allocation26_spill] sm:$0xff] }
 0x1fd   :  { %5739 = vst [vmem:[#allocation130_spill] sm:$0xff] %v4300_v48  ;;  %v5748_v48 = vld [vmem:[#allocation47_spill] sm:$0xff]  ;;  %1341 = vmatpush.msra.mxu3 %v5749_v60  ;;  %v5758_v53 = vld [vmem:[#allocation25_spill] sm:$0xff] }
 0x1fe   :  { %2454 = vst [vmem:[#allocation1] ss:$2 sm:$0xff] %v5592_v18  ;;  %1301 = vmatpush.msra.mxu1 %v5748_v48  ;;  %2150 = vmatpush.msrb.mxu2 %v5751_v31  ;;  %v5436_v48 = vmax.f32 %v4316_v1, 0.0  ;;  %v4342_v60 = vld [vmem:[#allocation10 + $0x268] sm:$0xff] }
 0x1ff   :  { %5746 = vst [vmem:[#allocation43_spill] sm:$0xff] %v4313_v4  ;;  %1990 = vmatpush.msra.mxu0 %v4313_v4  ;;  %1342 = vmatpush.msra.mxu3 %v5753_v11  ;;  %v5760_v11 = vld [vmem:[#allocation66_spill] sm:$0xff]  ;;  %v4373_v4 = vstv %s4326_s15  ;;  %v4401_v15 = vld [vmem:[#allocation10 + $0x208] sm:$0xff] }
 0x200   :  { %1302 = vmatpush.msra.mxu1 %v5752_v32  ;;  %2151 = vmatpush.msrb.mxu2 %v5754_v38  ;;  %5759 = vst [vmem:[#allocation56_spill] sm:$0xff] %v4342_v60  ;;  %v1722_v32 = vadd.f32 %v4329_v19, %v1699_v36  ;;  %v4349_v38 = vld [vmem:[#allocation10 + $0x258] sm:$0xff]  ;;  %v4360_v36 = vld.sshfl [vmem:[#allocation1 + $0x18] sm:$0xff pattern:$0x75316420] }
 0x201   :  { %1991 = vmatpush.msra.mxu0 %v4322_v50  ;;  %1343 = vmatpush.msra.mxu3 %v5758_v53  ;;  %5761 = vst [vmem:[#allocation47_spill] sm:$0xff] %v4349_v38  ;;  %v4358_v53 = vld.sshfl [vmem:[#allocation1 + $0x10] sm:$0xff pattern:$0x75316420] }
 0x202   :  { %1303 = vmatpush.msra.mxu1 %v5757_v59  ;;  %2152 = vmatpush.msrb.mxu2 %v5760_v11  ;;  %v5762_v59 = vld [vmem:[#allocation53_spill] sm:$0xff]  ;;  %5763 = vst [vmem:[#allocation58_spill] sm:$0xff] %v4360_v36  ;;  %v5764_v11 = vld [vmem:[#allocation55_spill] sm:$0xff] }
 0x203   :  { %1304 = vmatmul.f32.vlgmr.msra.gmra.mxu1 %v5436_v48  ;;  %1408 = vmatpush.msrb.mxu3 %v5762_v59  ;;  %1783 = vst [vmem:[#allocation1 + $0x10] ss:$2 sm:$0xff] %v5657_v6  ;;  %v5765_v48 = vld [vmem:[#allocation57_spill] sm:$0xff]  ;;  %v5768_v36 = vld [vmem:[#allocation63_spill] sm:$0xff] }
 0x204   :  { %1368 = vmatpush.msrb.mxu1 %v3803_v8  ;;  %1992 = vmatpush.msra.mxu0 %v4342_v60  ;;  %v4367_v50 = vld [vmem:[#allocation10 + $0x248] sm:$0xff]  ;;  %5782 = vst [vmem:[#allocation25_spill] sm:$0xff] %v4401_v15 }
 0x205   :  { %v4336_v27 = vld.sshfl [vmem:[#allocation1] sm:$0xff pattern:$0x75316420]  ;;  %v4338_v31 = vld.sshfl [vmem:[#allocation1 + $0x8] sm:$0xff pattern:$0x75316420]  ;;  %2153 = vmatpush.msrb.mxu2 %v5764_v11  ;;  %1409 = vmatpush.msrb.mxu3 %v3817_v33 }
 0x206   :  { %5755 = vst [vmem:[#allocation45_spill] sm:$0xff] %v4336_v27  ;;  %v4351_v27 = vpop.f32.mrf.mxu2  ;;  %1369 = vmatpush.msrb.mxu1 %v5765_v48  ;;  %1993 = vmatpush.msra.mxu0 %v4349_v38  ;;  %v5767_v59 = vld [vmem:[#allocation61_spill] sm:$0xff]  ;;  %v4377_v11 = vld [vmem:[#allocation10 + $0x238] sm:$0xff]  ;;  %v5774_v38 = vld [vmem:[#allocation68_spill] sm:$0xff] }
 0x207   :  { %5756 = vst [vmem:[#allocation54_spill] sm:$0xff] %v4338_v31  ;;  %v4354_v31 = vstv %s4309_s14  ;;  %2154 = vmatpush.msrb.mxu2 %v5767_v59  ;;  %1410 = vmatpush.msrb.mxu3 %v3834_v20  ;;  %v5770_v48 = vld [vmem:[#allocation65_spill] sm:$0xff] }
 0x208   :  { %2473 = vst [vmem:[#allocation1] ss:$2 sm:$0xff] %v5694_v25  ;;  %v1727_v8 = vmul.f32 %v4354_v31, %v1722_v32  ;;  %1370 = vmatpush.msrb.mxu1 %v5768_v36  ;;  %1994 = vmatpush.msra.mxu0 %v4367_v50  ;;  %v5773_v32 = vld [vmem:[#allocation67_spill] sm:$0xff]  ;;  %v4387_v59 = vld [vmem:[#allocation10 + $0x228] sm:$0xff] }
 0x209   :  { %5766 = vst [vmem:[#allocation49_spill] sm:$0xff] %v4367_v50  ;;  %2155 = vmatpush.msrb.mxu2 %v5770_v48  ;;  %1411 = vmatpush.msrb.mxu3 %v5774_v38  ;;  %v5776_v20 = vld [vmem:[#allocation69_spill] sm:$0xff]  ;;  %v5777_v50 = vld [vmem:[#allocation70_spill] sm:$0xff]  ;;  %v5778_v48 = vld [vmem:[#allocation71_spill] sm:$0xff] }
 0x20a   :  { %5769 = vst [vmem:[#allocation60_spill] sm:$0xff] %v4377_v11  ;;  %1371 = vmatpush.msrb.mxu1 %v5773_v32  ;;  %v1732_v36 = vadd.f32 %v4373_v4, %v1727_v8  ;;  %1995 = vmatpush.msra.mxu0 %v4377_v11  ;;  %v5779_v32 = vld [vmem:[#allocation72_spill] sm:$0xff]  ;;  %v5781_v8 = vld [vmem:[#allocation74_spill] sm:$0xff] }
 0x20b   :  { %5775 = vst [vmem:[#allocation51_spill] sm:$0xff] %v4387_v59  ;;  %2156 = vmatpush.msrb.mxu2 %v5776_v20  ;;  %1412 = vmatpush.msrb.mxu3 %v5778_v48  ;;  %v5785_v48 = vld [vmem:[#allocation76_spill] sm:$0xff] }
 0x20c   :  { %1372 = vmatpush.msrb.mxu1 %v5777_v50  ;;  %1996 = vmatpush.msra.mxu0 %v4387_v59  ;;  %v1736_v11 = vmax.f32 %v1732_v36, 0.0  ;;  %v5784_v50 = vld [vmem:[#allocation75_spill] sm:$0xff]  ;;  %v5786_v59 = vld [vmem:[#allocation77_spill] sm:$0xff]  ;;  %v5790_v36 = vld [vmem:[#allocation80_spill] sm:$0xff] }
 0x20d   :  { %2157 = vmatpush.msrb.mxu2 %v5779_v32  ;;  %1413 = vmatpush.msrb.mxu3 %v5781_v8  ;;  %v5787_v32 = vld [vmem:[#allocation79_spill] sm:$0xff] }
 0x20e   :  { %v1325_v38 = vpop.f32.mrf.mxu2  ;;  %1919 = vmatmul.f32.vlgmr.msrb.gmra.mxu0 %v1736_v11  ;;  %2039 = vmatmul.f32.vlgmr.msra.gmra.mxu2 %v1736_v11 }
 0x20f   :  { %v4381_v33 = vld.sshfl [vmem:[#allocation1] sm:$0xff pattern:$0x75316420]  ;;  %v4383_v60 = vld.sshfl [vmem:[#allocation1 + $0x8] sm:$0xff pattern:$0x75316420]  ;;  %v4404_v20 = vadd.f32 %v1325_v38, %v4266_v46  ;;  %2158 = vmatpush.msrb.mxu2 %v5784_v50  ;;  %1414 = vmatpush.msrb.mxu3 %v5786_v59 }
 0x210   :  { %5771 = vst [vmem:[#allocation62_spill] sm:$0xff] %v4381_v33  ;;  %v4395_v33 = vld [vmem:[#allocation10 + $0x218] sm:$0xff]  ;;  %v5791_v38 = vld [vmem:[#allocation78_spill] sm:$0xff]  ;;  %v5792_v50 = vld [vmem:[#allocation81_spill] sm:$0xff]  ;;  %1344 = vmatmul.f32.vlgmr.msra.gmra.mxu3 %v4164_v26 }
 0x211   :  { %5772 = vst [vmem:[#allocation26_spill] sm:$0xff] %v4383_v60  ;;  %v5780_v60 = vld [vmem:[#allocation73_spill] sm:$0xff]  ;;  %1997 = vmatpush.msra.mxu0 %v4395_v33  ;;  %2159 = vmatpush.msrb.mxu2 %v5787_v32  ;;  %v5794_v59 = vld [vmem:[#allocation84_spill] sm:$0xff]  ;;  %v5795_v46 = vld [vmem:[#allocation82_spill] sm:$0xff] }
 0x212   :  { %2488 = vst [vmem:[#allocation1] ss:$2 sm:$0xff] %v5694_v25  ;;  %1373 = vmatpush.msrb.mxu1 %v5780_v60  ;;  %1415 = vmatpush.msrb.mxu3 %v5792_v50  ;;  %v5796_v32 = vld [vmem:[#allocation85_spill] sm:$0xff]  ;;  %v5803_v50 = vld [vmem:[#allocation90_spill] sm:$0xff]  ;;  %v5813_v26 = vld [vmem:[#allocation99_spill] sm:$0xff] }
 0x213   :  { %5783 = vst [vmem:[#allocation66_spill] sm:$0xff] %v4404_v20  ;;  %1998 = vmatpush.msra.mxu0 %v4401_v15  ;;  %v5799_v20 = vld [vmem:[#allocation86_spill] sm:$0xff]  ;;  %v5801_v15 = vld [vmem:[#allocation24_spill] sm:$0xff] }
 0x214   :  { %1374 = vmatpush.msrb.mxu1 %v5785_v48  ;;  %v5793_v48 = vld [vmem:[#allocation83_spill] sm:$0xff]  ;;  %1416 = vmatpush.msrb.mxu3 %v5796_v32  ;;  %v5810_v32 = vld [vmem:[#allocation96_spill] sm:$0xff] }
 0x215   :  { %2107 = vmatpush.msrb.mxu0 %v5791_v38  ;;  %2160 = vmatpush.msrb.mxu2 %v5793_v48  ;;  %v5802_v38 = vld [vmem:[#allocation91_spill] sm:$0xff]  ;;  %v5804_v48 = vld [vmem:[#allocation92_spill] sm:$0xff] }
 0x216   :  { %1375 = vmatpush.msrb.mxu1 %v5790_v36  ;;  %v5800_v36 = vld [vmem:[#allocation89_spill] sm:$0xff]  ;;  %1999 = vmatmul.f32.vlgmr.msra.gmra.mxu0 %v4094_v0  ;;  %v4552_v0 = vld [vmem:[#allocation10 + $0x160] sm:$0xff] }
 0x217   :  { %2108 = vmatpush.msrb.mxu0 %v5795_v46  ;;  %1417 = vmatpush.msrb.mxu3 %v5800_v36  ;;  %v1784_v46 = vld.sshfl [vmem:[#allocation1 + $0x10] sm:$0xff pattern:$0x75316420]  ;;  %5834 = vst [vmem:[#allocation70_spill] sm:$0xff] %v4552_v0 }
 0x218   :  { %1376 = vmatpush.msrb.mxu1 %v5794_v59  ;;  %v5811_v36 = vld [vmem:[#allocation97_spill] sm:$0xff]  ;;  %v1804_v11 = vsel %vm165_vm0, %v1784_v46, 0.0  ;;  %v5821_v46 = vld [vmem:[#allocation107_spill] sm:$0xff] }
 0x219   :  { %v4412_v60 = vld.sshfl [vmem:[#allocation1] sm:$0xff pattern:$0x75316420]  ;;  %v4414_v8 = vld.sshfl [vmem:[#allocation1 + $0x8] sm:$0xff pattern:$0x75316420]  ;;  %2109 = vmatpush.msrb.mxu0 %v5799_v20  ;;  %1418 = vmatpush.msrb.mxu3 %v5804_v48 }
 0x21a   :  { %5788 = vst [vmem:[#allocation53_spill] sm:$0xff] %v4412_v60  ;;  %v5797_v60 = vld [vmem:[#allocation87_spill] sm:$0xff]  ;;  %v5808_v20 = vld [vmem:[#allocation94_spill] sm:$0xff]  ;;  %v5815_v48 = vld [vmem:[#allocation101_spill] sm:$0xff] }
 0x21b   :  { %5789 = vst [vmem:[#allocation55_spill] sm:$0xff] %v4414_v8  ;;  %2161 = vmatpush.msrb.mxu2 %v5797_v60  ;;  %v5798_v8 = vld [vmem:[#allocation88_spill] sm:$0xff]  ;;  %2110 = vmatpush.msrb.mxu0 %v5803_v50 }
 0x21c   :  { %2507 = vst [vmem:[#allocation1] ss:$2 sm:$0xff] %v5592_v18  ;;  %1377 = vmatpush.msrb.mxu1 %v5798_v8  ;;  %v5807_v8 = vld [vmem:[#allocation93_spill] sm:$0xff]  ;;  %1419 = vmatpush.msrb.mxu3 %v5810_v32  ;;  %v5814_v50 = vld [vmem:[#allocation100_spill] sm:$0xff] }
 0x21d   :  { %2162 = vmatpush.msrb.mxu2 %v5801_v15  ;;  %2111 = vmatpush.msrb.mxu0 %v5808_v20  ;;  %v5809_v15 = vld [vmem:[#allocation95_spill] sm:$0xff]  ;;  %v5818_v32 = vld [vmem:[#allocation104_spill] sm:$0xff] }
 0x21e   :  { %1378 = vmatpush.msrb.mxu1 %v5802_v38  ;;  %v5812_v38 = vld [vmem:[#allocation98_spill] sm:$0xff]  ;;  %1420 = vmatpush.msrb.mxu3 %v5814_v50  ;;  %v5817_v20 = vld [vmem:[#allocation103_spill] sm:$0xff]  ;;  %v5823_v50 = vld [vmem:[#allocation108_spill] sm:$0xff] }
 0x21f   :  { %2227 = vmatpush.msra.mxu2 %v5807_v8  ;;  %2112 = vmatpush.msrb.mxu0 %v5812_v38  ;;  %v5816_v8 = vld [vmem:[#allocation102_spill] sm:$0xff] }
 0x220   :  { %1379 = vmatpush.msrb.mxu1 %v5809_v15  ;;  %1421 = vmatpush.msrb.mxu3 %v3962_v13  ;;  %v1805_v15 = vrot.slane %v1804_v11, 4  ;;  %v5820_v38 = vld [vmem:[#allocation106_spill] sm:$0xff]  ;;  %v5825_v13 = vld [vmem:[#allocation109_spill] sm:$0xff] }
 0x221   :  { %2228 = vmatpush.msra.mxu2 %v5811_v36  ;;  %2113 = vmatpush.msrb.mxu0 %v5816_v8  ;;  %v5819_v36 = vld [vmem:[#allocation105_spill] sm:$0xff] }
 0x222   :  { %1380 = vmatpush.msrb.mxu1 %v5813_v26  ;;  %1422 = vmatpush.msrb.mxu3 %v5821_v46  ;;  %v4475_v46 = vld [vmem:[#allocation10 + $0x3e0] sm:$0xff] }
 0x223   :  { %v4432_v59 = vld.sshfl [vmem:[#allocation1] sm:$0xff pattern:$0x75316420]  ;;  %v4435_v60 = vld.sshfl [vmem:[#allocation1 + $0x8] sm:$0xff pattern:$0x75316420]  ;;  %2229 = vmatpush.msra.mxu2 %v5815_v48  ;;  %2114 = vmatpush.msrb.mxu0 %v5819_v36  ;;  %v1806_v36 = vadd.f32 %v1805_v15, %v1804_v11 }
 0x224   :  { %5805 = vst [vmem:[#allocation57_spill] sm:$0xff] %v4432_v59  ;;  %1381 = vmatpush.msrb.mxu1 %v5817_v20  ;;  %v4459_v48 = vld [vmem:[#allocation10 + $0x1f0] sm:$0xff] }
 0x225   :  { %5806 = vst [vmem:[#allocation61_spill] sm:$0xff] %v4435_v60  ;;  %2230 = vmatpush.msra.mxu2 %v5818_v32  ;;  %2115 = vmatpush.msrb.mxu0 %v3981_v58  ;;  %v5826_v20 = vld [vmem:[#allocation110_spill] sm:$0xff]  ;;  %v5827_v58 = vmax.f32 %v4316_v1, 0.0  ;;  %v4487_v1 = vld [vmem:[#allocation10 + $0x1c0] sm:$0xff] }
 0x226   :  { %2522 = vst [vmem:[#allocation1] ss:$2 sm:$0xff] %v5592_v18  ;;  %1382 = vmatpush.msrb.mxu1 %v5820_v38  ;;  %1423 = vmatpush.msrb.mxu3 %v5826_v20  ;;  %v4465_v32 = vld [vmem:[#allocation10 + $0x3f0] sm:$0xff]  ;;  %v4470_v38 = vld [vmem:[#allocation10 + $0x1e0] sm:$0xff]  ;;  %v1797_v20 = vsel %vm165_vm0, %v4148_v43, 0.0 }
 0x227   :  { %2231 = vmatpush.msra.mxu2 %v5823_v50  ;;  %1424 = vmatmul.f32.vlgmr.msrb.gmra.mxu3 %v5827_v58  ;;  %v4479_v11 = vld [vmem:[#allocation10 + $0x1d0] sm:$0xff]  ;;  %v1798_v43 = vrot.slane %v1797_v20, 4 }
 0x228   :  { %1383 = vmatpush.msrb.mxu1 %v5825_v13  ;;  %1883 = vmatpush.msra.mxu3 %v4465_v32  ;;  %v4499_v15 = vld [vmem:[#allocation10 + $0x3b0] sm:$0xff]  ;;  %v4507_v13 = vld [vmem:[#allocation10 + $0x1a0] sm:$0xff] }
 0x229   :  { %2232 = vmatpush.msra.mxu2 %v3991_v61  ;;  %1384 = vmatmul.f32.vlgmr.msrb.gmra.mxu1 %v4146_v55  ;;  %v4483_v61 = vld [vmem:[#allocation10 + $0x3d0] sm:$0xff]  ;;  %v1807_v55 = vrot.slane %v1806_v36, 2 }
 0x22a   :  { %1843 = vmatpush.msra.mxu1 %v4459_v48  ;;  %2116 = vmatpush.msrb.mxu0 %v3997_v21  ;;  %v4491_v21 = vld [vmem:[#allocation10 + $0x3c0] sm:$0xff] }
 0x22b   :  { %2233 = vmatpush.msra.mxu2 %v4001_v41  ;;  %1884 = vmatpush.msra.mxu3 %v4475_v46  ;;  %v4495_v41 = vld [vmem:[#allocation10 + $0x1b0] sm:$0xff] }
 0x22c   :  { %1844 = vmatpush.msra.mxu1 %v4470_v38  ;;  %2117 = vmatpush.msrb.mxu0 %v4006_v51  ;;  %v1808_v51 = vadd.f32 %v1807_v55, %v1806_v36  ;;  %v4530_v55 = vld [vmem:[#allocation10 + $0x180] sm:$0xff] }
 0x22d   :  { %v4455_v26 = vld.sshfl [vmem:[#allocation1] sm:$0xff pattern:$0x75316420]  ;;  %v4461_v8 = vld.sshfl [vmem:[#allocation1 + $0x8] sm:$0xff pattern:$0x75316420]  ;;  %2234 = vmatpush.msra.mxu2 %v4010_v57  ;;  %1885 = vmatpush.msra.mxu3 %v4483_v61 }
 0x22e   :  { %5822 = vst [vmem:[#allocation63_spill] sm:$0xff] %v4455_v26  ;;  %1845 = vmatpush.msra.mxu1 %v4479_v11  ;;  %2118 = vmatpush.msrb.mxu0 %v4012_v16  ;;  %v1707_v57 = vsel %vm165_vm0, %v4016_v29, 0.0  ;;  %v5830_v29 = vld [vmem:[#allocation112_spill] sm:$0xff]  ;;  %v1809_v58 = vrot.slane %v1808_v51, 1  ;;  %v5832_v26 = vld [vmem:[#allocation59_spill] sm:$0xff] }
 0x22f   :  { %5824 = vst [vmem:[#allocation65_spill] sm:$0xff] %v4461_v8  ;;  %2235 = vmatpush.msra.mxu2 %v4022_v39  ;;  %1886 = vmatpush.msra.mxu3 %v4491_v21  ;;  %v4513_v39 = vld [vmem:[#allocation10 + $0x3a0] sm:$0xff]  ;;  %v1708_v36 = vrot.slane %v1707_v57, 4  ;;  %v4544_v8 = vld [vmem:[#allocation10 + $0x370] sm:$0xff] }
 0x230   :  { %2541 = vst [vmem:[#allocation1] ss:$2 sm:$0xff] %v5694_v25  ;;  %1846 = vmatpush.msra.mxu1 %v4487_v1  ;;  %2119 = vmatpush.msrb.mxu0 %v4029_v22  ;;  %v4520_v22 = vld [vmem:[#allocation10 + $0x190] sm:$0xff] }
 0x231   :  { %2236 = vmatpush.msra.mxu2 %v4033_v42  ;;  %1887 = vmatpush.msra.mxu3 %v4499_v15  ;;  %v4524_v42 = vld [vmem:[#allocation10 + $0x390] sm:$0xff] }
 0x232   :  { %1847 = vmatpush.msra.mxu1 %v4495_v41  ;;  %2120 = vmatpush.msrb.mxu0 %v5830_v29  ;;  %v1765_v29 = vsel %vm165_vm0, %v4358_v53, -inf  ;;  %v1799_v53 = vadd.f32 %v1798_v43, %v1797_v20 }
 0x233   :  { %2237 = vmatpush.msra.mxu2 %v4041_v45  ;;  %1888 = vmatpush.msra.mxu3 %v4513_v39  ;;  %v4536_v45 = vld [vmem:[#allocation10 + $0x380] sm:$0xff]  ;;  %v1766_v60 = vrot.slane %v1765_v29, 4 }
 0x234   :  { %1848 = vmatpush.msra.mxu1 %v4507_v13  ;;  %2121 = vmatpush.msrb.mxu0 %v4045_v34  ;;  %v5831_v34 = vld [vmem:[#allocation29_spill] sm:$0xff]  ;;  %v1800_v43 = vrot.slane %v1799_v53, 2 }
 0x235   :  { %2238 = vmatpush.msra.mxu2 %v4051_v52  ;;  %1889 = vmatpush.msra.mxu3 %v4524_v42  ;;  %v1810_v52 = vadd.f32 %v1809_v58, %v1808_v51 }
 0x236   :  { %1849 = vmatpush.msra.mxu1 %v4520_v22  ;;  %2122 = vmatpush.msrb.mxu0 %v4059_v54  ;;  %v1758_v54 = vsel %vm165_vm0, %v5832_v26, -inf  ;;  %v4563_v26 = vld [vmem:[#allocation10 + $0x150] sm:$0xff] }
 0x237   :  { %v4503_v50 = vld.sshfl [vmem:[#allocation1] sm:$0xff pattern:$0x75316420]  ;;  %v4509_v16 = vld.sshfl [vmem:[#allocation1 + $0x8] sm:$0xff pattern:$0x75316420]  ;;  %2239 = vmatpush.msra.mxu2 %v5831_v34  ;;  %1890 = vmatpush.msra.mxu3 %v4536_v45  ;;  %v1767_v34 = vmax.f32 %v1765_v29, %v1766_v60 }
 0x238   :  { %5828 = vst [vmem:[#allocation67_spill] sm:$0xff] %v4503_v50  ;;  %v1709_v50 = vadd.f32 %v1708_v36, %v1707_v57  ;;  %2187 = vmatpush.msra.mxu0 %v4068_v63  ;;  %1850 = vmatpush.msra.mxu1 %v4530_v55  ;;  %v4558_v63 = vld [vmem:[#allocation10 + $0x360] sm:$0xff]  ;;  %v331_v57 = vpop.permute.xlu2 %330  ;;  %v1759_v58 = vrot.slane %v1758_v54, 4 }
 0x239   :  { %5829 = vst [vmem:[#allocation68_spill] sm:$0xff] %v4509_v16  ;;  %v4540_v16 = vld [vmem:[#allocation10 + $0x170] sm:$0xff]  ;;  %2240 = vmatpush.msra.mxu2 %v4072_v17  ;;  %1891 = vmatpush.msra.mxu3 %v4544_v8  ;;  %v4565_v17 = vmul.f32 0.25, %v1810_v52  ;;  %v333_v36 = vadd.f32 %v331_v57, %v4136_v56  ;;  %v4578_v56 = vld [vmem:[#allocation10 + $0x340] sm:$0xff]  ;;  %v5842_v52 = vld [vmem:[#allocation113_spill] sm:$0xff] }
 0x23a   :  { %2560 = vst [vmem:[#allocation1] ss:$2 sm:$0xff] %v5592_v18  ;;  %2188 = vmatpush.msra.mxu0 %v4076_v10  ;;  %1851 = vmatpush.msra.mxu1 %v4540_v16  ;;  %v1710_v20 = vrot.slane %v1709_v50, 2  ;;  %v4570_v10 = vld [vmem:[#allocation10 + $0x350] sm:$0xff]  ;;  %v259_v60 = vpop.permute.xlu1 %258  ;;  %v1760_v29 = vmax.f32 %v1758_v54, %v1759_v58 }
 0x23b   :  { %2241 = vmatpush.msra.mxu2 %v4080_v7  ;;  %5836 = vst [vmem:[#allocation72_spill] sm:$0xff] %v4563_v26  ;;  %1892 = vmatpush.msra.mxu3 %v4558_v63  ;;  %v2680_v7 = vmul.f32 -1.442695, %v333_v36  ;;  %v261_v57 = vadd.f32 %v259_v60, %v5842_v52  ;;  %v1801_v36 = vadd.f32 %v1800_v43, %v1799_v53  ;;  %v5845_v43 = vld [vmem:[#allocation50_spill] sm:$0xff]  ;;  %v5846_v60 = vld [vmem:[#allocation115_spill] sm:$0xff]  ;;  %v5847_v52 = vld [vmem:[#allocation116_spill] sm:$0xff] }
 0x23c   :  { %2189 = vmatpush.msra.mxu0 %v4084_v12  ;;  %1852 = vmatpush.msra.mxu1 %v4552_v0  ;;  %5837 = vst [vmem:[#allocation73_spill] sm:$0xff] %v4570_v10  ;;  %v1711_v12 = vadd.f32 %v1710_v20, %v1709_v50  ;;  %v4589_v50 = vld.sshfl [vmem:[#allocation1 + $0x18] sm:$0xff pattern:$0x75316420]  ;;  %v1761_v53 = vrot.slane %v1760_v29, 2 }
 0x23d   :  { %2242 = vmatpush.msra.mxu2 %v4088_v28  ;;  %5839 = vst [vmem:[#allocation75_spill] sm:$0xff] %v4578_v56  ;;  %1893 = vmatpush.msra.mxu3 %v4570_v10  ;;  %2727 = vpow2.f32 %v2680_v7  ;;  %v4584_v28 = vld [vmem:[#allocation10 + $0x130] sm:$0xff]  ;;  %v2675_v54 = vmul.f32 -1.442695, %v261_v57  ;;  %v1700_v7 = vsel %vm165_vm0, %v5845_v43, 0.0  ;;  %v1802_v57 = vrot.slane %v1801_v36, 1 }
 0x23e   :  { %2190 = vmatpush.msra.mxu0 %v4092_v2  ;;  %1853 = vmatpush.msra.mxu1 %v4563_v26  ;;  %5840 = vst [vmem:[#allocation76_spill] sm:$0xff] %v4584_v28  ;;  %v4586_v2 = vld [vmem:[#allocation10 + $0x330] sm:$0xff]  ;;  %v1712_v58 = vrot.slane %v1711_v12, 1  ;;  %v5849_v43 = vld [vmem:[#allocation117_spill] sm:$0xff]  ;;  %v4617_v26 = vld [vmem:[#allocation10 + $0x100] sm:$0xff]  ;;  %v1701_v0 = vrot.slane %v1700_v7, 4 }
 0x23f   :  { %2163 = vmatmul.f32.vlgmr.msrb.gmra.mxu2 %v4565_v17  ;;  %5841 = vst [vmem:[#allocation77_spill] sm:$0xff] %v4586_v2  ;;  %1894 = vmatpush.msra.mxu3 %v4578_v56  ;;  %v5843_v20 = vld [vmem:[#allocation22_spill] sm:$0xff]  ;;  %2729 = vpow2.f32 %v2675_v54  ;;  %v4619_v10 = vld [vmem:[#allocation10 + $0x300] sm:$0xff] }
 0x240   :  { %2307 = vmatpush.msrb.mxu2 %v4100_v9  ;;  %2191 = vmatpush.msra.mxu0 %v4102_v14  ;;  %2403 = vst [vmem:[#allocation1 + $0x10] ss:$2 sm:$0xff] %v5843_v20  ;;  %v4596_v9 = vld [vmem:[#allocation10 + $0x120] sm:$0xff]  ;;  %v1713_v54 = vadd.f32 %v1712_v58, %v1711_v12 }
 0x241   :  { %v4548_v59 = vld.sshfl [vmem:[#allocation1] sm:$0xff pattern:$0x75316420]  ;;  %v4554_v51 = vld.sshfl [vmem:[#allocation1 + $0x8] sm:$0xff pattern:$0x75316420]  ;;  %1895 = vmatpush.msra.mxu3 %v4586_v2 }
 0x242   :  { %5833 = vst [vmem:[#allocation69_spill] sm:$0xff] %v4548_v59  ;;  %v1768_v59 = vrot.slane %v1767_v34, 2  ;;  %2308 = vmatpush.msrb.mxu2 %v4108_v49  ;;  %2192 = vmatpush.msra.mxu0 %v4110_v24  ;;  %v4598_v14 = vld [vmem:[#allocation10 + $0x320] sm:$0xff]  ;;  %v4606_v49 = vld [vmem:[#allocation10 + $0x110] sm:$0xff] }
 0x243   :  { %5835 = vst [vmem:[#allocation71_spill] sm:$0xff] %v4554_v51  ;;  %v4608_v24 = vld [vmem:[#allocation10 + $0x310] sm:$0xff]  ;;  %v457_v51 = vpop.permute.xlu2 %456  ;;  %v2728_v56 = vpop.eup %2727  ;;  %1896 = vmatpush.msra.mxu3 %v4598_v14  ;;  %v4632_v12 = vld [vmem:[#allocation10 + $0x5e0] sm:$0xff] }
 0x244   :  { %2583 = vst [vmem:[#allocation1] ss:$2 sm:$0xff] %v5694_v25  ;;  %v4576_v25 = vld [vmem:[#allocation10 + $0x140] sm:$0xff]  ;;  %2309 = vmatpush.msrb.mxu2 %v5846_v60  ;;  %2193 = vmatpush.msra.mxu0 %v5847_v52  ;;  %v4614_v60 = vadd.f32 1.0, %v2728_v56  ;;  %v5850_v52 = vld [vmem:[#allocation118_spill] sm:$0xff] }
 0x245   :  { %5838 = vst [vmem:[#allocation74_spill] sm:$0xff] %v4576_v25  ;;  %1854 = vmatpush.msra.mxu1 %v4576_v25  ;;  %v1769_v25 = vmax.f32 %v1767_v34, %v1768_v59  ;;  %1897 = vmatpush.msra.mxu3 %v4608_v24  ;;  %v4623_v59 = vld [vmem:[#allocation10 + $0x5f0] sm:$0xff]  ;;  %v5854_v56 = vld [vmem:[#allocation28_spill] sm:$0xff] }
 0x246   :  { %5844 = vst [vmem:[#allocation79_spill] sm:$0xff] %v4596_v9  ;;  %2310 = vmatpush.msrb.mxu2 %v5849_v43  ;;  %2194 = vmatpush.msra.mxu0 %v5850_v52  ;;  %2731 = vrcp.f32 %v4614_v60  ;;  %v4628_v43 = vld [vmem:[#allocation10 + $0x1f8] sm:$0xff]  ;;  %v1803_v52 = vadd.f32 %v1802_v57, %v1801_v36  ;;  %v1702_v36 = vadd.f32 %v1701_v0, %v1700_v7  ;;  %vm343_vm6 = vweird.f32 %v4614_v60 }
 0x247   :  { %1855 = vmatpush.msra.mxu1 %v4584_v28  ;;  %v5848_v28 = vld [vmem:[#allocation31_spill] sm:$0xff]  ;;  %5851 = vst [vmem:[#allocation80_spill] sm:$0xff] %v4617_v26  ;;  %1898 = vmatpush.msra.mxu3 %v4619_v10  ;;  %v4634_v58 = vld.sshfl [vmem:[#allocation1 + $0x10] sm:$0xff pattern:$0x75316420] }
 0x248   :  { %v459_v2 = vadd.f32 %v457_v51, %v5848_v28  ;;  %5852 = vst [vmem:[#allocation78_spill] sm:$0xff] %v4619_v10  ;;  %v1762_v51 = vmax.f32 %v1760_v29, %v1761_v53  ;;  %2311 = vmatpush.msrb.mxu2 %v5854_v56  ;;  %v5855_v28 = vld [vmem:[#allocation119_spill] sm:$0xff]  ;;  %v2730_v29 = vpop.eup %2729  ;;  %v4638_v53 = vld [vmem:[#allocation10 + $0x1e8] sm:$0xff]  ;;  %v1724_v56 = vadd.f32 %v4329_v19, %v1713_v54  ;;  %v4641_v57 = vld.sshfl [vmem:[#allocation1 + $0x18] sm:$0xff pattern:$0x75316420] }
 0x249   :  { %1856 = vmatpush.msra.mxu1 %v4596_v9  ;;  %5853 = vst [vmem:[#allocation81_spill] sm:$0xff] %v4623_v59  ;;  %2195 = vmatpush.msra.mxu0 %v5855_v28  ;;  %v1770_v9 = vrot.slane %v1769_v25, 1  ;;  %v4643_v28 = vpop.f32.mrf.mxu1  ;;  %v5865_v10 = vld [vmem:[#allocation121_spill] sm:$0xff]  ;;  %v4655_v0 = vmul.f32 0.25, %v1803_v52  ;;  %v4669_v52 = vld [vmem:[#allocation10 + $0x5c0] sm:$0xff] }
 0x24a   :  { %v2685_v34 = vmul.f32 -1.442695, %v459_v2  ;;  %5856 = vst [vmem:[#allocation83_spill] sm:$0xff] %v4628_v43  ;;  %v5859_v2 = vld [vmem:[#allocation120_spill] sm:$0xff]  ;;  %1963 = vmatpush.msrb.mxu3 %v4628_v43 }
 0x24b   :  { %1857 = vmatpush.msra.mxu1 %v4606_v49  ;;  %5857 = vst [vmem:[#allocation84_spill] sm:$0xff] %v4632_v12  ;;  %2312 = vmatpush.msrb.mxu2 %v5859_v2  ;;  %v1763_v2 = vrot.slane %v1762_v51, 1  ;;  %v4657_v7 = vmax.f32 %v1769_v25, %v1770_v9  ;;  %v1729_v25 = vmul.f32 %v4354_v31, %v1724_v56  ;;  %v1703_v9 = vrot.slane %v1702_v36, 2  ;;  %v5873_v56 = vld [vmem:[#allocation123_spill] sm:$0xff] }
 0x24c   :  { %2733 = vpow2.f32 %v2685_v34  ;;  %5858 = vst [vmem:[#allocation82_spill] sm:$0xff] %v4634_v58  ;;  %v4647_v34 = vadd.f32 1.0, %v2730_v29  ;;  %v4649_v58 = vld [vmem:[#allocation10 + $0x5d0] sm:$0xff]  ;;  %1964 = vmatpush.msrb.mxu3 %v4638_v53  ;;  %v4663_v54 = vpop.eup %2731  ;;  %v4665_v29 = vpop.f32.mrf.mxu3 }
 0x24d   :  { %1858 = vmatpush.msra.mxu1 %v4617_v26  ;;  %5860 = vst [vmem:[#allocation85_spill] sm:$0xff] %v4638_v53  ;;  %v5863_v26 = vld [vmem:[#allocation23_spill] sm:$0xff]  ;;  %2313 = vmatpush.msrb.mxu2 %v5865_v10  ;;  %v5869_v10 = vld [vmem:[#allocation34_spill] sm:$0xff]  ;;  %v4674_v53 = vld [vmem:[#allocation10 + $0x1c8] sm:$0xff]  ;;  %vm344_vm5 = vweird.f32 %v4663_v54 }
 0x24e   :  { %5861 = vst [vmem:[#allocation87_spill] sm:$0xff] %v4641_v57  ;;  %2196 = vmatpush.msra.mxu0 %v5863_v26  ;;  %2735 = vrcp.f32 %v4647_v34  ;;  %v5867_v26 = vld [vmem:[#allocation30_spill] sm:$0xff]  ;;  %1899 = vmatmul.f32.vlgmr.msra.gmra.mxu3 %v4655_v0  ;;  %vm4736_vm7 = vmor %vm343_vm6, %vm344_vm5  ;;  %vm271_vm10 = vweird.f32 %v4647_v34 }
 0x24f   :  { %1923 = vmatpush.msrb.mxu1 %v4623_v59  ;;  %5862 = vst [vmem:[#allocation88_spill] sm:$0xff] %v4643_v28  ;;  %v4653_v59 = vld [vmem:[#allocation10 + $0x1d8] sm:$0xff]  ;;  %2314 = vmatpush.msrb.mxu2 %v5869_v10  ;;  %v5871_v28 = vld [vmem:[#allocation36_spill] sm:$0xff] }
 0x250   :  { %5864 = vst [vmem:[#allocation86_spill] sm:$0xff] %v4649_v58  ;;  %2197 = vmatpush.msra.mxu0 %v5867_v26  ;;  %1965 = vmatpush.msrb.mxu3 %v4653_v59  ;;  %v4676_v26 = vmax.f32 %v1762_v51, %v1763_v2  ;;  %v4693_v51 = vld [vmem:[#allocation10 + $0x5a0] sm:$0xff]  ;;  %v4698_v2 = vadd.f32 %v4373_v4, %v1729_v25 }
 0x251   :  { %1924 = vmatpush.msrb.mxu1 %v4632_v12  ;;  %5866 = vst [vmem:[#allocation89_spill] sm:$0xff] %v4653_v59  ;;  %2123 = vmatmul.f32.vlgmr.msrb.gmra.mxu0 %v4657_v7  ;;  %v4686_v59 = vld [vmem:[#allocation10 + $0x5b0] sm:$0xff]  ;;  %v4702_v12 = vpop.f32.mrf.mxu1 }
 0x252   :  { %2418 = vst [vmem:[#allocation1 + $0x10] ss:$2 sm:$0xff] %v5843_v20  ;;  %v2734_v57 = vpop.eup %2733  ;;  %2198 = vmatpush.msra.mxu0 %v5871_v28  ;;  %2315 = vmatpush.msrb.mxu2 %v5873_v56  ;;  %v4688_v28 = vld [vmem:[#allocation10 + $0x1b8] sm:$0xff]  ;;  %v1704_v56 = vadd.f32 %v1703_v9, %v1702_v36  ;;  %v4720_v9 = vld [vmem:[#allocation10 + $0x590] sm:$0xff] }
 0x253   :  { %5868 = vst [vmem:[#allocation24_spill] sm:$0xff] %v4665_v29  ;;  %1925 = vmatpush.msrb.mxu1 %v4649_v58  ;;  %v339_v29 = vmul.f32 %v4663_v54, %v4614_v60  ;;  %v4680_v10 = vadd.f32 1.0, %v2734_v57  ;;  %1966 = vmatpush.msrb.mxu3 %v4674_v53  ;;  %v4695_v57 = vld [vmem:[#allocation10 + $0x1a8] sm:$0xff] }
 0x254   :  { %5870 = vst [vmem:[#allocation91_spill] sm:$0xff] %v4669_v52  ;;  %2199 = vmatpush.msra.mxu0 %v4194_v40  ;;  %1859 = vmatmul.f32.vlgmr.msra.gmra.mxu1 %v4676_v26  ;;  %v347_v40 = vand.u32 2147483647, %v4614_v60 }
 0x255   :  { %5872 = vst [vmem:[#allocation90_spill] sm:$0xff] %v4674_v53  ;;  %1926 = vmatpush.msrb.mxu1 %v4669_v52  ;;  %v340_v58 = vsub.f32 1.0, %v339_v29  ;;  %2737 = vrcp.f32 %v4680_v10  ;;  %v4700_v52 = vpop.eup %2735  ;;  %2316 = vmatpush.msrb.mxu2 %v4196_v35  ;;  %v349_v53 = vand.u32 2147483648, %v4614_v60  ;;  %v5880_v35 = vld [vmem:[#allocation33_spill] sm:$0xff]  ;;  %v4745_v60 = vld [vmem:[#allocation10 + $0x580] sm:$0xff]  ;;  %vm469_vm14 = vweird.f32 %v4680_v10 }
 0x256   :  { %5874 = vst [vmem:[#allocation92_spill] sm:$0xff] %v4688_v28  ;;  %1967 = vmatpush.msrb.mxu3 %v4688_v28  ;;  %v267_v36 = vmul.f32 %v4700_v52, %v4647_v34  ;;  %2200 = vmatpush.msra.mxu0 %v5880_v35  ;;  %v4726_v28 = vpop.f32.mrf.mxu3  ;;  %v1705_v35 = vrot.slane %v1704_v56, 1  ;;  %vm348_vm8 = vcmp.eq.f32.partialorder %v347_v40, 8.507059e+37  ;;  %vm272_vm9 = vweird.f32 %v4700_v52 }
 0x257   :  { %5875 = vst [vmem:[#allocation93_spill] sm:$0xff] %v4693_v51  ;;  %v341_v29 = vmul.f32 %v4663_v54, %v340_v58  ;;  %1927 = vmatpush.msrb.mxu1 %v4686_v59  ;;  %v5881_v58 = vld [vmem:[#allocation124_spill] sm:$0xff]  ;;  %2243 = vmatmul.f32.vlgmr.msra.gmra.mxu2 %v4657_v7  ;;  %vm273_vm11 = vmor %vm271_vm10, %vm272_vm9 }
 0x258   :  { %5876 = vst [vmem:[#allocation94_spill] sm:$0xff] %v4695_v57  ;;  %2317 = vmatpush.msrb.mxu2 %v5881_v58  ;;  %1968 = vmatpush.msrb.mxu3 %v4695_v57  ;;  %v268_v58 = vsub.f32 1.0, %v267_v36  ;;  %v277_v57 = vand.u32 2147483648, %v4647_v34  ;;  %v4772_v7 = vld [vmem:[#allocation10 + $0x560] sm:$0xff] }
 0x259   :  { %5877 = vst [vmem:[#allocation95_spill] sm:$0xff] %v4702_v12  ;;  %v4709_v43 = vld.sshfl [vmem:[#allocation1 + $0x10] sm:$0xff pattern:$0x75316420]  ;;  %v4722_v12 = vld [vmem:[#allocation10 + $0x198] sm:$0xff]  ;;  %1928 = vmatpush.msrb.mxu1 %v4693_v51  ;;  %2201 = vmatpush.msra.mxu0 %v4222_v30 }
 0x25a   :  { %5878 = vst [vmem:[#allocation96_spill] sm:$0xff] %v4709_v43  ;;  %v4716_v25 = vld.sshfl [vmem:[#allocation1 + $0x18] sm:$0xff pattern:$0x75316420]  ;;  %v342_v43 = vadd.f32 %v4663_v54, %v341_v29  ;;  %2318 = vmatpush.msrb.mxu2 %v4227_v3  ;;  %1969 = vmatpush.msrb.mxu3 %v4722_v12  ;;  %v4747_v30 = vld [vmem:[#allocation10 + $0x188] sm:$0xff]  ;;  %v269_v36 = vmul.f32 %v4700_v52, %v268_v58 }
 0x25b   :  { %5879 = vst [vmem:[#allocation97_spill] sm:$0xff] %v4716_v25  ;;  %v4741_v51 = vpop.eup %2737  ;;  %1929 = vmatpush.msrb.mxu1 %v4720_v9  ;;  %2202 = vmatpush.msra.mxu0 %v4233_v37  ;;  %v1706_v58 = vadd.f32 %v1705_v35, %v1704_v56  ;;  %v4768_v37 = vpop.f32.mrf.mxu1  ;;  %v4777_v56 = vld [vmem:[#allocation10 + $0x168] sm:$0xff] }
 0x25c   :  { %5882 = vst [vmem:[#allocation98_spill] sm:$0xff] %v4720_v9  ;;  %v346_v3 = vsel %vm4736_vm7, %v4663_v54, %v342_v43  ;;  %v465_v25 = vmul.f32 %v4741_v51, %v4680_v10  ;;  %v5888_v9 = vld [vmem:[#allocation35_spill] sm:$0xff]  ;;  %v4762_v43 = vld [vmem:[#allocation10 + $0x570] sm:$0xff]  ;;  %v270_v29 = vadd.f32 %v4700_v52, %v269_v36  ;;  %1970 = vmatpush.msrb.mxu3 %v4747_v30  ;;  %vm470_vm13 = vweird.f32 %v4741_v51 }
 0x25d   :  { %5883 = vst [vmem:[#allocation99_spill] sm:$0xff] %v4722_v12  ;;  %v5887_v12 = vmax.f32 %v4698_v2, 0.0  ;;  %2319 = vmatpush.msrb.mxu2 %v5888_v9  ;;  %v4764_v54 = vld [vmem:[#allocation10 + $0x178] sm:$0xff]  ;;  %1930 = vmatpush.msrb.mxu1 %v4745_v60  ;;  %v475_v9 = vand.u32 2147483648, %v4680_v10  ;;  %vm471_vm15 = vmor %vm469_vm14, %vm470_vm13 }
 0x25e   :  { %2443 = vst [vmem:[#allocation1 + $0x10] ss:$2 sm:$0xff] %v5657_v6  ;;  %1971 = vmatpush.msrb.mxu3 %v4764_v54  ;;  %v4790_v36 = vpop.f32.mrf.mxu3 }
 0x25f   :  { %5884 = vst [vmem:[#allocation100_spill] sm:$0xff] %v4726_v28  ;;  %v350_v28 = vor.u32 1.1754944e-38, %v349_v53  ;;  %v275_v53 = vand.u32 2147483647, %v4647_v34  ;;  %2203 = vmatmul.f32.vlgmr.msra.gmra.mxu0 %v5887_v12  ;;  %v278_v12 = vor.u32 1.1754944e-38, %v277_v57  ;;  %2320 = vmatpush.msrb.mxu2 %v4245_v47  ;;  %v274_v34 = vsel %vm273_vm11, %v4700_v52, %v270_v29  ;;  %v4793_v52 = vld [vmem:[#allocation10 + $0x550] sm:$0xff]  ;;  %v529_v29 = vpop.permute.xlu1 %528 }
 0x260   :  { %5889 = vst [vmem:[#allocation101_spill] sm:$0xff] %v4768_v37  ;;  %1931 = vmatpush.msrb.mxu1 %v4762_v43  ;;  %v473_v47 = vand.u32 2147483647, %v4680_v10  ;;  %1972 = vmatpush.msrb.mxu3 %v4777_v56 }
 0x261   :  { %v351_v40 = vsel %vm348_vm8, %v350_v28, %v346_v3  ;;  %v466_v28 = vsub.f32 1.0, %v465_v25  ;;  %vm276_vm12 = vcmp.eq.f32.partialorder %v275_v53, 8.507059e+37  ;;  %5892 = vst [vmem:[#allocation104_spill] sm:$0xff] %v4790_v36  ;;  %2321 = vmatpush.msrb.mxu2 %v4252_v23  ;;  %v4795_v53 = vld [vmem:[#allocation10 + $0x158] sm:$0xff]  ;;  %v4806_v23 = vld [vmem:[#allocation10 + $0x540] sm:$0xff] }
 0x262   :  { %2396 = vperm.xlu1 %2726, %v351_v40   ;;  %v279_v3 = vsel %vm276_vm12, %v278_v12, %v274_v34  ;;  %v1723_v40 = vadd.f32 %v4329_v19, %v1706_v58  ;;  %1932 = vmatpush.msrb.mxu1 %v4772_v7  ;;  %v4808_v34 = vld [vmem:[#allocation10 + $0x148] sm:$0xff]  ;;  %v5894_v58 = vld [vmem:[#allocation32_spill] sm:$0xff]  ;;  %vm474_vm1 = vcmp.eq.f32.partialorder %v473_v47, 8.507059e+37 }
 0x263   :  { %v467_v57 = vmul.f32 %v4741_v51, %v466_v28  ;;  %2391 = vperm.xlu2 %2724, %v279_v3   ;;  %v4803_v28 = vld.sshfl [vmem:[#allocation1] sm:$0xff pattern:$0x75316420]  ;;  %2322 = vmatpush.msrb.mxu2 %v4270_v44  ;;  %v531_v3 = vadd.f32 %v529_v29, %v5894_v58  ;;  %v4817_v44 = vld.sshfl [vmem:[#allocation1 + $0x8] sm:$0xff pattern:$0x75316420] }
 0x264   :  { %5893 = vst [vmem:[#allocation105_spill] sm:$0xff] %v4803_v28  ;;  %1933 = vmatpush.msrb.mxu1 %v4793_v52  ;;  %1973 = vmatpush.msrb.mxu3 %v4795_v53  ;;  %v4821_v28 = vld [vmem:[#allocation10 + $0x530] sm:$0xff]  ;;  %v4823_v29 = vld [vmem:[#allocation10 + $0x138] sm:$0xff]  ;;  %v5898_v36 = vld [vmem:[#allocation44_spill] sm:$0xff] }
 0x265   :  { %v4781_v35 = vld.sshfl [vmem:[#allocation1 + $0x10] sm:$0xff pattern:$0x75316420]  ;;  %v4788_v25 = vld.sshfl [vmem:[#allocation1 + $0x18] sm:$0xff pattern:$0x75316420]  ;;  %v468_v12 = vadd.f32 %v4741_v51, %v467_v57 }
 0x266   :  { %5890 = vst [vmem:[#allocation102_spill] sm:$0xff] %v4781_v35  ;;  %v5895_v35 = vld [vmem:[#allocation42_spill] sm:$0xff]  ;;  %v5897_v57 = vmax.f32 %v4698_v2, 0.0  ;;  %v2690_v58 = vmul.f32 -1.442695, %v531_v3  ;;  %1934 = vmatpush.msrb.mxu1 %v4806_v23  ;;  %1974 = vmatpush.msrb.mxu3 %v4808_v34  ;;  %v4830_v47 = vld [vmem:[#allocation10 + $0x520] sm:$0xff] }
 0x267   :  { %5891 = vst [vmem:[#allocation103_spill] sm:$0xff] %v4788_v25  ;;  %v476_v25 = vor.u32 1.1754944e-38, %v475_v9  ;;  %2267 = vmatpush.msrb.mxu0 %v5895_v35  ;;  %v472_v10 = vsel %vm471_vm15, %v4741_v51, %v468_v12  ;;  %v1728_v9 = vmul.f32 %v4354_v31, %v1723_v40  ;;  %v1225_v51 = vpop.f32.mrf.mxu1  ;;  %v4832_v2 = vld [vmem:[#allocation10 + $0x128] sm:$0xff] }
 0x268   :  { %2458 = vst [vmem:[#allocation1 + $0x10] ss:$2 sm:$0xff] %v5657_v6  ;;  %2323 = vmatmul.f32.vlgmr.msrb.gmra.mxu2 %v5897_v57  ;;  %2739 = vpow2.f32 %v2690_v58  ;;  %v1226_v12 = vadd.f32 %v1225_v51, %v4278_v62  ;;  %1935 = vmatpush.msrb.mxu1 %v4821_v28  ;;  %v5903_v62 = vld [vmem:[#allocation39_spill] sm:$0xff]  ;;  %v4856_v58 = vld [vmem:[#allocation10 + $0x108] sm:$0xff]  ;;  %v1285_v51 = vpop.f32.mrf.mxu0 }
 0x269   :  { %5896 = vst [vmem:[#allocation106_spill] sm:$0xff] %v4817_v44  ;;  %v477_v35 = vsel %vm474_vm1, %v476_v25, %v472_v10  ;;  %2268 = vmatpush.msrb.mxu0 %v5898_v36  ;;  %1975 = vmatpush.msrb.mxu3 %v4823_v29  ;;  %v4840_v25 = vld [vmem:[#allocation10 + $0x510] sm:$0xff]  ;;  %v4842_v36 = vld [vmem:[#allocation10 + $0x118] sm:$0xff]  ;;  %v4845_v40 = vadd.f32 %v4373_v4, %v1728_v9  ;;  %v1265_v10 = vpop.f32.mrf.mxu3 }
 0x26a   :  { %2602 = vst [vmem:[#allocation1] ss:$2 sm:$0xff] %v5592_v18  ;;  %2431 = vperm.xlu0 %2725, %v477_v35   ;;  %v1246_v3 = vadd.f32 %v4351_v27, %v1226_v12  ;;  %1936 = vmatpush.msrb.mxu1 %v4830_v47  ;;  %v5907_v9 = vld [vmem:[#allocation27_spill] sm:$0xff]  ;;  %v5910_v44 = vld [vmem:[#allocation46_spill] sm:$0xff] }
 0x26b   :  { %5899 = vst [vmem:[#allocation107_spill] sm:$0xff] %v4832_v2  ;;  %2269 = vmatpush.msrb.mxu0 %v4262_v5  ;;  %1976 = vmatpush.msrb.mxu3 %v4832_v2  ;;  %v4854_v5 = vld [vmem:[#allocation10 + $0x500] sm:$0xff]  ;;  %v4861_v27 = vld [vmem:[#allocation10 + $0x5f8] sm:$0xff] }
 0x26c   :  { %5901 = vst [vmem:[#allocation109_spill] sm:$0xff] %v4840_v25  ;;  %v1266_v35 = vadd.f32 %v1265_v10, %v1246_v3  ;;  %1937 = vmatpush.msrb.mxu1 %v4840_v25  ;;  %v4873_v3 = vld [vmem:[#allocation10 + $0x5e8] sm:$0xff] }
 0x26d   :  { %5902 = vst [vmem:[#allocation110_spill] sm:$0xff] %v4842_v36  ;;  %2270 = vmatpush.msrb.mxu0 %v5903_v62  ;;  %1977 = vmatpush.msrb.mxu3 %v4842_v36  ;;  %v5471_v62 = vmax.f32 %v4845_v40, 0.0  ;;  %v4878_v10 = vld [vmem:[#allocation10 + $0x3e8] sm:$0xff] }
 0x26e   :  { %5905 = vst [vmem:[#allocation29_spill] sm:$0xff] %v4854_v5  ;;  %v2740_v12 = vpop.eup %2739  ;;  %1938 = vmatpush.msrb.mxu1 %v4854_v5  ;;  %v5928_v5 = vld [vmem:[#allocation47_spill] sm:$0xff]  ;;  %v5931_v25 = vld [vmem:[#allocation49_spill] sm:$0xff] }
 0x26f   :  { %v4838_v18 = vld.sshfl [vmem:[#allocation1 + $0x10] sm:$0xff pattern:$0x75316420]  ;;  %v4849_v57 = vld.sshfl [vmem:[#allocation1 + $0x18] sm:$0xff pattern:$0x75316420]  ;;  %2271 = vmatpush.msrb.mxu0 %v5907_v9  ;;  %1978 = vmatpush.msrb.mxu3 %v4856_v58 }
 0x270   :  { %5900 = vst [vmem:[#allocation108_spill] sm:$0xff] %v4838_v18  ;;  %v4866_v18 = vadd.f32 %v1285_v51, %v1266_v35  ;;  %v4869_v37 = vadd.f32 1.0, %v2740_v12  ;;  %1939 = vmatmul.f32.vlgmr.msrb.gmra.mxu1 %v5471_v62  ;;  %v4884_v35 = vld [vmem:[#allocation10 + $0x5d8] sm:$0xff]  ;;  %1979 = vmatmul.f32.vlgmr.msrb.gmra.mxu3 %v4676_v26  ;;  %v5915_v9 = vld [vmem:[#allocation48_spill] sm:$0xff]  ;;  %v4894_v62 = vld [vmem:[#allocation10 + $0x5c8] sm:$0xff] }
 0x271   :  { %5904 = vst [vmem:[#allocation112_spill] sm:$0xff] %v4849_v57  ;;  %v4864_v57 = vld [vmem:[#allocation10 + $0x3f8] sm:$0xff]  ;;  %2272 = vmatpush.msrb.mxu0 %v5910_v44  ;;  %2043 = vmatpush.msra.mxu3 %v4861_v27 }
 0x272   :  { %2477 = vst [vmem:[#allocation1 + $0x10] ss:$2 sm:$0xff] %v5843_v20  ;;  %2741 = vrcp.f32 %v4869_v37  ;;  %2003 = vmatpush.msra.mxu1 %v4864_v57  ;;  %v4882_v44 = vld [vmem:[#allocation10 + $0x3d8] sm:$0xff]  ;;  %v547_v36 = vand.u32 2147483648, %v4869_v37  ;;  %vm541_vm3 = vweird.f32 %v4869_v37 }
 0x273   :  { %5906 = vst [vmem:[#allocation59_spill] sm:$0xff] %v4856_v58  ;;  %2044 = vmatpush.msra.mxu3 %v4873_v3  ;;  %2273 = vmatpush.msrb.mxu0 %v5915_v9  ;;  %v4902_v26 = vld [vmem:[#allocation10 + $0x5b8] sm:$0xff] }
 0x274   :  { %5908 = vst [vmem:[#allocation113_spill] sm:$0xff] %v4861_v27  ;;  %2004 = vmatpush.msra.mxu1 %v4878_v10  ;;  %v5919_v27 = vld [vmem:[#allocation43_spill] sm:$0xff]  ;;  %v548_v2 = vor.u32 1.1754944e-38, %v547_v36  ;;  %v4960_v36 = vld [vmem:[#allocation10 + $0x548] sm:$0xff] }
 0x275   :  { %5909 = vst [vmem:[#allocation22_spill] sm:$0xff] %v4864_v57  ;;  %2045 = vmatpush.msra.mxu3 %v4884_v35  ;;  %v4898_v57 = vld [vmem:[#allocation10 + $0x3c8] sm:$0xff]  ;;  %2274 = vmatpush.msrb.mxu0 %v5919_v27  ;;  %v4905_v9 = vld [vmem:[#allocation10 + $0x3b8] sm:$0xff] }
 0x276   :  { %5911 = vst [vmem:[#allocation50_spill] sm:$0xff] %v4873_v3  ;;  %2005 = vmatpush.msra.mxu1 %v4882_v44  ;;  %v4909_v3 = vld [vmem:[#allocation10 + $0x5a8] sm:$0xff] }
 0x277   :  { %5912 = vst [vmem:[#allocation115_spill] sm:$0xff] %v4878_v10  ;;  %2046 = vmatpush.msra.mxu3 %v4894_v62 }
 0x278   :  { %5913 = vst [vmem:[#allocation116_spill] sm:$0xff] %v4882_v44  ;;  %v2742_v10 = vpop.eup %2741  ;;  %2006 = vmatpush.msra.mxu1 %v4898_v57  ;;  %v5925_v44 = vld [vmem:[#allocation56_spill] sm:$0xff] }
 0x279   :  { %5914 = vst [vmem:[#allocation31_spill] sm:$0xff] %v4884_v35  ;;  %v4889_v51 = vld.sshfl [vmem:[#allocation1 + $0x10] sm:$0xff pattern:$0x75316420]  ;;  %2047 = vmatpush.msra.mxu3 %v4902_v26  ;;  %v537_v27 = vmul.f32 %v2742_v10, %v4869_v37  ;;  %vm542_vm2 = vweird.f32 %v2742_v10 }
 0x27a   :  { %v4891_v12 = vld.sshfl [vmem:[#allocation1 + $0x18] sm:$0xff pattern:$0x75316420]  ;;  %5917 = vst [vmem:[#allocation118_spill] sm:$0xff] %v4894_v62  ;;  %v4912_v35 = vld [vmem:[#allocation10 + $0x3a8] sm:$0xff]  ;;  %2007 = vmatpush.msra.mxu1 %v4905_v9  ;;  %v4917_v62 = vld [vmem:[#allocation10 + $0x598] sm:$0xff] }
 0x27b   :  { %5916 = vst [vmem:[#allocation117_spill] sm:$0xff] %v4891_v12  ;;  %v5922_v12 = vld [vmem:[#allocation52_spill] sm:$0xff]  ;;  %2048 = vmatpush.msra.mxu3 %v4909_v3  ;;  %v538_v58 = vsub.f32 1.0, %v537_v27  ;;  %v545_v27 = vand.u32 2147483647, %v4869_v37  ;;  %vm543_vm4 = vmor %vm541_vm3, %vm542_vm2  ;;  %v4953_v37 = vld [vmem:[#allocation10 + $0x558] sm:$0xff] }
 0x27c   :  { %2492 = vst [vmem:[#allocation1 + $0x10] ss:$2 sm:$0xff] %v5843_v20  ;;  %2275 = vmatpush.msrb.mxu0 %v5922_v12  ;;  %v4920_v12 = vld [vmem:[#allocation10 + $0x398] sm:$0xff]  ;;  %2008 = vmatpush.msra.mxu1 %v4912_v35 }
 0x27d   :  { %5918 = vst [vmem:[#allocation28_spill] sm:$0xff] %v4898_v57  ;;  %2049 = vmatpush.msra.mxu3 %v4917_v62  ;;  %vm546_vm5 = vcmp.eq.f32.partialorder %v545_v27, 8.507059e+37  ;;  %v4977_v27 = vld [vmem:[#allocation10 + $0x338] sm:$0xff] }
 0x27e   :  { %5920 = vst [vmem:[#allocation119_spill] sm:$0xff] %v4902_v26  ;;  %2276 = vmatpush.msrb.mxu0 %v5925_v44  ;;  %v4926_v26 = vld [vmem:[#allocation10 + $0x588] sm:$0xff]  ;;  %2009 = vmatpush.msra.mxu1 %v4920_v12 }
 0x27f   :  { %5921 = vst [vmem:[#allocation120_spill] sm:$0xff] %v4905_v9  ;;  %v4932_v9 = vld [vmem:[#allocation10 + $0x388] sm:$0xff]  ;;  %2050 = vmatpush.msra.mxu3 %v4926_v26 }
 0x280   :  { %5923 = vst [vmem:[#allocation23_spill] sm:$0xff] %v4909_v3  ;;  %2277 = vmatpush.msrb.mxu0 %v5928_v5  ;;  %v539_v3 = vmul.f32 %v2742_v10, %v538_v58  ;;  %v4938_v5 = vld [vmem:[#allocation10 + $0x578] sm:$0xff]  ;;  %2010 = vmatpush.msra.mxu1 %v4932_v9  ;;  %v4946_v58 = vld [vmem:[#allocation10 + $0x568] sm:$0xff] }
 0x281   :  { %5924 = vst [vmem:[#allocation121_spill] sm:$0xff] %v4912_v35  ;;  %v4941_v35 = vld [vmem:[#allocation10 + $0x378] sm:$0xff]  ;;  %2051 = vmatpush.msra.mxu3 %v4938_v5 }
 0x282   :  { %5926 = vst [vmem:[#allocation30_spill] sm:$0xff] %v4917_v62  ;;  %2278 = vmatpush.msrb.mxu0 %v5931_v25  ;;  %v5932_v62 = vld [vmem:[#allocation60_spill] sm:$0xff]  ;;  %v4949_v25 = vld [vmem:[#allocation10 + $0x368] sm:$0xff]  ;;  %2011 = vmatpush.msra.mxu1 %v4941_v35 }
 0x283   :  { %5927 = vst [vmem:[#allocation34_spill] sm:$0xff] %v4920_v12  ;;  %v4922_v57 = vld.sshfl [vmem:[#allocation1 + $0x10] sm:$0xff pattern:$0x75316420]  ;;  %2052 = vmatpush.msra.mxu3 %v4946_v58 }
 0x284   :  { %5929 = vst [vmem:[#allocation36_spill] sm:$0xff] %v4926_v26  ;;  %v4929_v44 = vld.sshfl [vmem:[#allocation1 + $0x18] sm:$0xff pattern:$0x75316420]  ;;  %2279 = vmatpush.msrb.mxu0 %v5932_v62  ;;  %v5933_v26 = vld [vmem:[#allocation51_spill] sm:$0xff]  ;;  %2012 = vmatpush.msra.mxu1 %v4949_v25 }
 0x285   :  { %5930 = vst [vmem:[#allocation123_spill] sm:$0xff] %v4929_v44  ;;  %v540_v44 = vadd.f32 %v2742_v10, %v539_v3  ;;  %v4958_v3 = vld [vmem:[#allocation10 + $0x358] sm:$0xff]  ;;  %2053 = vmatpush.msra.mxu3 %v4953_v37 }
 0x286   :  { %2511 = vst [vmem:[#allocation1 + $0x10] ss:$2 sm:$0xff] %v5657_v6  ;;  %2280 = vmatpush.msrb.mxu0 %v5933_v26  ;;  %2013 = vmatpush.msra.mxu1 %v4958_v3 }
 0x287   :  { %v544_v12 = vsel %vm543_vm4, %v2742_v10, %v540_v44  ;;  %5934 = vst [vmem:[#allocation33_spill] sm:$0xff] %v4953_v37  ;;  %v5941_v44 = vld [vmem:[#allocation25_spill] sm:$0xff]  ;;  %2054 = vmatpush.msra.mxu3 %v4960_v36  ;;  %v4999_v37 = vstv %s4955_s18 }
 0x288   :  { %v549_v62 = vsel %vm546_vm5, %v548_v2, %v544_v12  ;;  %5935 = vst [vmem:[#allocation124_spill] sm:$0xff] %v4958_v3  ;;  %2281 = vmatpush.msrb.mxu0 %v4395_v33  ;;  %v4969_v2 = vld [vmem:[#allocation10 + $0x348] sm:$0xff]  ;;  %v4973_v12 = vld [vmem:[#allocation10 + $0x538] sm:$0xff]  ;;  %v4987_v3 = vstv %s2694_s7 }
 0x289   :  { %5936 = vst [vmem:[#allocation35_spill] sm:$0xff] %v4960_v36  ;;  %2436 = vperm.xlu2 %2724, %v549_v62   ;;  %2014 = vmatpush.msra.mxu1 %v4969_v2  ;;  %v4981_v33 = vld [vmem:[#allocation10 + $0x528] sm:$0xff]  ;;  %v1305_v62 = vpop.f32.mrf.mxu1 }
 0x28a   :  { %5939 = vst [vmem:[#allocation44_spill] sm:$0xff] %v4969_v2  ;;  %2282 = vmatpush.msrb.mxu0 %v5941_v44  ;;  %2055 = vmatpush.msra.mxu3 %v4973_v12  ;;  %v4990_v44 = vld [vmem:[#allocation10 + $0x518] sm:$0xff]  ;;  %v4995_v2 = vld [vmem:[#allocation10 + $0x508] sm:$0xff] }
 0x28b   :  { %5940 = vst [vmem:[#allocation39_spill] sm:$0xff] %v4973_v12  ;;  %2283 = vmatmul.f32.vlgmr.msrb.gmra.mxu0 %v4565_v17  ;;  %2015 = vmatpush.msra.mxu1 %v4977_v27  ;;  %v4993_v17 = vld [vmem:[#allocation10 + $0x318] sm:$0xff] }
 0x28c   :  { %5942 = vst [vmem:[#allocation27_spill] sm:$0xff] %v4981_v33  ;;  %2056 = vmatpush.msra.mxu3 %v4981_v33 }
 0x28d   :  { %v4963_v10 = vld.sshfl [vmem:[#allocation1 + $0x10] sm:$0xff pattern:$0x75316420]  ;;  %v4965_v26 = vld.sshfl [vmem:[#allocation1 + $0x18] sm:$0xff pattern:$0x75316420] }
 0x28e   :  { %5937 = vst [vmem:[#allocation32_spill] sm:$0xff] %v4963_v10  ;;  %v1306_v10 = vadd.f32 %v1305_v62, %v4866_v18  ;;  %2057 = vmatpush.msra.mxu3 %v4990_v44  ;;  %v5007_v62 = vld [vmem:[#allocation10 + $0x308] sm:$0xff] }
 0x28f   :  { %5938 = vst [vmem:[#allocation42_spill] sm:$0xff] %v4965_v26  ;;  %v4984_v26 = vld [vmem:[#allocation10 + $0x328] sm:$0xff] }
 0x290   :  { %2526 = vst [vmem:[#allocation1 + $0x10] ss:$2 sm:$0xff] %v5657_v6  ;;  %v1428_v36 = vmul.f32 %v1306_v10, %v4987_v3  ;;  %2016 = vmatpush.msra.mxu1 %v4984_v26  ;;  %2058 = vmatpush.msra.mxu3 %v4995_v2 }
 0x291   :  { %5943 = vst [vmem:[#allocation46_spill] sm:$0xff] %v4984_v26  ;;  %v5946_v26 = vmax.f32 %v4845_v40, 0.0 }
 0x292   :  { %v1430_v33 = vadd.f32 %v1428_v36, %v4999_v37  ;;  %2017 = vmatpush.msra.mxu1 %v4993_v17  ;;  %2167 = vmatpush.msrb.mxu3 %v4465_v32  ;;  %v5947_v32 = vld [vmem:[#allocation58_spill] sm:$0xff] }
 0x293   :  { %2059 = vmatmul.f32.vlgmr.msra.gmra.mxu3 %v5946_v26 }
 0x294   :  { %v2698_v10 = vmul.f32 -1.442695, %v1430_v33  ;;  %2018 = vmatpush.msra.mxu1 %v5007_v62  ;;  %2168 = vmatpush.msrb.mxu3 %v4475_v46 }
 0x295   :  { %2019 = vmatmul.f32.vlgmr.msra.gmra.mxu1 %v4655_v0 }
 0x296   :  { %2743 = vpow2.f32 %v2698_v10  ;;  %2127 = vmatpush.msrb.mxu1 %v4459_v48  ;;  %2169 = vmatpush.msrb.mxu3 %v4483_v61  ;;  %v1772_v48 = vsel %vm165_vm0, %v5947_v32, -inf  ;;  %v1365_v10 = vpop.f32.mrf.mxu0 }
 0x297   :  { %v5002_v12 = vld.sshfl [vmem:[#allocation1 + $0x10] sm:$0xff pattern:$0x75316420]  ;;  %v5004_v18 = vld.sshfl [vmem:[#allocation1 + $0x18] sm:$0xff pattern:$0x75316420] }
 0x298   :  { %5944 = vst [vmem:[#allocation48_spill] sm:$0xff] %v5002_v12  ;;  %2128 = vmatpush.msrb.mxu1 %v4470_v38  ;;  %2170 = vmatpush.msrb.mxu3 %v4491_v21  ;;  %v1773_v61 = vrot.slane %v1772_v48, 4 }
 0x299   :  { %5945 = vst [vmem:[#allocation43_spill] sm:$0xff] %v5004_v18  ;;  %v1811_v18 = vsel %vm165_vm0, %v4589_v50, 0.0 }
 0x29a   :  { %2545 = vst [vmem:[#allocation1 + $0x10] ss:$2 sm:$0xff] %v5843_v20  ;;  %v1812_v36 = vrot.slane %v1811_v18, 4  ;;  %2129 = vmatpush.msrb.mxu1 %v4479_v11  ;;  %2171 = vmatpush.msrb.mxu3 %v4499_v15 }
 0x29c   :  { %v2744_v50 = vpop.eup %2743  ;;  %2130 = vmatpush.msrb.mxu1 %v4487_v1  ;;  %v1813_v38 = vadd.f32 %v1812_v36, %v1811_v18  ;;  %2172 = vmatpush.msrb.mxu3 %v4513_v39  ;;  %v1774_v1 = vmax.f32 %v1772_v48, %v1773_v61  ;;  %v5949_v18 = vld [vmem:[#allocation73_spill] sm:$0xff]  ;;  %v5950_v36 = vld [vmem:[#allocation72_spill] sm:$0xff]  ;;  %v5952_v48 = vld [vmem:[#allocation75_spill] sm:$0xff] }
 0x29d   :  { %v1438_v46 = vadd.f32 1.0, %v2744_v50 }
 0x29e   :  { %2131 = vmatpush.msrb.mxu1 %v4495_v41  ;;  %v1814_v11 = vrot.slane %v1813_v38, 2  ;;  %2173 = vmatpush.msrb.mxu3 %v4524_v42 }
 0x29f   :  { %2745 = vrcp.f32 %v1438_v46  ;;  %v1451_v40 = vand.u32 2147483648, %v1438_v46  ;;  %vm1445_vm7 = vweird.f32 %v1438_v46 }
 0x2a0   :  { %2132 = vmatpush.msrb.mxu1 %v4507_v13  ;;  %2174 = vmatpush.msrb.mxu3 %v4536_v45  ;;  %v1815_v15 = vadd.f32 %v1814_v11, %v1813_v38  ;;  %v1775_v13 = vrot.slane %v1774_v1, 2  ;;  %v1449_v45 = vand.u32 2147483647, %v1438_v46  ;;  %v5954_v11 = vld [vmem:[#allocation74_spill] sm:$0xff] }
 0x2a1   :  { %v5023_v33 = vld.sshfl [vmem:[#allocation1 + $0x10] sm:$0xff pattern:$0x75316420]  ;;  %v5025_v12 = vld.sshfl [vmem:[#allocation1 + $0x18] sm:$0xff pattern:$0x75316420] }
 0x2a2   :  { %2564 = vst [vmem:[#allocation1 + $0x10] ss:$2 sm:$0xff] %v5657_v6  ;;  %2133 = vmatpush.msrb.mxu1 %v4520_v22  ;;  %2175 = vmatpush.msrb.mxu3 %v4544_v8  ;;  %v5948_v22 = vld [vmem:[#allocation70_spill] sm:$0xff]  ;;  %v1816_v26 = vrot.slane %v1815_v15, 1  ;;  %v1452_v61 = vor.u32 1.1754944e-38, %v1451_v40  ;;  %vm1450_vm9 = vcmp.eq.f32.partialorder %v1449_v45, 8.507059e+37 }
 0x2a3   :  { %v5951_v8 = vld [vmem:[#allocation66_spill] sm:$0xff]  ;;  %v5957_v40 = vld [vmem:[#allocation79_spill] sm:$0xff] }
 0x2a4   :  { %2134 = vmatpush.msrb.mxu1 %v4530_v55  ;;  %2176 = vmatpush.msrb.mxu3 %v4558_v63  ;;  %v1345_v55 = vpop.f32.mrf.mxu3  ;;  %v5953_v63 = vld [vmem:[#allocation111_spill] sm:$0xff] }
 0x2a5   :  { %v2746_v41 = vpop.eup %2745  ;;  %v1346_v50 = vadd.f32 %v1345_v55, %v5951_v8  ;;  %v1714_v38 = vsel %vm165_vm0, %v5953_v63, 0.0 }
 0x2a6   :  { %v1441_v39 = vmul.f32 %v2746_v41, %v1438_v46  ;;  %2135 = vmatpush.msrb.mxu1 %v4540_v16  ;;  %vm1446_vm6 = vweird.f32 %v2746_v41  ;;  %2177 = vmatpush.msrb.mxu3 %v5949_v18  ;;  %v1776_v16 = vmax.f32 %v1774_v1, %v1775_v13  ;;  %v5955_v18 = vld [vmem:[#allocation77_spill] sm:$0xff]  ;;  %v1385_v1 = vpop.f32.mrf.mxu1  ;;  %v1715_v46 = vrot.slane %v1714_v38, 4 }
 0x2a7   :  { %vm1447_vm8 = vmor %vm1445_vm7, %vm1446_vm6 }
 0x2a8   :  { %v1442_v42 = vsub.f32 1.0, %v1441_v39  ;;  %2136 = vmatpush.msrb.mxu1 %v5948_v22  ;;  %2178 = vmatpush.msrb.mxu3 %v5952_v48  ;;  %v1366_v39 = vadd.f32 %v1365_v10, %v1346_v50  ;;  %v1777_v13 = vrot.slane %v1776_v16, 1  ;;  %v1405_v48 = vpop.f32.mrf.mxu2  ;;  %v1716_v45 = vadd.f32 %v1715_v46, %v1714_v38  ;;  %v5958_v10 = vld [vmem:[#allocation78_spill] sm:$0xff]  ;;  %v5959_v50 = vld [vmem:[#allocation80_spill] sm:$0xff] }
 0x2a9   :  { %v5038_v0 = vld.sshfl [vmem:[#allocation1 + $0x10] sm:$0xff pattern:$0x75316420]  ;;  %v5041_v21 = vld.sshfl [vmem:[#allocation1 + $0x18] sm:$0xff pattern:$0x75316420] }
 0x2aa   :  { %2587 = vst [vmem:[#allocation1 + $0x10] ss:$2 sm:$0xff] %v5843_v20  ;;  %v1443_v20 = vmul.f32 %v2746_v41, %v1442_v42  ;;  %2137 = vmatpush.msrb.mxu1 %v5950_v36  ;;  %v1817_v42 = vadd.f32 %v1816_v26, %v1815_v15  ;;  %2179 = vmatpush.msrb.mxu3 %v5955_v18  ;;  %v5956_v36 = vld [vmem:[#allocation76_spill] sm:$0xff]  ;;  %v5965_v18 = vld [vmem:[#allocation89_spill] sm:$0xff]  ;;  %v5967_v46 = vld [vmem:[#allocation90_spill] sm:$0xff] }
 0x2ab   :  { %v1386_v55 = vadd.f32 %v1385_v1, %v1366_v39  ;;  %v5067_v26 = vmax.f32 %v1776_v16, %v1777_v13  ;;  %v1717_v16 = vrot.slane %v1716_v45, 2  ;;  %v5962_v38 = vld [vmem:[#allocation84_spill] sm:$0xff]  ;;  %v5963_v39 = vld [vmem:[#allocation85_spill] sm:$0xff]  ;;  %v5966_v13 = vld [vmem:[#allocation91_spill] sm:$0xff] }
 0x2ac   :  { %v1444_v32 = vadd.f32 %v2746_v41, %v1443_v20  ;;  %2138 = vmatpush.msrb.mxu1 %v5954_v11  ;;  %2180 = vmatpush.msrb.mxu3 %v4598_v14  ;;  %v5062_v63 = vmul.f32 0.25, %v1817_v42  ;;  %v1425_v11 = vpop.f32.mrf.mxu3 }
 0x2ad   :  { %v1718_v1 = vadd.f32 %v1717_v16, %v1716_v45 }
 0x2ae   :  { %v1448_v22 = vsel %vm1447_vm8, %v2746_v41, %v1444_v32  ;;  %2139 = vmatpush.msrb.mxu1 %v5956_v36  ;;  %2181 = vmatpush.msrb.mxu3 %v4608_v24  ;;  %v1406_v41 = vadd.f32 %v1405_v48, %v1386_v55  ;;  %v5961_v24 = vld [vmem:[#allocation83_spill] sm:$0xff]  ;;  %v5968_v55 = vld [vmem:[#allocation92_spill] sm:$0xff]  ;;  %v5969_v48 = vld [vmem:[#allocation93_spill] sm:$0xff] }
 0x2af   :  { %v1453_v20 = vsel %vm1450_vm9, %v1452_v61, %v1448_v22  ;;  %v5960_v61 = vld [vmem:[#allocation81_spill] sm:$0xff]  ;;  %v5964_v22 = vld [vmem:[#allocation86_spill] sm:$0xff] }
 0x2b0   :  { %v2471_v8 = vperm.slane %v1453_v20, 0  ;;  %2140 = vmatpush.msrb.mxu1 %v5957_v40  ;;  %2182 = vmatpush.msrb.mxu3 %v5958_v10  ;;  %v5970_v40 = vld [vmem:[#allocation94_spill] sm:$0xff] }
 0x2b1   :  { %2183 = vmatmul.f32.vlgmr.msrb.gmra.mxu3 %v5062_v63  ;;  %v2588_v32 = vld.sshfl [vmem:[#allocation1 + $0x10] sm:$0xff pattern:$0x75316420] }
 0x2b2   :  { %v2486_v15 = vmul.f32 %v4889_v51, %v2471_v8  ;;  %2141 = vmatpush.msrb.mxu1 %v4606_v49  ;;  %2247 = vmatpush.msra.mxu3 %v5961_v24  ;;  %v1426_v49 = vadd.f32 %v1425_v11, %v1406_v41  ;;  %v1719_v8 = vrot.slane %v1718_v1, 1  ;;  %v5971_v41 = vld [vmem:[#allocation98_spill] sm:$0xff]  ;;  %v5981_v11 = vld [vmem:[#allocation115_spill] sm:$0xff] }
 0x2b3   :  { %v5980_v24 = vld [vmem:[#allocation50_spill] sm:$0xff] }
 0x2b4   :  { %v2501_v14 = vadd.f32 %v4922_v57, %v2486_v15  ;;  %2142 = vmatpush.msrb.mxu1 %v5959_v50  ;;  %2248 = vmatpush.msra.mxu3 %v5963_v39  ;;  %v1429_v42 = vmul.f32 %v1426_v49, %v4987_v3  ;;  %v5972_v15 = vld [vmem:[#allocation99_spill] sm:$0xff]  ;;  %v1720_v45 = vadd.f32 %v1719_v8, %v1718_v1  ;;  %v2589_v50 = vld.sshfl [vmem:[#allocation1 + $0x18] sm:$0xff pattern:$0x75316420]  ;;  %v5991_v8 = vld [vmem:[#allocation129_spill] sm:$0xff] }
 0x2b5   :  { %2143 = vmatmul.f32.vlgmr.msrb.gmra.mxu1 %v5067_v26  ;;  %2606 = vst [vmem:[#allocation1 + $0x10] ss:$2 sm:$0xff] %v5657_v6  ;;  %v5973_v6 = vld [vmem:[#allocation107_spill] sm:$0xff]  ;;  %v5984_v39 = vld [vmem:[#allocation118_spill] sm:$0xff] }
 0x2b6   :  { %2207 = vmatpush.msra.mxu1 %v5960_v61  ;;  %v2581_v51 = vadd.f32 1.0, %v2501_v14  ;;  %2249 = vmatpush.msra.mxu3 %v5965_v18  ;;  %v1431_v36 = vadd.f32 %v1429_v42, %v4999_v37  ;;  %v5982_v49 = vld [vmem:[#allocation31_spill] sm:$0xff]  ;;  %v5985_v42 = vld [vmem:[#allocation117_spill] sm:$0xff]  ;;  %v5986_v18 = vld [vmem:[#allocation28_spill] sm:$0xff] }
 0x2b8   :  { %2208 = vmatpush.msra.mxu1 %v5962_v38  ;;  %v5078_v57 = vmul.f32 %v2588_v32, %v2581_v51  ;;  %2250 = vmatpush.msra.mxu3 %v5967_v46  ;;  %v2699_v20 = vmul.f32 -1.442695, %v1431_v36  ;;  %v5979_v32 = vld [vmem:[#allocation22_spill] sm:$0xff]  ;;  %v5983_v38 = vld [vmem:[#allocation116_spill] sm:$0xff]  ;;  %v5988_v36 = vld [vmem:[#allocation123_spill] sm:$0xff]  ;;  %v5132_v46 = vstv %s2702_s19 }
 0x2ba   :  { %2209 = vmatpush.msra.mxu1 %v5964_v22  ;;  %2251 = vmatpush.msra.mxu3 %v5968_v55  ;;  %2747 = vpow2.f32 %v2699_v20  ;;  %v5990_v20 = vld [vmem:[#allocation23_spill] sm:$0xff] }
 0x2bc   :  { %2210 = vmatpush.msra.mxu1 %v5966_v13  ;;  %2252 = vmatpush.msra.mxu3 %v5970_v40  ;;  %v5989_v13 = vld [vmem:[#allocation120_spill] sm:$0xff] }
 0x2be   :  { %2211 = vmatpush.msra.mxu1 %v4686_v59  ;;  %2253 = vmatpush.msra.mxu3 %v5972_v15  ;;  %v1725_v59 = vadd.f32 %v4329_v19, %v1720_v45  ;;  %v1840_v15 = vpop.f32.mrf.mxu0  ;;  %v5994_v45 = vld [vmem:[#allocation30_spill] sm:$0xff] }
 0x2c0   :  { %2212 = vmatpush.msra.mxu1 %v5969_v48  ;;  %2254 = vmatpush.msra.mxu3 %v4747_v30  ;;  %v2748_v10 = vpop.eup %2747  ;;  %v5992_v48 = vld [vmem:[#allocation114_spill] sm:$0xff] }
 0x2c1   :  { %v1439_v14 = vadd.f32 1.0, %v2748_v10  ;;  %v922_v40 = vadd.f32 %v5992_v48, %v5991_v8 }
 0x2c2   :  { %2213 = vmatpush.msra.mxu1 %v5971_v41  ;;  %2255 = vmatpush.msra.mxu3 %v4764_v54  ;;  %v5993_v41 = vld [vmem:[#allocation121_spill] sm:$0xff] }
 0x2c3   :  { %2749 = vrcp.f32 %v1439_v14  ;;  %vm1460_vm11 = vweird.f32 %v1439_v14 }
 0x2c4   :  { %2214 = vmatpush.msra.mxu1 %v4745_v60  ;;  %2256 = vmatpush.msra.mxu3 %v4777_v56  ;;  %v1730_v60 = vmul.f32 %v4354_v31, %v1725_v59  ;;  %v5974_v31 = vld [vmem:[#allocation109_spill] sm:$0xff]  ;;  %v5975_v56 = vld [vmem:[#allocation110_spill] sm:$0xff] }
 0x2c5   :  { %v5995_v59 = vld [vmem:[#allocation34_spill] sm:$0xff] }
 0x2c6   :  { %2215 = vmatpush.msra.mxu1 %v4762_v43  ;;  %2257 = vmatpush.msra.mxu3 %v4795_v53  ;;  %v5108_v43 = vadd.f32 %v4373_v4, %v1730_v60  ;;  %v1464_v53 = vand.u32 2147483647, %v1439_v14 }
 0x2c8   :  { %2216 = vmatpush.msra.mxu1 %v4772_v7  ;;  %2258 = vmatpush.msra.mxu3 %v4808_v34  ;;  %v1466_v7 = vand.u32 2147483648, %v1439_v14  ;;  %v5977_v34 = vld [vmem:[#allocation59_spill] sm:$0xff]  ;;  %vm1465_vm13 = vcmp.eq.f32.partialorder %v1464_v53, 8.507059e+37 }
 0x2c9   :  { %v2750_v30 = vpop.eup %2749 }
 0x2ca   :  { %2217 = vmatpush.msra.mxu1 %v4793_v52  ;;  %2259 = vmatpush.msra.mxu3 %v4823_v29  ;;  %v1456_v19 = vmul.f32 %v2750_v30, %v1439_v14  ;;  %vm1461_vm10 = vweird.f32 %v2750_v30  ;;  %v5978_v29 = vld [vmem:[#allocation113_spill] sm:$0xff]  ;;  %v1841_v14 = vadd.f32 %v1840_v15, %v5132_v46 }
 0x2cb   :  { %vm1462_vm12 = vmor %vm1460_vm11, %vm1461_vm10 }
 0x2cc   :  { %2218 = vmatpush.msra.mxu1 %v4806_v23  ;;  %2260 = vmatpush.msra.mxu3 %v5973_v6  ;;  %v1457_v54 = vsub.f32 1.0, %v1456_v19  ;;  %v5976_v23 = vld [vmem:[#allocation29_spill] sm:$0xff] }
 0x2cd   :  { %v5997_v19 = vld [vmem:[#allocation37_spill] sm:$0xff] }
 0x2ce   :  { %2219 = vmatpush.msra.mxu1 %v4821_v28  ;;  %2261 = vmatpush.msra.mxu3 %v5975_v56  ;;  %v1458_v52 = vmul.f32 %v2750_v30, %v1457_v54  ;;  %v1739_v28 = vmax.f32 %v5108_v43, 0.0  ;;  %v1042_v6 = vadd.f32 %v5997_v19, %v5991_v8  ;;  %v5998_v54 = vld [vmem:[#allocation88_spill] sm:$0xff] }
 0x2d0   :  { %2220 = vmatpush.msra.mxu1 %v4830_v47  ;;  %2262 = vmatpush.msra.mxu3 %v5977_v34  ;;  %v1459_v4 = vadd.f32 %v2750_v30, %v1458_v52  ;;  %v1467_v47 = vor.u32 1.1754944e-38, %v1466_v7  ;;  %v942_v7 = vadd.f32 %v5998_v54, %v922_v40  ;;  %v6000_v52 = vld [vmem:[#allocation100_spill] sm:$0xff]  ;;  %v6001_v34 = vld [vmem:[#allocation33_spill] sm:$0xff] }
 0x2d1   :  { %2263 = vmatmul.f32.vlgmr.msra.gmra.mxu3 %v5067_v26  ;;  %v5987_v26 = vld [vmem:[#allocation119_spill] sm:$0xff]  ;;  %v1860_v60 = vpop.f32.mrf.mxu1  ;;  %v1062_v53 = vadd.f32 %v6000_v52, %v1042_v6 }
 0x2d2   :  { %2221 = vmatpush.msra.mxu1 %v5974_v31  ;;  %2327 = vmatpush.msrb.mxu3 %v5978_v29  ;;  %v1463_v61 = vsel %vm1462_vm12, %v2750_v30, %v1459_v4  ;;  %v5996_v30 = vld [vmem:[#allocation36_spill] sm:$0xff]  ;;  %v1861_v31 = vadd.f32 %v1860_v60, %v1841_v14 }
 0x2d3   :  { %v1468_v51 = vsel %vm1465_vm13, %v1467_v47, %v1463_v61  ;;  %v6002_v29 = vld [vmem:[#allocation124_spill] sm:$0xff]  ;;  %v6003_v47 = vld [vmem:[#allocation35_spill] sm:$0xff] }
 0x2d4   :  { %2222 = vmatpush.msra.mxu1 %v5976_v23  ;;  %2328 = vmatpush.msrb.mxu3 %v5980_v24  ;;  %v2472_v16 = vperm.slane %v1468_v51, 0  ;;  %v1880_v23 = vpop.f32.mrf.mxu2  ;;  %v6007_v24 = vld [vmem:[#allocation39_spill] sm:$0xff]  ;;  %v6009_v51 = vld [vmem:[#allocation122_spill] sm:$0xff] }
 0x2d5   :  { %2223 = vmatmul.f32.vlgmr.msra.gmra.mxu1 %v1739_v28  ;;  %v1881_v4 = vadd.f32 %v1880_v23, %v1861_v31 }
 0x2d6   :  { %2287 = vmatpush.msrb.mxu1 %v5979_v32  ;;  %2329 = vmatpush.msrb.mxu3 %v5982_v49  ;;  %v2487_v22 = vmul.f32 %v5985_v42, %v2472_v16  ;;  %v6010_v16 = vld [vmem:[#allocation101_spill] sm:$0xff]  ;;  %v1920_v42 = vpop.f32.mrf.mxu0 }
 0x2d8   :  { %2288 = vmatpush.msrb.mxu1 %v5981_v11  ;;  %2330 = vmatpush.msrb.mxu3 %v5984_v39  ;;  %v2502_v1 = vadd.f32 %v5988_v36, %v2487_v22  ;;  %v6011_v39 = vld [vmem:[#allocation46_spill] sm:$0xff]  ;;  %v6012_v22 = vld [vmem:[#allocation95_spill] sm:$0xff]  ;;  %v6013_v36 = vld [vmem:[#allocation41_spill] sm:$0xff] }
 0x2da   :  { %2289 = vmatpush.msrb.mxu1 %v5983_v38  ;;  %2331 = vmatpush.msrb.mxu3 %v5987_v26  ;;  %v2582_v55 = vadd.f32 1.0, %v2502_v1 }
 0x2dc   :  { %2290 = vmatpush.msrb.mxu1 %v5986_v18  ;;  %2332 = vmatpush.msrb.mxu3 %v5990_v20  ;;  %v5139_v10 = vmul.f32 %v2589_v50, %v2582_v55  ;;  %v5999_v50 = vld [vmem:[#allocation38_spill] sm:$0xff]  ;;  %v5174_v20 = vstv %s2703_s20  ;;  %v6014_v55 = vld [vmem:[#allocation104_spill] sm:$0xff]  ;;  %v1960_v15 = vpop.f32.mrf.mxu2 }
 0x2dd   :  { %v962_v56 = vadd.f32 %v5999_v50, %v942_v7  ;;  %v1961_v14 = vadd.f32 %v1960_v15, %v5132_v46 }
 0x2de   :  { %2291 = vmatpush.msrb.mxu1 %v5989_v13  ;;  %2333 = vmatpush.msrb.mxu3 %v5994_v45  ;;  %v2000_v7 = vpop.f32.mrf.mxu0 }
 0x2e0   :  { %2292 = vmatpush.msrb.mxu1 %v5993_v41  ;;  %2334 = vmatpush.msrb.mxu3 %v5996_v30 }
 0x2e2   :  { %2293 = vmatpush.msrb.mxu1 %v5995_v59  ;;  %2335 = vmatpush.msrb.mxu3 %v4938_v5  ;;  %v6004_v5 = vld [vmem:[#allocation24_spill] sm:$0xff] }
 0x2e3   :  { %v982_v32 = vadd.f32 %v6004_v5, %v962_v56 }
 0x2e4   :  { %2294 = vmatpush.msrb.mxu1 %v4932_v9  ;;  %2336 = vmatpush.msrb.mxu3 %v4946_v58  ;;  %v1900_v9 = vpop.f32.mrf.mxu3  ;;  %v6006_v58 = vld [vmem:[#allocation44_spill] sm:$0xff] }
 0x2e5   :  { %v1901_v11 = vadd.f32 %v1900_v9, %v1881_v4  ;;  %v1002_v49 = vadd.f32 %v6009_v51, %v982_v32 }
 0x2e6   :  { %2295 = vmatpush.msrb.mxu1 %v4941_v35  ;;  %2337 = vmatpush.msrb.mxu3 %v6001_v34  ;;  %v6005_v35 = vld [vmem:[#allocation125_spill] sm:$0xff] }
 0x2e7   :  { %v1082_v61 = vadd.f32 %v6005_v35, %v1062_v53  ;;  %v1022_v18 = vadd.f32 %v6012_v22, %v1002_v49  ;;  %v1921_v26 = vadd.f32 %v1920_v42, %v1901_v11  ;;  %v2040_v53 = vpop.f32.mrf.mxu2 }
 0x2e8   :  { %2296 = vmatpush.msrb.mxu1 %v4949_v25  ;;  %2338 = vmatpush.msrb.mxu3 %v6003_v47  ;;  %v6008_v25 = vld [vmem:[#allocation27_spill] sm:$0xff] }
 0x2e9   :  { %v1102_v38 = vadd.f32 %v6010_v16, %v1082_v61 }
 0x2ea   :  { %2297 = vmatpush.msrb.mxu1 %v6002_v29  ;;  %2339 = vmatpush.msrb.mxu3 %v6007_v24 }
 0x2eb   :  { %v1122_v1 = vadd.f32 %v6013_v36, %v1102_v38 }
 0x2ec   :  { %2298 = vmatpush.msrb.mxu1 %v6006_v58  ;;  %2340 = vmatpush.msrb.mxu3 %v6008_v25 }
 0x2ee   :  { %2299 = vmatpush.msrb.mxu1 %v4977_v27  ;;  %2341 = vmatpush.msrb.mxu3 %v4990_v44  ;;  %v1940_v27 = vpop.f32.mrf.mxu1  ;;  %v1145_v44 = vmul.f32 %v4987_v3, %v1022_v18 }
 0x2ef   :  { %v1941_v13 = vadd.f32 %v1940_v27, %v1921_v26 }
 0x2f0   :  { %2300 = vmatpush.msrb.mxu1 %v6011_v39  ;;  %2342 = vmatpush.msrb.mxu3 %v4995_v2  ;;  %v5180_v2 = vstv %s2704_s1  ;;  %v1148_v48 = vadd.f32 %v4999_v37, %v1145_v44 }
 0x2f1   :  { %2343 = vmatmul.f32.vlgmr.msrb.gmra.mxu3 %v1739_v28  ;;  %v2064_v8 = vmul.f32 %v5174_v20, %v1941_v13 }
 0x2f2   :  { %2301 = vmatpush.msrb.mxu1 %v4993_v17  ;;  %v1142_v17 = vadd.f32 %v6014_v55, %v1122_v1  ;;  %v2696_v28 = vmul.f32 -1.442695, %v1148_v48 }
 0x2f3   :  { %v2067_v43 = vadd.f32 %v5180_v2, %v2064_v8  ;;  %v1980_v60 = vpop.f32.mrf.mxu3 }
 0x2f4   :  { %2302 = vmatpush.msrb.mxu1 %v5007_v62  ;;  %v1146_v62 = vmul.f32 %v4987_v3, %v1142_v17  ;;  %2751 = vpow2.f32 %v2696_v28  ;;  %v1981_v3 = vadd.f32 %v1980_v60, %v1961_v14 }
 0x2f5   :  { %2303 = vmatmul.f32.vlgmr.msrb.gmra.mxu1 %v5062_v63  ;;  %v2705_v41 = vmul.f32 -1.442695, %v2067_v43 }
 0x2f6   :  { %v1149_v40 = vadd.f32 %v4999_v37, %v1146_v62  ;;  %v2001_v37 = vadd.f32 %v2000_v7, %v1981_v3 }
 0x2f7   :  { %2753 = vpow2.f32 %v2705_v41 }
 0x2f8   :  { %v2697_v63 = vmul.f32 -1.442695, %v1149_v40 }
 0x2fa   :  { %2755 = vpow2.f32 %v2697_v63  ;;  %v2752_v45 = vpop.eup %2751 }
 0x2fb   :  { %v1156_v30 = vadd.f32 1.0, %v2752_v45  ;;  %v2432_v45 = vpop.permute.xlu0 %2431 }
 0x2fd   :  { %v2754_v59 = vpop.eup %2753  ;;  %2757 = vrcp.f32 %v1156_v30  ;;  %vm1163_vm1 = vweird.f32 %v1156_v30  ;;  %v1169_v18 = vand.u32 2147483648, %v1156_v30  ;;  %v1167_v27 = vand.u32 2147483647, %v1156_v30 }
 0x2fe   :  { %v2075_v6 = vadd.f32 1.0, %v2754_v59  ;;  %v2392_v59 = vpop.permute.xlu2 %2391 }
 0x2ff   :  { %v1170_v48 = vor.u32 1.1754944e-38, %v1169_v18  ;;  %vm1168_vm9 = vcmp.eq.f32.partialorder %v1167_v27, 8.507059e+37  ;;  %v6029_v18 = vld [vmem:[#allocation55_spill] sm:$0xff] }
 0x300   :  { %v2756_v19 = vpop.eup %2755  ;;  %2759 = vrcp.f32 %v2075_v6  ;;  %v2088_v39 = vand.u32 2147483648, %v2075_v6  ;;  %vm2082_vm3 = vweird.f32 %v2075_v6  ;;  %v2086_v26 = vand.u32 2147483647, %v2075_v6  ;;  %v6030_v27 = vld [vmem:[#allocation127_spill] sm:$0xff] }
 0x301   :  { %v1157_v54 = vadd.f32 1.0, %v2756_v19  ;;  %v6017_v19 = vld [vmem:[#allocation130_spill] sm:$0xff] }
 0x302   :  { %v2089_v8 = vor.u32 1.1754944e-38, %v2088_v39  ;;  %vm2087_vm8 = vcmp.eq.f32.partialorder %v2086_v26, 8.507059e+37 }
 0x303   :  { %2761 = vrcp.f32 %v1157_v54  ;;  %v2758_v56 = vpop.eup %2757  ;;  %v1184_v44 = vand.u32 2147483648, %v1157_v54  ;;  %vm1178_vm6 = vweird.f32 %v1157_v54  ;;  %v1182_v17 = vand.u32 2147483647, %v1157_v54 }
 0x304   :  { %v1159_v29 = vmul.f32 %v2758_v56, %v1156_v30  ;;  %vm1164_vm14 = vweird.f32 %v2758_v56 }
 0x305   :  { %vm5189_vm2 = vmor %vm1163_vm1, %vm1164_vm14  ;;  %v1185_v28 = vor.u32 1.1754944e-38, %v1184_v44  ;;  %vm1183_vm10 = vcmp.eq.f32.partialorder %v1182_v17, 8.507059e+37  ;;  %v2603_v17 = vld.sshfl [vmem:[#allocation1] sm:$0xff pattern:$0x75316420] }
 0x306   :  { %v2760_v52 = vpop.eup %2759  ;;  %v1160_v35 = vsub.f32 1.0, %v1159_v29  ;;  %v6022_v29 = vld [vmem:[#allocation40_spill] sm:$0xff] }
 0x307   :  { %v2078_v9 = vmul.f32 %v2760_v52, %v2075_v6  ;;  %vm2083_vm15 = vweird.f32 %v2760_v52  ;;  %v2451_v6 = vmul.f32 %v6017_v19, %v2432_v45  ;;  %v2604_v19 = vld.sshfl [vmem:[#allocation1 + $0x8] sm:$0xff pattern:$0x75316420] }
 0x308   :  { %v1161_v25 = vmul.f32 %v2758_v56, %v1160_v35  ;;  %vm2084_vm5 = vmor %vm2082_vm3, %vm2083_vm15 }
 0x309   :  { %v2762_v4 = vpop.eup %2761  ;;  %v2079_v61 = vsub.f32 1.0, %v2078_v9  ;;  %v2410_v9 = vmul.f32 %v6022_v29, %v2392_v59 }
 0x30a   :  { %v1174_v32 = vmul.f32 %v2762_v4, %v1157_v54  ;;  %v1162_v16 = vadd.f32 %v2758_v56, %v1161_v25  ;;  %vm1179_vm4 = vweird.f32 %v2762_v4  ;;  %v6018_v54 = vld [vmem:[#allocation57_spill] sm:$0xff] }
 0x30b   :  { %v2080_v51 = vmul.f32 %v2760_v52, %v2079_v61  ;;  %vm1180_vm7 = vmor %vm1178_vm6, %vm1179_vm4  ;;  %v6026_v25 = vld [vmem:[#allocation53_spill] sm:$0xff] }
 0x30c   :  { %v1175_v11 = vsub.f32 1.0, %v1174_v32  ;;  %v1166_v13 = vsel %vm5189_vm2, %v2758_v56, %v1162_v16  ;;  %v6020_v56 = vld [vmem:[#allocation62_spill] sm:$0xff] }
 0x30d   :  { %v2081_v38 = vadd.f32 %v2760_v52, %v2080_v51  ;;  %v1171_v40 = vsel %vm1168_vm9, %v1170_v48, %v1166_v13  ;;  %v6024_v32 = vld [vmem:[#allocation54_spill] sm:$0xff] }
 0x30e   :  { %v1176_v49 = vmul.f32 %v2762_v4, %v1175_v11  ;;  %v2469_v14 = vperm.slane %v1171_v40, 0  ;;  %v2466_v35 = vadd.f32 %v6024_v32, %v2451_v6  ;;  %v6035_v6 = vld [vmem:[#allocation68_spill] sm:$0xff] }
 0x30f   :  { %v2085_v55 = vsel %vm2084_vm5, %v2760_v52, %v2081_v38  ;;  %v6028_v38 = vld [vmem:[#allocation45_spill] sm:$0xff] }
 0x310   :  { %v1177_v36 = vadd.f32 %v2762_v4, %v1176_v49  ;;  %v2090_v43 = vsel %vm2087_vm8, %v2089_v8, %v2085_v55  ;;  %v2484_v52 = vmul.f32 %v6020_v56, %v2469_v14  ;;  %v6027_v49 = vld [vmem:[#allocation128_spill] sm:$0xff]  ;;  %v2557_v13 = vadd.f32 1.0, %v2466_v35  ;;  %v6037_v56 = vld [vmem:[#allocation106_spill] sm:$0xff] }
 0x311   :  { %v2503_v63 = vperm.slane %v2090_v43, 0 }
 0x312   :  { %v2020_v31 = vpop.f32.mrf.mxu1  ;;  %v1181_v62 = vsel %vm1180_vm7, %v2762_v4, %v1177_v36  ;;  %v2499_v51 = vadd.f32 %v6026_v25, %v2484_v52  ;;  %v2425_v36 = vadd.f32 %v6030_v27, %v2410_v9  ;;  %v5218_v9 = vstv %s144_s21 }
 0x313   :  { %v2021_v50 = vadd.f32 %v2020_v31, %v2001_v37  ;;  %v1186_v41 = vsel %vm1183_vm10, %v1185_v28, %v1181_v62  ;;  %v2518_v7 = vmul.f32 %v6018_v54, %v2503_v63  ;;  %v6019_v37 = vld [vmem:[#allocation126_spill] sm:$0xff]  ;;  %v6031_v62 = vld [vmem:[#allocation61_spill] sm:$0xff] }
 0x314   :  { %v2470_v30 = vperm.slane %v1186_v41, 0  ;;  %v2411_v31 = vmul.f32 %v6019_v37, %v2392_v59  ;;  %v2579_v55 = vadd.f32 1.0, %v2499_v51  ;;  %v2537_v40 = vadd.f32 1.0, %v2425_v36  ;;  %v6032_v41 = vld [vmem:[#allocation71_spill] sm:$0xff]  ;;  %v2124_v59 = vpop.f32.mrf.mxu0 }
 0x315   :  { %v2041_v23 = vadd.f32 %v2040_v53, %v2021_v50  ;;  %v6021_v53 = vld [vmem:[#allocation64_spill] sm:$0xff]  ;;  %v2572_v63 = vmul.f32 %v6032_v41, %v2557_v13  ;;  %v2125_v54 = vadd.f32 %v2124_v59, %v5132_v46 }
 0x316   :  { %v2060_v34 = vpop.f32.mrf.mxu3  ;;  %v2426_v16 = vadd.f32 %v6027_v49, %v2411_v31 }
 0x317   :  { %v2061_v47 = vadd.f32 %v2060_v34, %v2041_v23  ;;  %v2450_v23 = vmul.f32 %v6021_v53, %v2432_v45  ;;  %v6038_v53 = vld [vmem:[#allocation67_spill] sm:$0xff] }
 0x318   :  { %v2538_v8 = vadd.f32 1.0, %v2426_v16 }
 0x319   :  { %v2065_v5 = vmul.f32 %v5174_v20, %v2061_v47  ;;  %v6023_v47 = vld [vmem:[#allocation26_spill] sm:$0xff]  ;;  %v2465_v39 = vadd.f32 %v6028_v38, %v2450_v23  ;;  %v2552_v23 = vmul.f32 %v6038_v53, %v2537_v40  ;;  %v2397_v40 = vpop.permute.xlu1 %2396 }
 0x31b   :  { %v2068_v58 = vadd.f32 %v5180_v2, %v2065_v5  ;;  %v2485_v5 = vmul.f32 %v6023_v47, %v2470_v30  ;;  %v2556_v48 = vadd.f32 1.0, %v2465_v39  ;;  %v5220_v47 = vstv %s2670_s22 }
 0x31d   :  { %v2706_v24 = vmul.f32 -1.442695, %v2068_v58  ;;  %v6025_v58 = vld [vmem:[#allocation63_spill] sm:$0xff]  ;;  %v2500_v26 = vadd.f32 %v6029_v18, %v2485_v5  ;;  %v2204_v18 = vpop.f32.mrf.mxu0 }
 0x31f   :  { %2763 = vpow2.f32 %v2706_v24  ;;  %v2533_v24 = vadd.f32 %v6025_v58, %v2518_v7  ;;  %v2580_v28 = vadd.f32 1.0, %v2500_v26  ;;  %v6036_v7 = vld [vmem:[#allocation69_spill] sm:$0xff] }
 0x320   :  { %v2571_v37 = vmul.f32 %v6036_v7, %v2556_v48  ;;  %v6041_v7 = vld [vmem:[#allocation108_spill] sm:$0xff] }
 0x321   :  { %v2598_v44 = vadd.f32 1.0, %v2533_v24  ;;  %v2595_v52 = vmul.f32 %v6037_v56, %v2580_v28  ;;  %v2437_v28 = vpop.permute.xlu2 %2436  ;;  %v6042_v56 = vld [vmem:[#allocation96_spill] sm:$0xff] }
 0x322   :  { %v2575_v5 = vadd.f32 %v2571_v37, %v2552_v23 }
 0x323   :  { %v2613_v14 = vmul.f32 %v2603_v17, %v2598_v44 }
 0x324   :  { %v2622_v25 = vmul.f32 %v5218_v9, %v2575_v5 }
 0x325   :  { %v2764_v42 = vpop.eup %2763 }
 0x326   :  { %v2076_v1 = vadd.f32 1.0, %v2764_v42 }
 0x328   :  { %2765 = vrcp.f32 %v2076_v1  ;;  %v2103_v50 = vand.u32 2147483648, %v2076_v1  ;;  %v2101_v4 = vand.u32 2147483647, %v2076_v1  ;;  %vm2097_vm12 = vweird.f32 %v2076_v1 }
 0x32a   :  { %v2104_v11 = vor.u32 1.1754944e-38, %v2103_v50  ;;  %vm2102_vm14 = vcmp.eq.f32.partialorder %v2101_v4, 8.507059e+37 }
 0x32e   :  { %v2766_v15 = vpop.eup %2765 }
 0x32f   :  { %v2093_v60 = vmul.f32 %v2766_v15, %v2076_v1  ;;  %vm2098_vm11 = vweird.f32 %v2766_v15 }
 0x330   :  { %vm2099_vm13 = vmor %vm2097_vm12, %vm2098_vm11 }
 0x331   :  { %v2094_v3 = vsub.f32 1.0, %v2093_v60  ;;  %v6034_v60 = vld [vmem:[#allocation105_spill] sm:$0xff] }
 0x332   :  { %v2594_v30 = vmul.f32 %v6034_v60, %v2579_v55  ;;  %v2144_v50 = vpop.f32.mrf.mxu1  ;;  %v6040_v60 = vld [vmem:[#allocation82_spill] sm:$0xff] }
 0x333   :  { %v2095_v34 = vmul.f32 %v2766_v15, %v2094_v3  ;;  %v2553_v3 = vmul.f32 %v6035_v6, %v2538_v8  ;;  %v2145_v32 = vadd.f32 %v2144_v50, %v2125_v54 }
 0x334   :  { %v2617_v29 = vadd.f32 %v2613_v14, %v2594_v30  ;;  %v2184_v16 = vpop.f32.mrf.mxu3  ;;  %v2412_v30 = vmul.f32 %v6040_v60, %v2397_v40 }
 0x335   :  { %v2096_v61 = vadd.f32 %v2766_v15, %v2095_v34  ;;  %v2576_v34 = vadd.f32 %v2572_v63, %v2553_v3 }
 0x336   :  { %v2627_v58 = vmul.f32 %v5220_v47, %v2617_v29 }
 0x337   :  { %v2100_v42 = vsel %vm2099_vm13, %v2766_v15, %v2096_v61  ;;  %v6033_v15 = vld [vmem:[#allocation65_spill] sm:$0xff]  ;;  %v2623_v61 = vmul.f32 %v5218_v9, %v2576_v34 }
 0x338   :  { %v2105_v22 = vsel %vm2102_vm14, %v2104_v11, %v2100_v42  ;;  %v2164_v11 = vpop.f32.mrf.mxu2  ;;  %v2631_v38 = vadd.f32 %v2627_v58, %v2622_v25  ;;  %v6043_v58 = vld [vmem:[#allocation32_spill] sm:$0xff] }
 0x339   :  { %v2504_v1 = vperm.slane %v2105_v22, 0  ;;  %v2165_v51 = vadd.f32 %v2164_v11, %v2145_v32 }
 0x33b   :  { %v2519_v43 = vmul.f32 %v6031_v62, %v2504_v1  ;;  %v2185_v42 = vadd.f32 %v2184_v16, %v2165_v51  ;;  %v6044_v51 = vld [vmem:[#allocation48_spill] sm:$0xff] }
 0x33d   :  { %v2534_v45 = vadd.f32 %v6033_v15, %v2519_v43  ;;  %v2205_v26 = vadd.f32 %v2204_v18, %v2185_v42  ;;  %v2284_v15 = vpop.f32.mrf.mxu0 }
 0x33f   :  { %v2599_v31 = vadd.f32 1.0, %v2534_v45  ;;  %v6039_v45 = vld [vmem:[#allocation102_spill] sm:$0xff] }
 0x340   :  { %v2244_v8 = vpop.f32.mrf.mxu2  ;;  %v2452_v14 = vmul.f32 %v6039_v45, %v2437_v28 }
 0x341   :  { %v2614_v4 = vmul.f32 %v2604_v19, %v2599_v31  ;;  %v2245_v48 = vadd.f32 %v2244_v8, %v5132_v46 }
 0x342   :  { %v2467_v37 = vadd.f32 %v6041_v7, %v2452_v14 }
 0x343   :  { %v2618_v35 = vadd.f32 %v2614_v4, %v2595_v52  ;;  %v2427_v52 = vadd.f32 %v6042_v56, %v2412_v30 }
 0x344   :  { %v2558_v4 = vadd.f32 1.0, %v2467_v37  ;;  %v6050_v37 = vld [vmem:[#allocation43_spill] sm:$0xff] }
 0x345   :  { %v2628_v24 = vmul.f32 %v5220_v47, %v2618_v35  ;;  %v2539_v35 = vadd.f32 1.0, %v2427_v52 }
 0x346   :  { %v2573_v25 = vmul.f32 %v5038_v0, %v2558_v4 }
 0x347   :  { %v2632_v49 = vadd.f32 %v2628_v24, %v2623_v61 }
 0x348   :  { %v2324_v29 = vpop.f32.mrf.mxu2 }
 0x349   :  { %v2639_v39 = vrot.slane %v2632_v49, 4 }
 0x34b   :  { %v2641_v22 = vsel %vm165_vm0, %v2631_v38, %v2639_v39  ;;  %v2607_v38 = vld.sshfl [vmem:[#allocation1 + $0x10] sm:$0xff pattern:$0x75316420]  ;;  %v2554_v39 = vmul.f32 %v5023_v33, %v2539_v35  ;;  %v6045_v33 = vld [vmem:[#allocation103_spill] sm:$0xff] }
 0x34c   :  { %2645 = vst [vmem:[#allocation15] sm:$0xff] %v2641_v22  ;;  %v2453_v8 = vmul.f32 %v6045_v33, %v2437_v28 }
 0x34d   :  { %v2577_v18 = vadd.f32 %v2573_v25, %v2554_v39 }
 0x352   :  { %v2224_v27 = vpop.f32.mrf.mxu1 }
 0x353   :  { %v2225_v36 = vadd.f32 %v2224_v27, %v2205_v26 }
 0x354   :  { %v2264_v62 = vpop.f32.mrf.mxu3 }
 0x355   :  { %v2347_v13 = vmul.f32 %v2225_v36, %v5174_v20  ;;  %v2265_v63 = vadd.f32 %v2264_v62, %v2245_v48  ;;  %v6046_v62 = vld [vmem:[#allocation87_spill] sm:$0xff] }
 0x357   :  { %v2349_v1 = vadd.f32 %v2347_v13, %v5180_v2  ;;  %v2285_v54 = vadd.f32 %v2284_v15, %v2265_v63  ;;  %v2624_v13 = vmul.f32 %v5218_v9, %v2577_v18  ;;  %v6047_v63 = vld [vmem:[#allocation112_spill] sm:$0xff] }
 0x358   :  { %v2468_v15 = vadd.f32 %v6047_v63, %v2453_v8 }
 0x359   :  { %v2707_v44 = vmul.f32 -1.442695, %v2349_v1 }
 0x35b   :  { %2767 = vpow2.f32 %v2707_v44 }
 0x361   :  { %v2768_v55 = vpop.eup %2767 }
 0x362   :  { %v2357_v17 = vadd.f32 1.0, %v2768_v55 }
 0x364   :  { %2769 = vrcp.f32 %v2357_v17  ;;  %v2370_v19 = vand.u32 2147483648, %v2357_v17  ;;  %v2368_v3 = vand.u32 2147483647, %v2357_v17  ;;  %vm2364_vm1 = vweird.f32 %v2357_v17 }
 0x366   :  { %v2371_v31 = vor.u32 1.1754944e-38, %v2370_v19  ;;  %vm2369_vm3 = vcmp.eq.f32.partialorder %v2368_v3, 8.507059e+37 }
 0x36a   :  { %v2770_v43 = vpop.eup %2769 }
 0x36b   :  { %v2360_v41 = vmul.f32 %v2770_v43, %v2357_v17  ;;  %vm2365_vm15 = vweird.f32 %v2770_v43 }
 0x36c   :  { %vm2366_vm2 = vmor %vm2364_vm1, %vm2365_vm15 }
 0x36d   :  { %v2361_v59 = vsub.f32 1.0, %v2360_v41 }
 0x36f   :  { %v2362_v6 = vmul.f32 %v2770_v43, %v2361_v59  ;;  %v6048_v59 = vld [vmem:[#allocation97_spill] sm:$0xff] }
 0x371   :  { %v2363_v46 = vadd.f32 %v2770_v43, %v2362_v6  ;;  %v2559_v6 = vadd.f32 1.0, %v2468_v15 }
 0x372   :  { %v2304_v50 = vpop.f32.mrf.mxu1 }
 0x373   :  { %v2367_v53 = vsel %vm2366_vm2, %v2770_v43, %v2363_v46  ;;  %v2305_v23 = vadd.f32 %v2304_v50, %v2285_v54  ;;  %v2413_v43 = vmul.f32 %v6046_v62, %v2397_v40  ;;  %v6049_v54 = vld [vmem:[#allocation42_spill] sm:$0xff]  ;;  %v2574_v40 = vmul.f32 %v5041_v21, %v2559_v6 }
 0x374   :  { %v2372_v34 = vsel %vm2369_vm3, %v2371_v31, %v2367_v53  ;;  %v2344_v61 = vpop.f32.mrf.mxu3  ;;  %v2608_v31 = vld.sshfl [vmem:[#allocation1 + $0x18] sm:$0xff pattern:$0x75316420] }
 0x375   :  { %v2505_v5 = vperm.slane %v2372_v34, 0  ;;  %v2325_v32 = vadd.f32 %v2324_v29, %v2305_v23  ;;  %v2428_v60 = vadd.f32 %v6048_v59, %v2413_v43 }
 0x377   :  { %v2520_v24 = vmul.f32 %v6043_v58, %v2505_v5  ;;  %v2345_v11 = vadd.f32 %v2344_v61, %v2325_v32  ;;  %v2540_v3 = vadd.f32 1.0, %v2428_v60 }
 0x379   :  { %v2535_v49 = vadd.f32 %v6044_v51, %v2520_v24  ;;  %v2348_v16 = vmul.f32 %v2345_v11, %v5174_v20  ;;  %v2555_v50 = vmul.f32 %v5025_v12, %v2540_v3 }
 0x37b   :  { %v2600_v42 = vadd.f32 1.0, %v2535_v49  ;;  %v2350_v22 = vadd.f32 %v2348_v16, %v5180_v2  ;;  %v2578_v52 = vadd.f32 %v2574_v40, %v2555_v50 }
 0x37d   :  { %v2615_v26 = vmul.f32 %v2607_v38, %v2600_v42  ;;  %v2708_v27 = vmul.f32 -1.442695, %v2350_v22  ;;  %v2625_v34 = vmul.f32 %v5218_v9, %v2578_v52 }
 0x37f   :  { %v2619_v36 = vadd.f32 %v2615_v26, %v5078_v57  ;;  %2771 = vpow2.f32 %v2708_v27 }
 0x381   :  { %v2629_v0 = vmul.f32 %v5220_v47, %v2619_v36 }
 0x383   :  { %v2633_v1 = vadd.f32 %v2629_v0, %v2624_v13 }
 0x385   :  { %v2772_v44 = vpop.eup %2771 }
 0x386   :  { %v2358_v55 = vadd.f32 1.0, %v2772_v44 }
 0x388   :  { %2773 = vrcp.f32 %v2358_v55  ;;  %v2385_v2 = vand.u32 2147483648, %v2358_v55  ;;  %v2383_v57 = vand.u32 2147483647, %v2358_v55  ;;  %vm2379_vm5 = vweird.f32 %v2358_v55 }
 0x38a   :  { %v2386_v14 = vor.u32 1.1754944e-38, %v2385_v2  ;;  %vm2384_vm7 = vcmp.eq.f32.partialorder %v2383_v57, 8.507059e+37 }
 0x38e   :  { %v2774_v20 = vpop.eup %2773 }
 0x38f   :  { %v2375_v17 = vmul.f32 %v2774_v20, %v2358_v55  ;;  %vm2380_vm4 = vweird.f32 %v2774_v20 }
 0x390   :  { %vm2381_vm6 = vmor %vm2379_vm5, %vm2380_vm4 }
 0x391   :  { %v2376_v48 = vsub.f32 1.0, %v2375_v17 }
 0x393   :  { %v2377_v41 = vmul.f32 %v2774_v20, %v2376_v48 }
 0x395   :  { %v2378_v45 = vadd.f32 %v2774_v20, %v2377_v41 }
 0x397   :  { %v2382_v30 = vsel %vm2381_vm6, %v2774_v20, %v2378_v45 }
 0x398   :  { %v2387_v19 = vsel %vm2384_vm7, %v2386_v14, %v2382_v30 }
 0x399   :  { %v2506_v28 = vperm.slane %v2387_v19, 0 }
 0x39b   :  { %v2521_v7 = vmul.f32 %v6049_v54, %v2506_v28 }
 0x39d   :  { %v2536_v46 = vadd.f32 %v6050_v37, %v2521_v7 }
 0x39f   :  { %v2601_v56 = vadd.f32 1.0, %v2536_v46 }
 0x3a1   :  { %v2616_v53 = vmul.f32 %v2608_v31, %v2601_v56 }
 0x3a3   :  { %v2620_v23 = vadd.f32 %v2616_v53, %v5139_v10 }
 0x3a5   :  { %v2630_v4 = vmul.f32 %v5220_v47, %v2620_v23 }
 0x3a7   :  { %v2634_v29 = vadd.f32 %v2630_v4, %v2625_v34 }
 0x3a9   :  { %v2640_v21 = vrot.slane %v2634_v29, 4 }
 0x3ab   :  { %v2642_v12 = vsel %vm165_vm0, %v2633_v1, %v2640_v21 }
 0x3ac   :  { %2646 = vst [vmem:[#allocation15 + $0x8] sm:$0xff] %v2642_v12 }
 0x3ad   :  { %2659 = dma.vmem_to_hbm [thread:$0]  %s2652_s8, 256, %s2654_s24, [#allocation4], %s2944_s16, %s2944_s16, %s2945_s17  }
 0x3ae   :  { %2941 = dma.done.wait [#allocation4], 256  }
 0x3af   :  { %2942 = vsyncadd [#allocation4], 4294967040 }
 0x3b0   :  { %2664 = vsyncpa [#allocation3], 1 }
 0x3b1   :  { %2665 = vsyncpa [#allocation7], 1 }
 0x3b2   :  { %2666 = vsyncpa [#allocation11], 1 }
 0x3b3   :  { %2667 = vsyncpa [#allocation4], 1 }
 0x3b4   :  { %2668 = vsyncpa [#allocation5], 1 }
 0x3b5   :  { %2669 = vsyncpa [#allocation13], 1 }

</bundles_post_ra>
